<compile_context>
chip_gen: v5e
topology: v5e:2x2
jax: 0.10.0
libtpu: 0.0.40
codegen_flags: <defaults>
</compile_context>

<pallas_src>
import functools

import jax
import jax.numpy as jnp
import numpy as np
from jax.experimental import pallas as pl
from jax.experimental.pallas import tpu as pltpu


# ----------------------------------------------------------------------------
# Fused ESPCN kernel: one grid step == (one batch element, one row band).
# ----------------------------------------------------------------------------
def _espcn_fused_kernel(p_ref, w1_ref, b1_ref, w2_ref, b2_ref, w3_ref, b3_ref,
                        w4_ref, b4_ref, o_ref,
                        a1_ref, a2_ref, a3_ref, acc2_ref,
                        *, T, H, W, PADL):
    # p_ref   : (1, 1, (T+6)*W, KH1*KW1*Cin)   im2col patches for conv1 (+halo)
    # w1_ref  : (KH1*KW1*Cin, C1)              b1_ref: (1, C1)
    # w2_ref  : (9, C1, C2)                    b2_ref: (1, C2)
    # w3_ref  : (9, C2, C3)                    b3_ref: (1, C3)
    # w4_ref  : (9, C3, C4)                    b4_ref: (1, C4)
    # o_ref   : (1, T*W, C4)                   conv4 output rows of this band
    # a1/a2/a3: f32 VMEM scratch, W-padded intermediate activations
    # acc2_ref: f32 VMEM accumulator for conv2 (largest layer)
    band = pl.program_id(1)
    cdtype = w1_ref.dtype
    C1 = w1_ref.shape[1]
    C2 = w2_ref.shape[2]
    C3 = w3_ref.shape[2]
    C4 = w4_ref.shape[2]
    R1, R2, R3 = T + 6, T + 4, T + 2          # rows held for conv1/conv2/conv3

    def row_mask(n_rows, start):
        # 1.0 where the global image row index is in [0, H), else 0.0 (this is
        # exactly the vertical zero padding of the following 'same' conv).
        pos = (band * T + start +
               jax.lax.broadcasted_iota(jnp.int32, (n_rows, W), 0))
        m = jnp.logical_and(pos >= 0, pos < H).astype(jnp.float32)
        return m[:, :, None]                   # (n_rows, W, 1)

    def store_padded(dst_ref, val3d):
        # Zero the whole buffer (keeps the W borders == horizontal zero
        # padding), then write the valid WxC interior at a sublane-aligned
        # offset PADL.
        dst_ref[...] = jnp.zeros_like(dst_ref)
        dst_ref[:, PADL:PADL + W, :] = val3d.astype(dst_ref.dtype)

    # ---- conv1: im2col, a single K = KH*KW*Cin matmul, bias + ReLU ----------
    y1 = jnp.dot(p_ref[0, 0], w1_ref[...], preferred_element_type=jnp.float32)
    y1 = jnp.maximum(y1 + b1_ref[0, :], 0.0)
    store_padded(a1_ref, y1.reshape(R1, W, C1) * row_mask(R1, -3))

    # ---- conv2: 3x3, 9 tap-matmuls into a VMEM f32 accumulator --------------
    acc2_ref[...] = jnp.zeros_like(acc2_ref)
    for kh in range(3):
        for kw in range(3):
            patch = a1_ref[kh:kh + R2, PADL - 1 + kw:PADL - 1 + kw + W, :]
            patch = patch.reshape(R2 * W, C1).astype(cdtype)
            acc2_ref[...] += jnp.dot(patch, w2_ref[kh * 3 + kw],
                                     preferred_element_type=jnp.float32)
    y2 = jnp.maximum(acc2_ref[...] + b2_ref[0, :], 0.0)
    store_padded(a2_ref, y2.reshape(R2, W, C2) * row_mask(R2, -2))

    # ---- conv3: 3x3 ----------------------------------------------------------
    acc3 = jnp.zeros((R3 * W, C3), jnp.float32)
    for kh in range(3):
        for kw in range(3):
            patch = a2_ref[kh:kh + R3, PADL - 1 + kw:PADL - 1 + kw + W, :]
            patch = patch.reshape(R3 * W, C2).astype(cdtype)
            acc3 = acc3 + jnp.dot(patch, w3_ref[kh * 3 + kw],
                                  preferred_element_type=jnp.float32)
    y3 = jnp.maximum(acc3 + b3_ref[0, :], 0.0)
    store_padded(a3_ref, y3.reshape(R3, W, C3) * row_mask(R3, -1))

    # ---- conv4: 3x3, no ReLU; store accumulator directly --------------------
    acc4 = jnp.zeros((T * W, C4), jnp.float32)
    for kh in range(3):
        for kw in range(3):
            patch = a3_ref[kh:kh + T, PADL - 1 + kw:PADL - 1 + kw + W, :]
            patch = patch.reshape(T * W, C3).astype(cdtype)
            acc4 = acc4 + jnp.dot(patch, w4_ref[kh * 3 + kw],
                                  preferred_element_type=jnp.float32)
    o_ref[0] = (acc4 + b4_ref[0, :]).astype(o_ref.dtype)


def _pick_tile_h(H, target=8):
    # Largest divisor of H that is <= target and keeps the output block
    # (TILE_H * W rows) sublane-friendly; falls back to the full height.
    for t in range(min(target, H), 0, -1):
        if H % t == 0 and (t % 8 == 0 or t == H):
            return t
    return H


# ----------------------------------------------------------------------------
# ESPCN forward (matches ESPCN_net.forward semantics; NCHW in, NCHW out).
# ----------------------------------------------------------------------------
def espcn_forward(x_nchw, params, upscale_factor=4,
                  compute_dtype=jnp.bfloat16, tile_h=8):
    N, Cin, H, W = x_nchw.shape
    r = upscale_factor
    x = jnp.transpose(x_nchw, (0, 2, 3, 1))             # NCHW -> NHWC

    C1 = params["w1"].shape[0]
    C2 = params["w2"].shape[0]
    C3 = params["w3"].shape[0]
    C4 = params["w4"].shape[0]
    assert params["w1"].shape[1] == Cin and params["w1"].shape[2:] == (5, 5)
    assert params["w2"].shape[2:] == (3, 3)
    assert C4 == Cin * r * r

    T = _pick_tile_h(H, tile_h)      # rows of final conv output per grid step
    nb = H // T
    halo = 3                          # conv2 + conv3 + conv4: one row each side
    R1, R2, R3 = T + 2 * halo, T + 2 * halo - 2, T + 2 * halo - 4

    # --- conv1 im2col patches, banded with a vertical halo (tiny glue) -------
    KH1 = KW1 = 5
    K1 = KH1 * KW1 * Cin
    xp = jnp.pad(x, ((0, 0), (2, 2), (2, 2), (0, 0)))
    cols = [xp[:, kh:kh + H, kw:kw + W, :]
            for kh in range(KH1) for kw in range(KW1)]
    patches = jnp.concatenate(cols, axis=-1)            # (N, H, W, 25*Cin)
    patches = jnp.pad(patches, ((0, 0), (halo, halo), (0, 0), (0, 0)))
    bands = jnp.stack([patches[:, b * T: b * T + R1] for b in range(nb)],
                      axis=1)                           # (N, nb, R1, W, K1)
    bands = bands.reshape(N, nb, R1 * W, K1).astype(compute_dtype)

    # --- weight / bias re-layout (OIHW -> matmul-friendly) -------------------
    w1 = jnp.transpose(params["w1"], (2, 3, 1, 0)).reshape(K1, C1)
    w2 = jnp.transpose(params["w2"], (2, 3, 1, 0)).reshape(9, C1, C2)
    w3 = jnp.transpose(params["w3"], (2, 3, 1, 0)).reshape(9, C2, C3)
    w4 = jnp.transpose(params["w4"], (2, 3, 1, 0)).reshape(9, C3, C4)
    w1, w2, w3, w4 = (w.astype(compute_dtype) for w in (w1, w2, w3, w4))
    b1 = params["b1"].reshape(1, C1).astype(jnp.float32)
    b2 = params["b2"].reshape(1, C2).astype(jnp.float32)
    b3 = params["b3"].reshape(1, C3).astype(jnp.float32)
    b4 = params["b4"].reshape(1, C4).astype(jnp.float32)

    PADL = 8                           # sublane-aligned left zero border
    Wp = PADL + W + 1                  # padded width of scratch activations

    # Explicit VMEM budget check (keeps TILE_H honest on v7x's 64 MiB).
    itemsize = jnp.dtype(compute_dtype).itemsize
    vmem_est = (4 * (R1 * Wp * C1 + R2 * Wp * C2 + R3 * Wp * C3 + R2 * W * C2)
                + 2 * itemsize * R1 * W * K1
                + 2 * 4 * T * W * C4
                + 2 * itemsize * (K1 * C1 + 9 * (C1 * C2 + C2 * C3 + C3 * C4)))
    assert vmem_est < 40 * 1024 * 1024, ("TILE_H too large for VMEM", vmem_est)

    kernel = functools.partial(_espcn_fused_kernel, T=T, H=H, W=W, PADL=PADL)

    out = pl.pallas_call(
        kernel,
        out_shape=jax.ShapeDtypeStruct((N, H * W, C4), x.dtype),
        grid_spec=pltpu.PrefetchScalarGridSpec(
            num_scalar_prefetch=0,
            grid=(N, nb),
            in_specs=[
                pl.BlockSpec((1, 1, R1 * W, K1), lambda n, b: (n, b, 0, 0)),
                pl.BlockSpec((K1, C1), lambda n, b: (0, 0)),
                pl.BlockSpec((1, C1), lambda n, b: (0, 0)),
                pl.BlockSpec((9, C1, C2), lambda n, b: (0, 0, 0)),
                pl.BlockSpec((1, C2), lambda n, b: (0, 0)),
                pl.BlockSpec((9, C2, C3), lambda n, b: (0, 0, 0)),
                pl.BlockSpec((1, C3), lambda n, b: (0, 0)),
                pl.BlockSpec((9, C3, C4), lambda n, b: (0, 0, 0)),
                pl.BlockSpec((1, C4), lambda n, b: (0, 0)),
            ],
            out_specs=pl.BlockSpec((1, T * W, C4), lambda n, b: (n, b, 0)),
            scratch_shapes=[
                pltpu.VMEM((R1, Wp, C1), jnp.float32),
                pltpu.VMEM((R2, Wp, C2), jnp.float32),
                pltpu.VMEM((R3, Wp, C3), jnp.float32),
                pltpu.VMEM((R2 * W, C2), jnp.float32),
            ],
        ),
        compiler_params=pltpu.CompilerParams(
            dimension_semantics=("parallel", "parallel"),
            vmem_limit_bytes=48 * 1024 * 1024,
        ),
    )(bands, w1, b1, w2, b2, w3, b3, w4, b4)

    # PixelShuffle (cheap glue on the final, smallest tensor).
    # Channel index convention matches PyTorch: c*r^2 + i*r + j.
    y = out.reshape(N, H, W, Cin, r, r)
    y = jnp.transpose(y, (0, 3, 1, 4, 2, 5)).reshape(N, Cin, H * r, W * r)
    return y                                             # NCHW


# ----------------------------------------------------------------------------
# Plain-JAX reference (for correctness of the Pallas path).
# ----------------------------------------------------------------------------
def espcn_reference(x, params, r=4):
    def conv(x, w, b):
        ph, pw = w.shape[2] // 2, w.shape[3] // 2
        y = jax.lax.conv_general_dilated(
            x, w, (1, 1), padding=[(ph, ph), (pw, pw)],
            dimension_numbers=("NCHW", "OIHW", "NCHW"))
        return y + b[None, :, None, None]

    x = jax.nn.relu(conv(x, params["w1"], params["b1"]))
    x = jax.nn.relu(conv(x, params["w2"], params["b2"]))
    x = jax.nn.relu(conv(x, params["w3"], params["b3"]))
    x = conv(x, params["w4"], params["b4"])
    N, Cr2, H, W = x.shape
    C = Cr2 // (r * r)
    x = x.reshape(N, C, r, r, H, W).transpose(0, 1, 4, 2, 5, 3)
    return x.reshape(N, C, H * r, W * r)


# ----------------------------------------------------------------------------
# Deterministic synthetic parameters (shapes from ESPCN_net.__init__).
# ----------------------------------------------------------------------------
def make_params(key, in_feats=1, upscale_factor=4, width=1):
    # TODO(synk): PyTorch uses init.orthogonal_ with relu gain; synthetic
    # weights here are scaled-normal (deterministic), not an orthogonal basis.
    shapes = [
        (128 * width, in_feats, 5, 5),
        (128 * width, 128 * width, 3, 3),
        (64 * width, 128 * width, 3, 3),
        (in_feats * upscale_factor ** 2, 64 * width, 3, 3),
    ]
    params = {}
    for i, shp in enumerate(shapes, start=1):
        key, kw_, kb_ = jax.random.split(key, 3)
        cout, cin, kh, kw = shp
        fan_in = cin * kh * kw
        params[f"w{i}"] = (jax.random.normal(kw_, shp, jnp.float32)
                           / jnp.sqrt(jnp.float32(fan_in)))
        params[f"b{i}"] = 0.01 * jax.random.normal(kb_, (cout,), jnp.float32)
    return params


if __name__ == "__main__":
    in_feats, upscale, width = 1, 4, 1
    N, H, W = 2, 16, 16

    key = jax.random.PRNGKey(0)
    kx, kp = jax.random.split(key)
    x = jax.random.normal(kx, (N, in_feats, H, W), jnp.float32)   # NCHW input
    params = make_params(kp, in_feats, upscale, width)

    ref = jax.block_until_ready(espcn_reference(x, params, upscale))

    # f32 path (tight correctness check of the fused/banded kernel).
    fwd32 = jax.jit(functools.partial(espcn_forward, upscale_factor=upscale,
                                      compute_dtype=jnp.float32))
    out32 = jax.block_until_ready(fwd32(x, params))
    assert out32.shape == (N, in_feats, H * upscale, W * upscale), out32.shape
    np.testing.assert_allclose(np.asarray(out32), np.asarray(ref),
                               rtol=2e-3, atol=2e-3)

    # bf16 fast path (bf16 patches/weights on the MXU, f32 accumulation).
    fwd16 = jax.jit(functools.partial(espcn_forward, upscale_factor=upscale,
                                      compute_dtype=jnp.bfloat16))
    out16 = jax.block_until_ready(fwd16(x, params))
    assert out16.shape == (N, in_feats, H * upscale, W * upscale), out16.shape
    np.testing.assert_allclose(np.asarray(out16), np.asarray(ref),
                               rtol=6e-2, atol=6e-2)

    print("KERNEL_OK")
</pallas_src>

<mosaic_0001>
module attributes {stable_mosaic.version = 11 : i64} {
  func.func @_espcn_fused_kernel(%arg0: i32, %arg1: i32, %arg2: memref<1x1x224x25xf32, #tpu.memory_space<vmem>>, %arg3: memref<25x128xf32, #tpu.memory_space<vmem>>, %arg4: memref<1x128xf32, #tpu.memory_space<vmem>>, %arg5: memref<9x128x128xf32, #tpu.memory_space<vmem>>, %arg6: memref<1x128xf32, #tpu.memory_space<vmem>>, %arg7: memref<9x128x64xf32, #tpu.memory_space<vmem>>, %arg8: memref<1x64xf32, #tpu.memory_space<vmem>>, %arg9: memref<9x64x16xf32, #tpu.memory_space<vmem>>, %arg10: memref<1x16xf32, #tpu.memory_space<vmem>>, %arg11: memref<1x128x16xf32, #tpu.memory_space<vmem>>, %arg12: memref<14x25x128xf32, #tpu.memory_space<vmem>>, %arg13: memref<12x25x128xf32, #tpu.memory_space<vmem>>, %arg14: memref<10x25x64xf32, #tpu.memory_space<vmem>>, %arg15: memref<192x128xf32, #tpu.memory_space<vmem>>) attributes {dimension_semantics = [#tpu.dimension_semantics<parallel>, #tpu.dimension_semantics<parallel>], iteration_bounds = array<i64: 2, 2>, scalar_prefetch = 0 : i64, scratch_operands = 4 : i64, tpu.core_type = #tpu.core_type<tc>, window_params = [{transform_indices = @transform_0, window_bounds = array<i64: 1, 1, 224, 25>}, {pipeline_mode = #tpu.pipeline_mode<synchronous>, transform_indices = @transform_1, window_bounds = array<i64: 25, 128>}, {pipeline_mode = #tpu.pipeline_mode<synchronous>, transform_indices = @transform_2, window_bounds = array<i64: 1, 128>}, {pipeline_mode = #tpu.pipeline_mode<synchronous>, transform_indices = @transform_3, window_bounds = array<i64: 9, 128, 128>}, {pipeline_mode = #tpu.pipeline_mode<synchronous>, transform_indices = @transform_4, window_bounds = array<i64: 1, 128>}, {pipeline_mode = #tpu.pipeline_mode<synchronous>, transform_indices = @transform_5, window_bounds = array<i64: 9, 128, 64>}, {pipeline_mode = #tpu.pipeline_mode<synchronous>, transform_indices = @transform_6, window_bounds = array<i64: 1, 64>}, {pipeline_mode = #tpu.pipeline_mode<synchronous>, transform_indices = @transform_7, window_bounds = array<i64: 9, 64, 16>}, {pipeline_mode = #tpu.pipeline_mode<synchronous>, transform_indices = @transform_8, window_bounds = array<i64: 1, 16>}, {transform_indices = @transform_9, window_bounds = array<i64: 1, 128, 16>}]} {
    %c0 = arith.constant 0 : index
    %c0_0 = arith.constant 0 : index
    %c0_1 = arith.constant 0 : index
    %c0_2 = arith.constant 0 : index
    %0 = vector.load %arg2[%c0, %c0_0, %c0_1, %c0_2] : memref<1x1x224x25xf32, #tpu.memory_space<vmem>>, vector<1x1x224x25xf32>
    %1 = vector.shape_cast %0 : vector<1x1x224x25xf32> to vector<224x25xf32>
    %c0_3 = arith.constant 0 : index
    %c0_4 = arith.constant 0 : index
    %2 = vector.load %arg3[%c0_3, %c0_4] : memref<25x128xf32, #tpu.memory_space<vmem>>, vector<25x128xf32>
    %cst = arith.constant dense<0.000000e+00> : vector<224x128xf32>
    %3 = tpu.matmul %1, %2, %cst {dimension_numbers = #tpu.dot_dimension_numbers<[1], [0], [0], [1], [0, 0, 1, 1], [], []>} : vector<224x25xf32>, vector<25x128xf32>, vector<224x128xf32> -> vector<224x128xf32>
    %c0_5 = arith.constant 0 : index
    %c0_6 = arith.constant 0 : index
    %4 = vector.load %arg4[%c0_5, %c0_6] : memref<1x128xf32, #tpu.memory_space<vmem>>, vector<1x128xf32>
    %5 = vector.shape_cast %4 : vector<1x128xf32> to vector<128xf32>
    %6 = vector.shape_cast %5 : vector<128xf32> to vector<1x128xf32>
    %7 = vector.broadcast %6 : vector<1x128xf32> to vector<224x128xf32>
    %8 = arith.addf %3, %7 : vector<224x128xf32>
    %cst_7 = arith.constant 0.000000e+00 : f32
    %9 = vector.broadcast %cst_7 : f32 to vector<224x128xf32>
    %10 = arith.maximumf %8, %9 : vector<224x128xf32>
    %11 = vector.shape_cast %10 : vector<224x128xf32> to vector<14x16x128xf32>
    %c8_i32 = arith.constant 8 : i32
    %12 = arith.muli %arg1, %c8_i32 : i32
    %c-3_i32 = arith.constant -3 : i32
    %13 = arith.addi %12, %c-3_i32 : i32
    %14 = tpu.iota {dimensions = array<i32: 0>} : vector<14x16xi32>
    %15 = vector.broadcast %13 : i32 to vector<14x16xi32>
    %16 = arith.addi %15, %14 : vector<14x16xi32>
    %c0_i32 = arith.constant 0 : i32
    %17 = vector.broadcast %c0_i32 : i32 to vector<14x16xi32>
    %18 = arith.cmpi sge, %16, %17 : vector<14x16xi32>
    %c16_i32 = arith.constant 16 : i32
    %19 = vector.broadcast %c16_i32 : i32 to vector<14x16xi32>
    %20 = arith.cmpi slt, %16, %19 : vector<14x16xi32>
    %21 = arith.andi %18, %20 : vector<14x16xi1>
    %22 = arith.extui %21 : vector<14x16xi1> to vector<14x16xi32>
    %23 = arith.sitofp %22 : vector<14x16xi32> to vector<14x16xf32>
    %24 = vector.shape_cast %23 : vector<14x16xf32> to vector<14x16x1xf32>
    %25 = vector.broadcast %24 : vector<14x16x1xf32> to vector<14x16x128xf32>
    %26 = arith.mulf %11, %25 : vector<14x16x128xf32>
    %cst_8 = arith.constant 0.000000e+00 : f32
    %27 = vector.broadcast %cst_8 : f32 to vector<14x25x128xf32>
    %c0_9 = arith.constant 0 : index
    %c0_10 = arith.constant 0 : index
    %c0_11 = arith.constant 0 : index
    %28 = vector.load %arg12[%c0_9, %c0_10, %c0_11] : memref<14x25x128xf32, #tpu.memory_space<vmem>>, vector<14x25x128xf32>
    tpu.vector_store %arg12[%c0_9, %c0_10, %c0_11], %27 {strides = array<i32>} : memref<14x25x128xf32, #tpu.memory_space<vmem>>, vector<14x25x128xf32>,
    %c0_12 = arith.constant 0 : index
    %c8 = arith.constant 8 : index
    %c0_13 = arith.constant 0 : index
    %29 = vector.load %arg12[%c0_12, %c8, %c0_13] : memref<14x25x128xf32, #tpu.memory_space<vmem>>, vector<14x16x128xf32>
    tpu.vector_store %arg12[%c0_12, %c8, %c0_13], %26 {strides = array<i32>} : memref<14x25x128xf32, #tpu.memory_space<vmem>>, vector<14x16x128xf32>,
    %cst_14 = arith.constant 0.000000e+00 : f32
    %30 = vector.broadcast %cst_14 : f32 to vector<192x128xf32>
    %c0_15 = arith.constant 0 : index
    %c0_16 = arith.constant 0 : index
    %31 = vector.load %arg15[%c0_15, %c0_16] : memref<192x128xf32, #tpu.memory_space<vmem>>, vector<192x128xf32>
    tpu.vector_store %arg15[%c0_15, %c0_16], %30 {strides = array<i32>} : memref<192x128xf32, #tpu.memory_space<vmem>>, vector<192x128xf32>,
    %c0_17 = arith.constant 0 : index
    %c7 = arith.constant 7 : index
    %c0_18 = arith.constant 0 : index
    %32 = vector.load %arg12[%c0_17, %c7, %c0_18] : memref<14x25x128xf32, #tpu.memory_space<vmem>>, vector<12x16x128xf32>
    %33 = vector.shape_cast %32 : vector<12x16x128xf32> to vector<192x128xf32>
    %c0_19 = arith.constant 0 : index
    %c0_20 = arith.constant 0 : index
    %34 = vector.load %arg15[%c0_19, %c0_20] : memref<192x128xf32, #tpu.memory_space<vmem>>, vector<192x128xf32>
    %c0_21 = arith.constant 0 : index
    %c0_22 = arith.constant 0 : index
    %c0_23 = arith.constant 0 : index
    %35 = vector.load %arg5[%c0_21, %c0_22, %c0_23] : memref<9x128x128xf32, #tpu.memory_space<vmem>>, vector<1x128x128xf32>
    %36 = vector.shape_cast %35 : vector<1x128x128xf32> to vector<128x128xf32>
    %cst_24 = arith.constant dense<0.000000e+00> : vector<192x128xf32>
    %37 = tpu.matmul %33, %36, %cst_24 {dimension_numbers = #tpu.dot_dimension_numbers<[1], [0], [0], [1], [0, 0, 1, 1], [], []>} : vector<192x128xf32>, vector<128x128xf32>, vector<192x128xf32> -> vector<192x128xf32>
    %38 = arith.addf %34, %37 : vector<192x128xf32>
    %c0_25 = arith.constant 0 : index
    %c0_26 = arith.constant 0 : index
    %39 = vector.load %arg15[%c0_25, %c0_26] : memref<192x128xf32, #tpu.memory_space<vmem>>, vector<192x128xf32>
    tpu.vector_store %arg15[%c0_25, %c0_26], %38 {strides = array<i32>} : memref<192x128xf32, #tpu.memory_space<vmem>>, vector<192x128xf32>,
    %c0_27 = arith.constant 0 : index
    %c8_28 = arith.constant 8 : index
    %c0_29 = arith.constant 0 : index
    %40 = vector.load %arg12[%c0_27, %c8_28, %c0_29] : memref<14x25x128xf32, #tpu.memory_space<vmem>>, vector<12x16x128xf32>
    %41 = vector.shape_cast %40 : vector<12x16x128xf32> to vector<192x128xf32>
    %c0_30 = arith.constant 0 : index
    %c0_31 = arith.constant 0 : index
    %42 = vector.load %arg15[%c0_30, %c0_31] : memref<192x128xf32, #tpu.memory_space<vmem>>, vector<192x128xf32>
    %c1 = arith.constant 1 : index
    %c0_32 = arith.constant 0 : index
    %c0_33 = arith.constant 0 : index
    %43 = vector.load %arg5[%c1, %c0_32, %c0_33] : memref<9x128x128xf32, #tpu.memory_space<vmem>>, vector<1x128x128xf32>
    %44 = vector.shape_cast %43 : vector<1x128x128xf32> to vector<128x128xf32>
    %cst_34 = arith.constant dense<0.000000e+00> : vector<192x128xf32>
    %45 = tpu.matmul %41, %44, %cst_34 {dimension_numbers = #tpu.dot_dimension_numbers<[1], [0], [0], [1], [0, 0, 1, 1], [], []>} : vector<192x128xf32>, vector<128x128xf32>, vector<192x128xf32> -> vector<192x128xf32>
    %46 = arith.addf %42, %45 : vector<192x128xf32>
    %c0_35 = arith.constant 0 : index
    %c0_36 = arith.constant 0 : index
    %47 = vector.load %arg15[%c0_35, %c0_36] : memref<192x128xf32, #tpu.memory_space<vmem>>, vector<192x128xf32>
    tpu.vector_store %arg15[%c0_35, %c0_36], %46 {strides = array<i32>} : memref<192x128xf32, #tpu.memory_space<vmem>>, vector<192x128xf32>,
    %c0_37 = arith.constant 0 : index
    %c9 = arith.constant 9 : index
    %c0_38 = arith.constant 0 : index
    %48 = vector.load %arg12[%c0_37, %c9, %c0_38] : memref<14x25x128xf32, #tpu.memory_space<vmem>>, vector<12x16x128xf32>
    %49 = vector.shape_cast %48 : vector<12x16x128xf32> to vector<192x128xf32>
    %c0_39 = arith.constant 0 : index
    %c0_40 = arith.constant 0 : index
    %50 = vector.load %arg15[%c0_39, %c0_40] : memref<192x128xf32, #tpu.memory_space<vmem>>, vector<192x128xf32>
    %c2 = arith.constant 2 : index
    %c0_41 = arith.constant 0 : index
    %c0_42 = arith.constant 0 : index
    %51 = vector.load %arg5[%c2, %c0_41, %c0_42] : memref<9x128x128xf32, #tpu.memory_space<vmem>>, vector<1x128x128xf32>
    %52 = vector.shape_cast %51 : vector<1x128x128xf32> to vector<128x128xf32>
    %cst_43 = arith.constant dense<0.000000e+00> : vector<192x128xf32>
    %53 = tpu.matmul %49, %52, %cst_43 {dimension_numbers = #tpu.dot_dimension_numbers<[1], [0], [0], [1], [0, 0, 1, 1], [], []>} : vector<192x128xf32>, vector<128x128xf32>, vector<192x128xf32> -> vector<192x128xf32>
    %54 = arith.addf %50, %53 : vector<192x128xf32>
    %c0_44 = arith.constant 0 : index
    %c0_45 = arith.constant 0 : index
    %55 = vector.load %arg15[%c0_44, %c0_45] : memref<192x128xf32, #tpu.memory_space<vmem>>, vector<192x128xf32>
    tpu.vector_store %arg15[%c0_44, %c0_45], %54 {strides = array<i32>} : memref<192x128xf32, #tpu.memory_space<vmem>>, vector<192x128xf32>,
    %c1_46 = arith.constant 1 : index
    %c7_47 = arith.constant 7 : index
    %c0_48 = arith.constant 0 : index
    %56 = vector.load %arg12[%c1_46, %c7_47, %c0_48] : memref<14x25x128xf32, #tpu.memory_space<vmem>>, vector<12x16x128xf32>
    %57 = vector.shape_cast %56 : vector<12x16x128xf32> to vector<192x128xf32>
    %c0_49 = arith.constant 0 : index
    %c0_50 = arith.constant 0 : index
    %58 = vector.load %arg15[%c0_49, %c0_50] : memref<192x128xf32, #tpu.memory_space<vmem>>, vector<192x128xf32>
    %c3 = arith.constant 3 : index
    %c0_51 = arith.constant 0 : index
    %c0_52 = arith.constant 0 : index
    %59 = vector.load %arg5[%c3, %c0_51, %c0_52] : memref<9x128x128xf32, #tpu.memory_space<vmem>>, vector<1x128x128xf32>
    %60 = vector.shape_cast %59 : vector<1x128x128xf32> to vector<128x128xf32>
    %cst_53 = arith.constant dense<0.000000e+00> : vector<192x128xf32>
    %61 = tpu.matmul %57, %60, %cst_53 {dimension_numbers = #tpu.dot_dimension_numbers<[1], [0], [0], [1], [0, 0, 1, 1], [], []>} : vector<192x128xf32>, vector<128x128xf32>, vector<192x128xf32> -> vector<192x128xf32>
    %62 = arith.addf %58, %61 : vector<192x128xf32>
    %c0_54 = arith.constant 0 : index
    %c0_55 = arith.constant 0 : index
    %63 = vector.load %arg15[%c0_54, %c0_55] : memref<192x128xf32, #tpu.memory_space<vmem>>, vector<192x128xf32>
    tpu.vector_store %arg15[%c0_54, %c0_55], %62 {strides = array<i32>} : memref<192x128xf32, #tpu.memory_space<vmem>>, vector<192x128xf32>,
    %c1_56 = arith.constant 1 : index
    %c8_57 = arith.constant 8 : index
    %c0_58 = arith.constant 0 : index
    %64 = vector.load %arg12[%c1_56, %c8_57, %c0_58] : memref<14x25x128xf32, #tpu.memory_space<vmem>>, vector<12x16x128xf32>
    %65 = vector.shape_cast %64 : vector<12x16x128xf32> to vector<192x128xf32>
    %c0_59 = arith.constant 0 : index
    %c0_60 = arith.constant 0 : index
    %66 = vector.load %arg15[%c0_59, %c0_60] : memref<192x128xf32, #tpu.memory_space<vmem>>, vector<192x128xf32>
    %c4 = arith.constant 4 : index
    %c0_61 = arith.constant 0 : index
    %c0_62 = arith.constant 0 : index
    %67 = vector.load %arg5[%c4, %c0_61, %c0_62] : memref<9x128x128xf32, #tpu.memory_space<vmem>>, vector<1x128x128xf32>
    %68 = vector.shape_cast %67 : vector<1x128x128xf32> to vector<128x128xf32>
    %cst_63 = arith.constant dense<0.000000e+00> : vector<192x128xf32>
    %69 = tpu.matmul %65, %68, %cst_63 {dimension_numbers = #tpu.dot_dimension_numbers<[1], [0], [0], [1], [0, 0, 1, 1], [], []>} : vector<192x128xf32>, vector<128x128xf32>, vector<192x128xf32> -> vector<192x128xf32>
    %70 = arith.addf %66, %69 : vector<192x128xf32>
    %c0_64 = arith.constant 0 : index
    %c0_65 = arith.constant 0 : index
    %71 = vector.load %arg15[%c0_64, %c0_65] : memref<192x128xf32, #tpu.memory_space<vmem>>, vector<192x128xf32>
    tpu.vector_store %arg15[%c0_64, %c0_65], %70 {strides = array<i32>} : memref<192x128xf32, #tpu.memory_space<vmem>>, vector<192x128xf32>,
    %c1_66 = arith.constant 1 : index
    %c9_67 = arith.constant 9 : index
    %c0_68 = arith.constant 0 : index
    %72 = vector.load %arg12[%c1_66, %c9_67, %c0_68] : memref<14x25x128xf32, #tpu.memory_space<vmem>>, vector<12x16x128xf32>
    %73 = vector.shape_cast %72 : vector<12x16x128xf32> to vector<192x128xf32>
    %c0_69 = arith.constant 0 : index
    %c0_70 = arith.constant 0 : index
    %74 = vector.load %arg15[%c0_69, %c0_70] : memref<192x128xf32, #tpu.memory_space<vmem>>, vector<192x128xf32>
    %c5 = arith.constant 5 : index
    %c0_71 = arith.constant 0 : index
    %c0_72 = arith.constant 0 : index
    %75 = vector.load %arg5[%c5, %c0_71, %c0_72] : memref<9x128x128xf32, #tpu.memory_space<vmem>>, vector<1x128x128xf32>
    %76 = vector.shape_cast %75 : vector<1x128x128xf32> to vector<128x128xf32>
    %cst_73 = arith.constant dense<0.000000e+00> : vector<192x128xf32>
    %77 = tpu.matmul %73, %76, %cst_73 {dimension_numbers = #tpu.dot_dimension_numbers<[1], [0], [0], [1], [0, 0, 1, 1], [], []>} : vector<192x128xf32>, vector<128x128xf32>, vector<192x128xf32> -> vector<192x128xf32>
    %78 = arith.addf %74, %77 : vector<192x128xf32>
    %c0_74 = arith.constant 0 : index
    %c0_75 = arith.constant 0 : index
    %79 = vector.load %arg15[%c0_74, %c0_75] : memref<192x128xf32, #tpu.memory_space<vmem>>, vector<192x128xf32>
    tpu.vector_store %arg15[%c0_74, %c0_75], %78 {strides = array<i32>} : memref<192x128xf32, #tpu.memory_space<vmem>>, vector<192x128xf32>,
    %c2_76 = arith.constant 2 : index
    %c7_77 = arith.constant 7 : index
    %c0_78 = arith.constant 0 : index
    %80 = vector.load %arg12[%c2_76, %c7_77, %c0_78] : memref<14x25x128xf32, #tpu.memory_space<vmem>>, vector<12x16x128xf32>
    %81 = vector.shape_cast %80 : vector<12x16x128xf32> to vector<192x128xf32>
    %c0_79 = arith.constant 0 : index
    %c0_80 = arith.constant 0 : index
    %82 = vector.load %arg15[%c0_79, %c0_80] : memref<192x128xf32, #tpu.memory_space<vmem>>, vector<192x128xf32>
    %c6 = arith.constant 6 : index
    %c0_81 = arith.constant 0 : index
    %c0_82 = arith.constant 0 : index
    %83 = vector.load %arg5[%c6, %c0_81, %c0_82] : memref<9x128x128xf32, #tpu.memory_space<vmem>>, vector<1x128x128xf32>
    %84 = vector.shape_cast %83 : vector<1x128x128xf32> to vector<128x128xf32>
    %cst_83 = arith.constant dense<0.000000e+00> : vector<192x128xf32>
    %85 = tpu.matmul %81, %84, %cst_83 {dimension_numbers = #tpu.dot_dimension_numbers<[1], [0], [0], [1], [0, 0, 1, 1], [], []>} : vector<192x128xf32>, vector<128x128xf32>, vector<192x128xf32> -> vector<192x128xf32>
    %86 = arith.addf %82, %85 : vector<192x128xf32>
    %c0_84 = arith.constant 0 : index
    %c0_85 = arith.constant 0 : index
    %87 = vector.load %arg15[%c0_84, %c0_85] : memref<192x128xf32, #tpu.memory_space<vmem>>, vector<192x128xf32>
    tpu.vector_store %arg15[%c0_84, %c0_85], %86 {strides = array<i32>} : memref<192x128xf32, #tpu.memory_space<vmem>>, vector<192x128xf32>,
    %c2_86 = arith.constant 2 : index
    %c8_87 = arith.constant 8 : index
    %c0_88 = arith.constant 0 : index
    %88 = vector.load %arg12[%c2_86, %c8_87, %c0_88] : memref<14x25x128xf32, #tpu.memory_space<vmem>>, vector<12x16x128xf32>
    %89 = vector.shape_cast %88 : vector<12x16x128xf32> to vector<192x128xf32>
    %c0_89 = arith.constant 0 : index
    %c0_90 = arith.constant 0 : index
    %90 = vector.load %arg15[%c0_89, %c0_90] : memref<192x128xf32, #tpu.memory_space<vmem>>, vector<192x128xf32>
    %c7_91 = arith.constant 7 : index
    %c0_92 = arith.constant 0 : index
    %c0_93 = arith.constant 0 : index
    %91 = vector.load %arg5[%c7_91, %c0_92, %c0_93] : memref<9x128x128xf32, #tpu.memory_space<vmem>>, vector<1x128x128xf32>
    %92 = vector.shape_cast %91 : vector<1x128x128xf32> to vector<128x128xf32>
    %cst_94 = arith.constant dense<0.000000e+00> : vector<192x128xf32>
    %93 = tpu.matmul %89, %92, %cst_94 {dimension_numbers = #tpu.dot_dimension_numbers<[1], [0], [0], [1], [0, 0, 1, 1], [], []>} : vector<192x128xf32>, vector<128x128xf32>, vector<192x128xf32> -> vector<192x128xf32>
    %94 = arith.addf %90, %93 : vector<192x128xf32>
    %c0_95 = arith.constant 0 : index
    %c0_96 = arith.constant 0 : index
    %95 = vector.load %arg15[%c0_95, %c0_96] : memref<192x128xf32, #tpu.memory_space<vmem>>, vector<192x128xf32>
    tpu.vector_store %arg15[%c0_95, %c0_96], %94 {strides = array<i32>} : memref<192x128xf32, #tpu.memory_space<vmem>>, vector<192x128xf32>,
    %c2_97 = arith.constant 2 : index
    %c9_98 = arith.constant 9 : index
    %c0_99 = arith.constant 0 : index
    %96 = vector.load %arg12[%c2_97, %c9_98, %c0_99] : memref<14x25x128xf32, #tpu.memory_space<vmem>>, vector<12x16x128xf32>
    %97 = vector.shape_cast %96 : vector<12x16x128xf32> to vector<192x128xf32>
    %c0_100 = arith.constant 0 : index
    %c0_101 = arith.constant 0 : index
    %98 = vector.load %arg15[%c0_100, %c0_101] : memref<192x128xf32, #tpu.memory_space<vmem>>, vector<192x128xf32>
    %c8_102 = arith.constant 8 : index
    %c0_103 = arith.constant 0 : index
    %c0_104 = arith.constant 0 : index
    %99 = vector.load %arg5[%c8_102, %c0_103, %c0_104] : memref<9x128x128xf32, #tpu.memory_space<vmem>>, vector<1x128x128xf32>
    %100 = vector.shape_cast %99 : vector<1x128x128xf32> to vector<128x128xf32>
    %cst_105 = arith.constant dense<0.000000e+00> : vector<192x128xf32>
    %101 = tpu.matmul %97, %100, %cst_105 {dimension_numbers = #tpu.dot_dimension_numbers<[1], [0], [0], [1], [0, 0, 1, 1], [], []>} : vector<192x128xf32>, vector<128x128xf32>, vector<192x128xf32> -> vector<192x128xf32>
    %102 = arith.addf %98, %101 : vector<192x128xf32>
    %c0_106 = arith.constant 0 : index
    %c0_107 = arith.constant 0 : index
    %103 = vector.load %arg15[%c0_106, %c0_107] : memref<192x128xf32, #tpu.memory_space<vmem>>, vector<192x128xf32>
    tpu.vector_store %arg15[%c0_106, %c0_107], %102 {strides = array<i32>} : memref<192x128xf32, #tpu.memory_space<vmem>>, vector<192x128xf32>,
    %c0_108 = arith.constant 0 : index
    %c0_109 = arith.constant 0 : index
    %104 = vector.load %arg15[%c0_108, %c0_109] : memref<192x128xf32, #tpu.memory_space<vmem>>, vector<192x128xf32>
    %c0_110 = arith.constant 0 : index
    %c0_111 = arith.constant 0 : index
    %105 = vector.load %arg6[%c0_110, %c0_111] : memref<1x128xf32, #tpu.memory_space<vmem>>, vector<1x128xf32>
    %106 = vector.shape_cast %105 : vector<1x128xf32> to vector<128xf32>
    %107 = vector.shape_cast %106 : vector<128xf32> to vector<1x128xf32>
    %108 = vector.broadcast %107 : vector<1x128xf32> to vector<192x128xf32>
    %109 = arith.addf %104, %108 : vector<192x128xf32>
    %cst_112 = arith.constant 0.000000e+00 : f32
    %110 = vector.broadcast %cst_112 : f32 to vector<192x128xf32>
    %111 = arith.maximumf %109, %110 : vector<192x128xf32>
    %112 = vector.shape_cast %111 : vector<192x128xf32> to vector<12x16x128xf32>
    %c8_i32_113 = arith.constant 8 : i32
    %113 = arith.muli %arg1, %c8_i32_113 : i32
    %c-2_i32 = arith.constant -2 : i32
    %114 = arith.addi %113, %c-2_i32 : i32
    %115 = tpu.iota {dimensions = array<i32: 0>} : vector<12x16xi32>
    %116 = vector.broadcast %114 : i32 to vector<12x16xi32>
    %117 = arith.addi %116, %115 : vector<12x16xi32>
    %c0_i32_114 = arith.constant 0 : i32
    %118 = vector.broadcast %c0_i32_114 : i32 to vector<12x16xi32>
    %119 = arith.cmpi sge, %117, %118 : vector<12x16xi32>
    %c16_i32_115 = arith.constant 16 : i32
    %120 = vector.broadcast %c16_i32_115 : i32 to vector<12x16xi32>
    %121 = arith.cmpi slt, %117, %120 : vector<12x16xi32>
    %122 = arith.andi %119, %121 : vector<12x16xi1>
    %123 = arith.extui %122 : vector<12x16xi1> to vector<12x16xi32>
    %124 = arith.sitofp %123 : vector<12x16xi32> to vector<12x16xf32>
    %125 = vector.shape_cast %124 : vector<12x16xf32> to vector<12x16x1xf32>
    %126 = vector.broadcast %125 : vector<12x16x1xf32> to vector<12x16x128xf32>
    %127 = arith.mulf %112, %126 : vector<12x16x128xf32>
    %cst_116 = arith.constant 0.000000e+00 : f32
    %128 = vector.broadcast %cst_116 : f32 to vector<12x25x128xf32>
    %c0_117 = arith.constant 0 : index
    %c0_118 = arith.constant 0 : index
    %c0_119 = arith.constant 0 : index
    %129 = vector.load %arg13[%c0_117, %c0_118, %c0_119] : memref<12x25x128xf32, #tpu.memory_space<vmem>>, vector<12x25x128xf32>
    tpu.vector_store %arg13[%c0_117, %c0_118, %c0_119], %128 {strides = array<i32>} : memref<12x25x128xf32, #tpu.memory_space<vmem>>, vector<12x25x128xf32>,
    %c0_120 = arith.constant 0 : index
    %c8_121 = arith.constant 8 : index
    %c0_122 = arith.constant 0 : index
    %130 = vector.load %arg13[%c0_120, %c8_121, %c0_122] : memref<12x25x128xf32, #tpu.memory_space<vmem>>, vector<12x16x128xf32>
    tpu.vector_store %arg13[%c0_120, %c8_121, %c0_122], %127 {strides = array<i32>} : memref<12x25x128xf32, #tpu.memory_space<vmem>>, vector<12x16x128xf32>,
    %cst_123 = arith.constant 0.000000e+00 : f32
    %131 = vector.broadcast %cst_123 : f32 to vector<160x64xf32>
    %c0_124 = arith.constant 0 : index
    %c7_125 = arith.constant 7 : index
    %c0_126 = arith.constant 0 : index
    %132 = vector.load %arg13[%c0_124, %c7_125, %c0_126] : memref<12x25x128xf32, #tpu.memory_space<vmem>>, vector<10x16x128xf32>
    %133 = vector.shape_cast %132 : vector<10x16x128xf32> to vector<160x128xf32>
    %c0_127 = arith.constant 0 : index
    %c0_128 = arith.constant 0 : index
    %c0_129 = arith.constant 0 : index
    %134 = vector.load %arg7[%c0_127, %c0_128, %c0_129] : memref<9x128x64xf32, #tpu.memory_space<vmem>>, vector<1x128x64xf32>
    %135 = vector.shape_cast %134 : vector<1x128x64xf32> to vector<128x64xf32>
    %cst_130 = arith.constant dense<0.000000e+00> : vector<160x64xf32>
    %136 = tpu.matmul %133, %135, %cst_130 {dimension_numbers = #tpu.dot_dimension_numbers<[1], [0], [0], [1], [0, 0, 1, 1], [], []>} : vector<160x128xf32>, vector<128x64xf32>, vector<160x64xf32> -> vector<160x64xf32>
    %137 = arith.addf %131, %136 : vector<160x64xf32>
    %c0_131 = arith.constant 0 : index
    %c8_132 = arith.constant 8 : index
    %c0_133 = arith.constant 0 : index
    %138 = vector.load %arg13[%c0_131, %c8_132, %c0_133] : memref<12x25x128xf32, #tpu.memory_space<vmem>>, vector<10x16x128xf32>
    %139 = vector.shape_cast %138 : vector<10x16x128xf32> to vector<160x128xf32>
    %c1_134 = arith.constant 1 : index
    %c0_135 = arith.constant 0 : index
    %c0_136 = arith.constant 0 : index
    %140 = vector.load %arg7[%c1_134, %c0_135, %c0_136] : memref<9x128x64xf32, #tpu.memory_space<vmem>>, vector<1x128x64xf32>
    %141 = vector.shape_cast %140 : vector<1x128x64xf32> to vector<128x64xf32>
    %cst_137 = arith.constant dense<0.000000e+00> : vector<160x64xf32>
    %142 = tpu.matmul %139, %141, %cst_137 {dimension_numbers = #tpu.dot_dimension_numbers<[1], [0], [0], [1], [0, 0, 1, 1], [], []>} : vector<160x128xf32>, vector<128x64xf32>, vector<160x64xf32> -> vector<160x64xf32>
    %143 = arith.addf %137, %142 : vector<160x64xf32>
    %c0_138 = arith.constant 0 : index
    %c9_139 = arith.constant 9 : index
    %c0_140 = arith.constant 0 : index
    %144 = vector.load %arg13[%c0_138, %c9_139, %c0_140] : memref<12x25x128xf32, #tpu.memory_space<vmem>>, vector<10x16x128xf32>
    %145 = vector.shape_cast %144 : vector<10x16x128xf32> to vector<160x128xf32>
    %c2_141 = arith.constant 2 : index
    %c0_142 = arith.constant 0 : index
    %c0_143 = arith.constant 0 : index
    %146 = vector.load %arg7[%c2_141, %c0_142, %c0_143] : memref<9x128x64xf32, #tpu.memory_space<vmem>>, vector<1x128x64xf32>
    %147 = vector.shape_cast %146 : vector<1x128x64xf32> to vector<128x64xf32>
    %cst_144 = arith.constant dense<0.000000e+00> : vector<160x64xf32>
    %148 = tpu.matmul %145, %147, %cst_144 {dimension_numbers = #tpu.dot_dimension_numbers<[1], [0], [0], [1], [0, 0, 1, 1], [], []>} : vector<160x128xf32>, vector<128x64xf32>, vector<160x64xf32> -> vector<160x64xf32>
    %149 = arith.addf %143, %148 : vector<160x64xf32>
    %c1_145 = arith.constant 1 : index
    %c7_146 = arith.constant 7 : index
    %c0_147 = arith.constant 0 : index
    %150 = vector.load %arg13[%c1_145, %c7_146, %c0_147] : memref<12x25x128xf32, #tpu.memory_space<vmem>>, vector<10x16x128xf32>
    %151 = vector.shape_cast %150 : vector<10x16x128xf32> to vector<160x128xf32>
    %c3_148 = arith.constant 3 : index
    %c0_149 = arith.constant 0 : index
    %c0_150 = arith.constant 0 : index
    %152 = vector.load %arg7[%c3_148, %c0_149, %c0_150] : memref<9x128x64xf32, #tpu.memory_space<vmem>>, vector<1x128x64xf32>
    %153 = vector.shape_cast %152 : vector<1x128x64xf32> to vector<128x64xf32>
    %cst_151 = arith.constant dense<0.000000e+00> : vector<160x64xf32>
    %154 = tpu.matmul %151, %153, %cst_151 {dimension_numbers = #tpu.dot_dimension_numbers<[1], [0], [0], [1], [0, 0, 1, 1], [], []>} : vector<160x128xf32>, vector<128x64xf32>, vector<160x64xf32> -> vector<160x64xf32>
    %155 = arith.addf %149, %154 : vector<160x64xf32>
    %c1_152 = arith.constant 1 : index
    %c8_153 = arith.constant 8 : index
    %c0_154 = arith.constant 0 : index
    %156 = vector.load %arg13[%c1_152, %c8_153, %c0_154] : memref<12x25x128xf32, #tpu.memory_space<vmem>>, vector<10x16x128xf32>
    %157 = vector.shape_cast %156 : vector<10x16x128xf32> to vector<160x128xf32>
    %c4_155 = arith.constant 4 : index
    %c0_156 = arith.constant 0 : index
    %c0_157 = arith.constant 0 : index
    %158 = vector.load %arg7[%c4_155, %c0_156, %c0_157] : memref<9x128x64xf32, #tpu.memory_space<vmem>>, vector<1x128x64xf32>
    %159 = vector.shape_cast %158 : vector<1x128x64xf32> to vector<128x64xf32>
    %cst_158 = arith.constant dense<0.000000e+00> : vector<160x64xf32>
    %160 = tpu.matmul %157, %159, %cst_158 {dimension_numbers = #tpu.dot_dimension_numbers<[1], [0], [0], [1], [0, 0, 1, 1], [], []>} : vector<160x128xf32>, vector<128x64xf32>, vector<160x64xf32> -> vector<160x64xf32>
    %161 = arith.addf %155, %160 : vector<160x64xf32>
    %c1_159 = arith.constant 1 : index
    %c9_160 = arith.constant 9 : index
    %c0_161 = arith.constant 0 : index
    %162 = vector.load %arg13[%c1_159, %c9_160, %c0_161] : memref<12x25x128xf32, #tpu.memory_space<vmem>>, vector<10x16x128xf32>
    %163 = vector.shape_cast %162 : vector<10x16x128xf32> to vector<160x128xf32>
    %c5_162 = arith.constant 5 : index
    %c0_163 = arith.constant 0 : index
    %c0_164 = arith.constant 0 : index
    %164 = vector.load %arg7[%c5_162, %c0_163, %c0_164] : memref<9x128x64xf32, #tpu.memory_space<vmem>>, vector<1x128x64xf32>
    %165 = vector.shape_cast %164 : vector<1x128x64xf32> to vector<128x64xf32>
    %cst_165 = arith.constant dense<0.000000e+00> : vector<160x64xf32>
    %166 = tpu.matmul %163, %165, %cst_165 {dimension_numbers = #tpu.dot_dimension_numbers<[1], [0], [0], [1], [0, 0, 1, 1], [], []>} : vector<160x128xf32>, vector<128x64xf32>, vector<160x64xf32> -> vector<160x64xf32>
    %167 = arith.addf %161, %166 : vector<160x64xf32>
    %c2_166 = arith.constant 2 : index
    %c7_167 = arith.constant 7 : index
    %c0_168 = arith.constant 0 : index
    %168 = vector.load %arg13[%c2_166, %c7_167, %c0_168] : memref<12x25x128xf32, #tpu.memory_space<vmem>>, vector<10x16x128xf32>
    %169 = vector.shape_cast %168 : vector<10x16x128xf32> to vector<160x128xf32>
    %c6_169 = arith.constant 6 : index
    %c0_170 = arith.constant 0 : index
    %c0_171 = arith.constant 0 : index
    %170 = vector.load %arg7[%c6_169, %c0_170, %c0_171] : memref<9x128x64xf32, #tpu.memory_space<vmem>>, vector<1x128x64xf32>
    %171 = vector.shape_cast %170 : vector<1x128x64xf32> to vector<128x64xf32>
    %cst_172 = arith.constant dense<0.000000e+00> : vector<160x64xf32>
    %172 = tpu.matmul %169, %171, %cst_172 {dimension_numbers = #tpu.dot_dimension_numbers<[1], [0], [0], [1], [0, 0, 1, 1], [], []>} : vector<160x128xf32>, vector<128x64xf32>, vector<160x64xf32> -> vector<160x64xf32>
    %173 = arith.addf %167, %172 : vector<160x64xf32>
    %c2_173 = arith.constant 2 : index
    %c8_174 = arith.constant 8 : index
    %c0_175 = arith.constant 0 : index
    %174 = vector.load %arg13[%c2_173, %c8_174, %c0_175] : memref<12x25x128xf32, #tpu.memory_space<vmem>>, vector<10x16x128xf32>
    %175 = vector.shape_cast %174 : vector<10x16x128xf32> to vector<160x128xf32>
    %c7_176 = arith.constant 7 : index
    %c0_177 = arith.constant 0 : index
    %c0_178 = arith.constant 0 : index
    %176 = vector.load %arg7[%c7_176, %c0_177, %c0_178] : memref<9x128x64xf32, #tpu.memory_space<vmem>>, vector<1x128x64xf32>
    %177 = vector.shape_cast %176 : vector<1x128x64xf32> to vector<128x64xf32>
    %cst_179 = arith.constant dense<0.000000e+00> : vector<160x64xf32>
    %178 = tpu.matmul %175, %177, %cst_179 {dimension_numbers = #tpu.dot_dimension_numbers<[1], [0], [0], [1], [0, 0, 1, 1], [], []>} : vector<160x128xf32>, vector<128x64xf32>, vector<160x64xf32> -> vector<160x64xf32>
    %179 = arith.addf %173, %178 : vector<160x64xf32>
    %c2_180 = arith.constant 2 : index
    %c9_181 = arith.constant 9 : index
    %c0_182 = arith.constant 0 : index
    %180 = vector.load %arg13[%c2_180, %c9_181, %c0_182] : memref<12x25x128xf32, #tpu.memory_space<vmem>>, vector<10x16x128xf32>
    %181 = vector.shape_cast %180 : vector<10x16x128xf32> to vector<160x128xf32>
    %c8_183 = arith.constant 8 : index
    %c0_184 = arith.constant 0 : index
    %c0_185 = arith.constant 0 : index
    %182 = vector.load %arg7[%c8_183, %c0_184, %c0_185] : memref<9x128x64xf32, #tpu.memory_space<vmem>>, vector<1x128x64xf32>
    %183 = vector.shape_cast %182 : vector<1x128x64xf32> to vector<128x64xf32>
    %cst_186 = arith.constant dense<0.000000e+00> : vector<160x64xf32>
    %184 = tpu.matmul %181, %183, %cst_186 {dimension_numbers = #tpu.dot_dimension_numbers<[1], [0], [0], [1], [0, 0, 1, 1], [], []>} : vector<160x128xf32>, vector<128x64xf32>, vector<160x64xf32> -> vector<160x64xf32>
    %185 = arith.addf %179, %184 : vector<160x64xf32>
    %c0_187 = arith.constant 0 : index
    %c0_188 = arith.constant 0 : index
    %186 = vector.load %arg8[%c0_187, %c0_188] : memref<1x64xf32, #tpu.memory_space<vmem>>, vector<1x64xf32>
    %187 = vector.shape_cast %186 : vector<1x64xf32> to vector<64xf32>
    %188 = vector.shape_cast %187 : vector<64xf32> to vector<1x64xf32>
    %189 = vector.broadcast %188 : vector<1x64xf32> to vector<160x64xf32>
    %190 = arith.addf %185, %189 : vector<160x64xf32>
    %cst_189 = arith.constant 0.000000e+00 : f32
    %191 = vector.broadcast %cst_189 : f32 to vector<160x64xf32>
    %192 = arith.maximumf %190, %191 : vector<160x64xf32>
    %193 = vector.shape_cast %192 : vector<160x64xf32> to vector<10x16x64xf32>
    %c8_i32_190 = arith.constant 8 : i32
    %194 = arith.muli %arg1, %c8_i32_190 : i32
    %c-1_i32 = arith.constant -1 : i32
    %195 = arith.addi %194, %c-1_i32 : i32
    %196 = tpu.iota {dimensions = array<i32: 0>} : vector<10x16xi32>
    %197 = vector.broadcast %195 : i32 to vector<10x16xi32>
    %198 = arith.addi %197, %196 : vector<10x16xi32>
    %c0_i32_191 = arith.constant 0 : i32
    %199 = vector.broadcast %c0_i32_191 : i32 to vector<10x16xi32>
    %200 = arith.cmpi sge, %198, %199 : vector<10x16xi32>
    %c16_i32_192 = arith.constant 16 : i32
    %201 = vector.broadcast %c16_i32_192 : i32 to vector<10x16xi32>
    %202 = arith.cmpi slt, %198, %201 : vector<10x16xi32>
    %203 = arith.andi %200, %202 : vector<10x16xi1>
    %204 = arith.extui %203 : vector<10x16xi1> to vector<10x16xi32>
    %205 = arith.sitofp %204 : vector<10x16xi32> to vector<10x16xf32>
    %206 = vector.shape_cast %205 : vector<10x16xf32> to vector<10x16x1xf32>
    %207 = vector.broadcast %206 : vector<10x16x1xf32> to vector<10x16x64xf32>
    %208 = arith.mulf %193, %207 : vector<10x16x64xf32>
    %cst_193 = arith.constant 0.000000e+00 : f32
    %209 = vector.broadcast %cst_193 : f32 to vector<10x25x64xf32>
    %c0_194 = arith.constant 0 : index
    %c0_195 = arith.constant 0 : index
    %c0_196 = arith.constant 0 : index
    %210 = vector.load %arg14[%c0_194, %c0_195, %c0_196] : memref<10x25x64xf32, #tpu.memory_space<vmem>>, vector<10x25x64xf32>
    tpu.vector_store %arg14[%c0_194, %c0_195, %c0_196], %209 {strides = array<i32>} : memref<10x25x64xf32, #tpu.memory_space<vmem>>, vector<10x25x64xf32>,
    %c0_197 = arith.constant 0 : index
    %c8_198 = arith.constant 8 : index
    %c0_199 = arith.constant 0 : index
    %211 = vector.load %arg14[%c0_197, %c8_198, %c0_199] : memref<10x25x64xf32, #tpu.memory_space<vmem>>, vector<10x16x64xf32>
    tpu.vector_store %arg14[%c0_197, %c8_198, %c0_199], %208 {strides = array<i32>} : memref<10x25x64xf32, #tpu.memory_space<vmem>>, vector<10x16x64xf32>,
    %cst_200 = arith.constant 0.000000e+00 : f32
    %212 = vector.broadcast %cst_200 : f32 to vector<128x16xf32>
    %c0_201 = arith.constant 0 : index
    %c7_202 = arith.constant 7 : index
    %c0_203 = arith.constant 0 : index
    %213 = vector.load %arg14[%c0_201, %c7_202, %c0_203] : memref<10x25x64xf32, #tpu.memory_space<vmem>>, vector<8x16x64xf32>
    %214 = vector.shape_cast %213 : vector<8x16x64xf32> to vector<128x64xf32>
    %c0_204 = arith.constant 0 : index
    %c0_205 = arith.constant 0 : index
    %c0_206 = arith.constant 0 : index
    %215 = vector.load %arg9[%c0_204, %c0_205, %c0_206] : memref<9x64x16xf32, #tpu.memory_space<vmem>>, vector<1x64x16xf32>
    %216 = vector.shape_cast %215 : vector<1x64x16xf32> to vector<64x16xf32>
    %cst_207 = arith.constant dense<0.000000e+00> : vector<128x16xf32>
    %217 = tpu.matmul %214, %216, %cst_207 {dimension_numbers = #tpu.dot_dimension_numbers<[1], [0], [0], [1], [0, 0, 1, 1], [], []>} : vector<128x64xf32>, vector<64x16xf32>, vector<128x16xf32> -> vector<128x16xf32>
    %218 = arith.addf %212, %217 : vector<128x16xf32>
    %c0_208 = arith.constant 0 : index
    %c8_209 = arith.constant 8 : index
    %c0_210 = arith.constant 0 : index
    %219 = vector.load %arg14[%c0_208, %c8_209, %c0_210] : memref<10x25x64xf32, #tpu.memory_space<vmem>>, vector<8x16x64xf32>
    %220 = vector.shape_cast %219 : vector<8x16x64xf32> to vector<128x64xf32>
    %c1_211 = arith.constant 1 : index
    %c0_212 = arith.constant 0 : index
    %c0_213 = arith.constant 0 : index
    %221 = vector.load %arg9[%c1_211, %c0_212, %c0_213] : memref<9x64x16xf32, #tpu.memory_space<vmem>>, vector<1x64x16xf32>
    %222 = vector.shape_cast %221 : vector<1x64x16xf32> to vector<64x16xf32>
    %cst_214 = arith.constant dense<0.000000e+00> : vector<128x16xf32>
    %223 = tpu.matmul %220, %222, %cst_214 {dimension_numbers = #tpu.dot_dimension_numbers<[1], [0], [0], [1], [0, 0, 1, 1], [], []>} : vector<128x64xf32>, vector<64x16xf32>, vector<128x16xf32> -> vector<128x16xf32>
    %224 = arith.addf %218, %223 : vector<128x16xf32>
    %c0_215 = arith.constant 0 : index
    %c9_216 = arith.constant 9 : index
    %c0_217 = arith.constant 0 : index
    %225 = vector.load %arg14[%c0_215, %c9_216, %c0_217] : memref<10x25x64xf32, #tpu.memory_space<vmem>>, vector<8x16x64xf32>
    %226 = vector.shape_cast %225 : vector<8x16x64xf32> to vector<128x64xf32>
    %c2_218 = arith.constant 2 : index
    %c0_219 = arith.constant 0 : index
    %c0_220 = arith.constant 0 : index
    %227 = vector.load %arg9[%c2_218, %c0_219, %c0_220] : memref<9x64x16xf32, #tpu.memory_space<vmem>>, vector<1x64x16xf32>
    %228 = vector.shape_cast %227 : vector<1x64x16xf32> to vector<64x16xf32>
    %cst_221 = arith.constant dense<0.000000e+00> : vector<128x16xf32>
    %229 = tpu.matmul %226, %228, %cst_221 {dimension_numbers = #tpu.dot_dimension_numbers<[1], [0], [0], [1], [0, 0, 1, 1], [], []>} : vector<128x64xf32>, vector<64x16xf32>, vector<128x16xf32> -> vector<128x16xf32>
    %230 = arith.addf %224, %229 : vector<128x16xf32>
    %c1_222 = arith.constant 1 : index
    %c7_223 = arith.constant 7 : index
    %c0_224 = arith.constant 0 : index
    %231 = vector.load %arg14[%c1_222, %c7_223, %c0_224] : memref<10x25x64xf32, #tpu.memory_space<vmem>>, vector<8x16x64xf32>
    %232 = vector.shape_cast %231 : vector<8x16x64xf32> to vector<128x64xf32>
    %c3_225 = arith.constant 3 : index
    %c0_226 = arith.constant 0 : index
    %c0_227 = arith.constant 0 : index
    %233 = vector.load %arg9[%c3_225, %c0_226, %c0_227] : memref<9x64x16xf32, #tpu.memory_space<vmem>>, vector<1x64x16xf32>
    %234 = vector.shape_cast %233 : vector<1x64x16xf32> to vector<64x16xf32>
    %cst_228 = arith.constant dense<0.000000e+00> : vector<128x16xf32>
    %235 = tpu.matmul %232, %234, %cst_228 {dimension_numbers = #tpu.dot_dimension_numbers<[1], [0], [0], [1], [0, 0, 1, 1], [], []>} : vector<128x64xf32>, vector<64x16xf32>, vector<128x16xf32> -> vector<128x16xf32>
    %236 = arith.addf %230, %235 : vector<128x16xf32>
    %c1_229 = arith.constant 1 : index
    %c8_230 = arith.constant 8 : index
    %c0_231 = arith.constant 0 : index
    %237 = vector.load %arg14[%c1_229, %c8_230, %c0_231] : memref<10x25x64xf32, #tpu.memory_space<vmem>>, vector<8x16x64xf32>
    %238 = vector.shape_cast %237 : vector<8x16x64xf32> to vector<128x64xf32>
    %c4_232 = arith.constant 4 : index
    %c0_233 = arith.constant 0 : index
    %c0_234 = arith.constant 0 : index
    %239 = vector.load %arg9[%c4_232, %c0_233, %c0_234] : memref<9x64x16xf32, #tpu.memory_space<vmem>>, vector<1x64x16xf32>
    %240 = vector.shape_cast %239 : vector<1x64x16xf32> to vector<64x16xf32>
    %cst_235 = arith.constant dense<0.000000e+00> : vector<128x16xf32>
    %241 = tpu.matmul %238, %240, %cst_235 {dimension_numbers = #tpu.dot_dimension_numbers<[1], [0], [0], [1], [0, 0, 1, 1], [], []>} : vector<128x64xf32>, vector<64x16xf32>, vector<128x16xf32> -> vector<128x16xf32>
    %242 = arith.addf %236, %241 : vector<128x16xf32>
    %c1_236 = arith.constant 1 : index
    %c9_237 = arith.constant 9 : index
    %c0_238 = arith.constant 0 : index
    %243 = vector.load %arg14[%c1_236, %c9_237, %c0_238] : memref<10x25x64xf32, #tpu.memory_space<vmem>>, vector<8x16x64xf32>
    %244 = vector.shape_cast %243 : vector<8x16x64xf32> to vector<128x64xf32>
    %c5_239 = arith.constant 5 : index
    %c0_240 = arith.constant 0 : index
    %c0_241 = arith.constant 0 : index
    %245 = vector.load %arg9[%c5_239, %c0_240, %c0_241] : memref<9x64x16xf32, #tpu.memory_space<vmem>>, vector<1x64x16xf32>
    %246 = vector.shape_cast %245 : vector<1x64x16xf32> to vector<64x16xf32>
    %cst_242 = arith.constant dense<0.000000e+00> : vector<128x16xf32>
    %247 = tpu.matmul %244, %246, %cst_242 {dimension_numbers = #tpu.dot_dimension_numbers<[1], [0], [0], [1], [0, 0, 1, 1], [], []>} : vector<128x64xf32>, vector<64x16xf32>, vector<128x16xf32> -> vector<128x16xf32>
    %248 = arith.addf %242, %247 : vector<128x16xf32>
    %c2_243 = arith.constant 2 : index
    %c7_244 = arith.constant 7 : index
    %c0_245 = arith.constant 0 : index
    %249 = vector.load %arg14[%c2_243, %c7_244, %c0_245] : memref<10x25x64xf32, #tpu.memory_space<vmem>>, vector<8x16x64xf32>
    %250 = vector.shape_cast %249 : vector<8x16x64xf32> to vector<128x64xf32>
    %c6_246 = arith.constant 6 : index
    %c0_247 = arith.constant 0 : index
    %c0_248 = arith.constant 0 : index
    %251 = vector.load %arg9[%c6_246, %c0_247, %c0_248] : memref<9x64x16xf32, #tpu.memory_space<vmem>>, vector<1x64x16xf32>
    %252 = vector.shape_cast %251 : vector<1x64x16xf32> to vector<64x16xf32>
    %cst_249 = arith.constant dense<0.000000e+00> : vector<128x16xf32>
    %253 = tpu.matmul %250, %252, %cst_249 {dimension_numbers = #tpu.dot_dimension_numbers<[1], [0], [0], [1], [0, 0, 1, 1], [], []>} : vector<128x64xf32>, vector<64x16xf32>, vector<128x16xf32> -> vector<128x16xf32>
    %254 = arith.addf %248, %253 : vector<128x16xf32>
    %c2_250 = arith.constant 2 : index
    %c8_251 = arith.constant 8 : index
    %c0_252 = arith.constant 0 : index
    %255 = vector.load %arg14[%c2_250, %c8_251, %c0_252] : memref<10x25x64xf32, #tpu.memory_space<vmem>>, vector<8x16x64xf32>
    %256 = vector.shape_cast %255 : vector<8x16x64xf32> to vector<128x64xf32>
    %c7_253 = arith.constant 7 : index
    %c0_254 = arith.constant 0 : index
    %c0_255 = arith.constant 0 : index
    %257 = vector.load %arg9[%c7_253, %c0_254, %c0_255] : memref<9x64x16xf32, #tpu.memory_space<vmem>>, vector<1x64x16xf32>
    %258 = vector.shape_cast %257 : vector<1x64x16xf32> to vector<64x16xf32>
    %cst_256 = arith.constant dense<0.000000e+00> : vector<128x16xf32>
    %259 = tpu.matmul %256, %258, %cst_256 {dimension_numbers = #tpu.dot_dimension_numbers<[1], [0], [0], [1], [0, 0, 1, 1], [], []>} : vector<128x64xf32>, vector<64x16xf32>, vector<128x16xf32> -> vector<128x16xf32>
    %260 = arith.addf %254, %259 : vector<128x16xf32>
    %c2_257 = arith.constant 2 : index
    %c9_258 = arith.constant 9 : index
    %c0_259 = arith.constant 0 : index
    %261 = vector.load %arg14[%c2_257, %c9_258, %c0_259] : memref<10x25x64xf32, #tpu.memory_space<vmem>>, vector<8x16x64xf32>
    %262 = vector.shape_cast %261 : vector<8x16x64xf32> to vector<128x64xf32>
    %c8_260 = arith.constant 8 : index
    %c0_261 = arith.constant 0 : index
    %c0_262 = arith.constant 0 : index
    %263 = vector.load %arg9[%c8_260, %c0_261, %c0_262] : memref<9x64x16xf32, #tpu.memory_space<vmem>>, vector<1x64x16xf32>
    %264 = vector.shape_cast %263 : vector<1x64x16xf32> to vector<64x16xf32>
    %cst_263 = arith.constant dense<0.000000e+00> : vector<128x16xf32>
    %265 = tpu.matmul %262, %264, %cst_263 {dimension_numbers = #tpu.dot_dimension_numbers<[1], [0], [0], [1], [0, 0, 1, 1], [], []>} : vector<128x64xf32>, vector<64x16xf32>, vector<128x16xf32> -> vector<128x16xf32>
    %266 = arith.addf %260, %265 : vector<128x16xf32>
    %c0_264 = arith.constant 0 : index
    %c0_265 = arith.constant 0 : index
    %267 = vector.load %arg10[%c0_264, %c0_265] : memref<1x16xf32, #tpu.memory_space<vmem>>, vector<1x16xf32>
    %268 = vector.shape_cast %267 : vector<1x16xf32> to vector<16xf32>
    %269 = vector.shape_cast %268 : vector<16xf32> to vector<1x16xf32>
    %270 = vector.broadcast %269 : vector<1x16xf32> to vector<128x16xf32>
    %271 = arith.addf %266, %270 : vector<128x16xf32>
    %c0_266 = arith.constant 0 : index
    %c0_267 = arith.constant 0 : index
    %c0_268 = arith.constant 0 : index
    %272 = vector.load %arg11[%c0_266, %c0_267, %c0_268] : memref<1x128x16xf32, #tpu.memory_space<vmem>>, vector<1x128x16xf32>
    %273 = vector.shape_cast %272 : vector<1x128x16xf32> to vector<128x16xf32>
    %274 = vector.shape_cast %271 : vector<128x16xf32> to vector<1x128x16xf32>
    tpu.vector_store %arg11[%c0_266, %c0_267, %c0_268], %274 {strides = array<i32>} : memref<1x128x16xf32, #tpu.memory_space<vmem>>, vector<1x128x16xf32>,
    return
  }
  func.func @transform_0(%arg0: i32, %arg1: i32) -> (i32, i32, i32, i32) {
    %c0_i32 = arith.constant 0 : i32
    %c0_i32_0 = arith.constant 0 : i32
    %c0_i32_1 = arith.constant 0 : i32
    return %arg0, %arg1, %c0_i32, %c0_i32_0 : i32, i32, i32, i32
  }
  func.func @transform_1(%arg0: i32, %arg1: i32) -> (i32, i32) {
    %c0_i32 = arith.constant 0 : i32
    %c0_i32_0 = arith.constant 0 : i32
    %c0_i32_1 = arith.constant 0 : i32
    return %c0_i32, %c0_i32_0 : i32, i32
  }
  func.func @transform_2(%arg0: i32, %arg1: i32) -> (i32, i32) {
    %c0_i32 = arith.constant 0 : i32
    %c0_i32_0 = arith.constant 0 : i32
    %c0_i32_1 = arith.constant 0 : i32
    return %c0_i32, %c0_i32_0 : i32, i32
  }
  func.func @transform_3(%arg0: i32, %arg1: i32) -> (i32, i32, i32) {
    %c0_i32 = arith.constant 0 : i32
    %c0_i32_0 = arith.constant 0 : i32
    %c0_i32_1 = arith.constant 0 : i32
    %c0_i32_2 = arith.constant 0 : i32
    return %c0_i32, %c0_i32_0, %c0_i32_1 : i32, i32, i32
  }
  func.func @transform_4(%arg0: i32, %arg1: i32) -> (i32, i32) {
    %c0_i32 = arith.constant 0 : i32
    %c0_i32_0 = arith.constant 0 : i32
    %c0_i32_1 = arith.constant 0 : i32
    return %c0_i32, %c0_i32_0 : i32, i32
  }
  func.func @transform_5(%arg0: i32, %arg1: i32) -> (i32, i32, i32) {
    %c0_i32 = arith.constant 0 : i32
    %c0_i32_0 = arith.constant 0 : i32
    %c0_i32_1 = arith.constant 0 : i32
    %c0_i32_2 = arith.constant 0 : i32
    return %c0_i32, %c0_i32_0, %c0_i32_1 : i32, i32, i32
  }
  func.func @transform_6(%arg0: i32, %arg1: i32) -> (i32, i32) {
    %c0_i32 = arith.constant 0 : i32
    %c0_i32_0 = arith.constant 0 : i32
    %c0_i32_1 = arith.constant 0 : i32
    return %c0_i32, %c0_i32_0 : i32, i32
  }
  func.func @transform_7(%arg0: i32, %arg1: i32) -> (i32, i32, i32) {
    %c0_i32 = arith.constant 0 : i32
    %c0_i32_0 = arith.constant 0 : i32
    %c0_i32_1 = arith.constant 0 : i32
    %c0_i32_2 = arith.constant 0 : i32
    return %c0_i32, %c0_i32_0, %c0_i32_1 : i32, i32, i32
  }
  func.func @transform_8(%arg0: i32, %arg1: i32) -> (i32, i32) {
    %c0_i32 = arith.constant 0 : i32
    %c0_i32_0 = arith.constant 0 : i32
    %c0_i32_1 = arith.constant 0 : i32
    return %c0_i32, %c0_i32_0 : i32, i32
  }
  func.func @transform_9(%arg0: i32, %arg1: i32) -> (i32, i32, i32) {
    %c0_i32 = arith.constant 0 : i32
    %c0_i32_0 = arith.constant 0 : i32
    return %arg0, %arg1, %c0_i32 : i32, i32, i32
  }
}

</mosaic_0001>

<bundles_post_ra>
// kernel: espcn_forward.1
= control target key start
LH: loop header
LB: loop body
LE: loop exit
PB: predicated region body
PF: predicated region fallthrough
CT: control target
= control target key end

     0   :  { %s6281_s30 = smov 0   ;;  %s6283_s10 = smov 0   ;;  %s9756_s0 = inlined_call_operand.vmem [shape: f32[2,2,224,25], index: 0, kind: input, shape index: {}]   ;;  %s9757_s1 = inlined_call_operand.vmem [shape: f32[25,128], index: 1, kind: input, shape index: {}]   ;;  %s9758_s2 = inlined_call_operand.vmem [shape: f32[1,128], index: 2, kind: input, shape index: {}]   ;;  %s9759_s3 = inlined_call_operand.vmem [shape: f32[9,128,128], index: 3, kind: input, shape index: {}]   ;;  %s9760_s4 = inlined_call_operand.vmem [shape: f32[1,128], index: 4, kind: input, shape index: {}]   ;;  %s9761_s5 = inlined_call_operand.vmem [shape: f32[9,128,64], index: 5, kind: input, shape index: {}]   ;;  %s9762_s6 = inlined_call_operand.vmem [shape: f32[1,64], index: 6, kind: input, shape index: {}]   ;;  %s9763_s7 = inlined_call_operand.vmem [shape: f32[9,64,16], index: 7, kind: input, shape index: {}]   ;;  %s9764_s8 = inlined_call_operand.vmem [shape: f32[1,16], index: 8, kind: input, shape index: {}]   ;;  %s9765_s9 = inlined_call_operand.vmem [shape: f32[2,256,16], index: 9, kind: output, shape index: {}]  }
   0x1   :  { %s6285_s11 = smov 0   ;;  %s6287_s12 = smov 0  }
   0x2   :  { %s6289_s13 = smov 0  }
   0x3 LB: > { %s28_s14 = sadd.s32 1, %s6220_s11  ;;  %s31_s15 = sadd.s32 1, %s6224_s12  ;;  %s6228_s13 = sphi %s6289_s13, %s19_s13   ;;  %s6224_s12 = sphi %s6287_s12, %s9963_s12   ;;  %s6220_s11 = sphi %s6285_s11, %s9962_s11   ;;  %s6216_s10 = sphi %s6283_s10, %s9961_s10   ;;  %s6212_s30 = sphi %s6281_s30, %s9960_s30  }
   0x4   : > { %p29_p0 = scmp.ge.s32.totalorder %s28_s14, 2  ;;  %p5615_p1 = scmp.ge.s32.totalorder %s6228_s13, 1 }
   0x5   : > { %p307_p2 = scmp.lt.s32.totalorder %s6228_s13, 5 }
   0x6   : > { %s9965_s14 = smov (%p29_p0, %s28_s14), 0  ;;  %s9967_s15 = smov (!%p29_p0, %s31_s15), %s6224_s12 }
   0x7   : > { %p308_p3 = pnand %p5615_p1, %p307_p2  ;;  %p33_p4 = scmp.ge.s32.totalorder %s9967_s15, 2 }
   0x9   : > { %s9969_s15 = smov (%p33_p4, %s9967_s15), 0  ;;  %311 = sbr.rel (%p308_p3) target bundleno = 1684 (0x694), region = 56 }
   0xe   : > { %v401_v0 = vld [vmem:[%s9757_s1 + $0x18] sm:$0x1]  ;;  %vm491_vm0 = vcmask 1040384   ;;  %v400_v1 = vld [vmem:[%s9757_s1 + $0x10] sm:$0xff]  ;;  %p351_p5 = scmp.lt.s32.totalorder %s6216_s10, 1  ;;  %p353_p6 = scmp.lt.s32.totalorder %s6212_s30, 1  ;;  %v626_v54 = vlaneseq }
   0xf   : > { %5620 = vmatpush.msk.msra.mxu0 %vm491_vm0, %v401_v0  ;;  %v399_v2 = vld [vmem:[%s9757_s1 + $0x8] sm:$0xff]  ;;  %v398_v3 = vld [vmem:[%s9757_s1] sm:$0xff]  ;;  %vm406_vm1 = vcmask 203776   ;;  %v5667_v13 = vld [vmem:[%s9759_s3 + $0xf8] sm:$0xff]  ;;  %v6230_v45 = vmov 0.0   ;;  %s6475_s21 = sshll.u32 %s6212_s30, 3 }
  0x10   : > { %s9971_s10 = smov (!%p351_p5, %s6216_s10), 1  ;;  %1058 = vmatpush.msra.mxu2 %v5667_v13  ;;  %v5666_v15 = vld [vmem:[%s9759_s3 + $0xf0] sm:$0xff]  ;;  %v855_v16 = vld [vmem:[%s9759_s3 + $0x78] sm:$0xff]  ;;  %v5665_v18 = vld [vmem:[%s9759_s3 + $0xe8] sm:$0xff]  ;;  %684 = vst [vmem:[#allocation2] sm:$0xff] %v6230_v45  ;;  %v6496_v59 = vshrl.u32 %v626_v54, 7 }
  0x11   : > { %508 = vmatpush.msra.mxu0 %v400_v1  ;;  %s354_s22 = scalar_select %p353_p6, %s6212_s30, 1  ;;  %v854_v17 = vld [vmem:[%s9759_s3 + $0x70] sm:$0xff]  ;;  %856 = vmatpush.msra.mxu1 %v855_v16  ;;  %v5664_v19 = vld [vmem:[%s9759_s3 + $0xe0] sm:$0xff]  ;;  %v5663_v20 = vld [vmem:[%s9759_s3 + $0xd8] sm:$0xff]  ;;  %687 = vst [vmem:[#allocation2 + $0x18] sm:$0x1] %v6230_v45 }
  0x12   : > { %s6139_s25 = smul.u32 56, %s9971_s10  ;;  %1059 = vmatpush.msra.mxu2 %v5666_v15  ;;  %v5662_v22 = vld [vmem:[%s9759_s3 + $0xd0] sm:$0xff]  ;;  %v853_v23 = vld [vmem:[%s9759_s3 + $0x68] sm:$0xff]  ;;  %v852_v24 = vld [vmem:[%s9759_s3 + $0x60] sm:$0xff]  ;;  %688 = vst [vmem:[#allocation2 + $0x20] sm:$0xff] %v6230_v45  ;;  %s2687_s24 = sadd.s32 4294967294, %s6475_s21 }
  0x13   : > { %509 = vmatpush.msra.mxu0 %v399_v2  ;;  %s6138_s26 = smul.u32 28, %s354_s22  ;;  %857 = vmatpush.msra.mxu1 %v854_v17  ;;  %v5683_v25 = vld [vmem:[%s9759_s3 + $0x178] sm:$0xff]  ;;  %v5682_v26 = vld [vmem:[%s9759_s3 + $0x170] sm:$0xff]  ;;  %v5661_v28 = vld [vmem:[%s9759_s3 + $0xc8] sm:$0xff]  ;;  %691 = vst [vmem:[#allocation2 + $0x38] sm:$0x1] %v6230_v45 }
  0x14   : > { %1060 = vmatpush.msra.mxu2 %v5665_v18  ;;  %v851_v27 = vld [vmem:[%s9759_s3 + $0x58] sm:$0xff]  ;;  %1260 = vmatpush.msra.mxu3 %v5683_v25  ;;  %v5660_v29 = vld [vmem:[%s9759_s3 + $0xc0] sm:$0xff]  ;;  %v850_v30 = vld [vmem:[%s9759_s3 + $0x50] sm:$0xff]  ;;  %692 = vst [vmem:[#allocation2 + $0x40] sm:$0xff] %v6230_v45  ;;  %vm4064_vm14 = vcmask 523264   ;;  %s5617_s23 = sshll.u32 %s6212_s30, 4 }
  0x15   : > { %510 = vmatpush.msra.mxu0 %v398_v3  ;;  %s357_s27 = sadd.s32 %s6139_s25, %s6138_s26  ;;  %858 = vmatpush.msra.mxu1 %v853_v23  ;;  %v5659_v31 = vld [vmem:[%s9759_s3 + $0xb8] sm:$0xff]  ;;  %v5658_v33 = vld [vmem:[%s9759_s3 + $0xb0] sm:$0xff]  ;;  %v849_v34 = vld [vmem:[%s9759_s3 + $0x48] sm:$0xff]  ;;  %695 = vst [vmem:[#allocation2 + $0x58] sm:$0x1] %v6230_v45  ;;  %s625_s26 = sadd.s32 4294967293, %s6475_s21 }
  0x16   : > { %s5616_s28 = sshll.u32 %s357_s27, 3  ;;  %1061 = vmatpush.msra.mxu2 %v5664_v19  ;;  %1261 = vmatpush.msra.mxu3 %v5682_v26  ;;  %v5681_v35 = vld [vmem:[%s9759_s3 + $0x168] sm:$0xff]  ;;  %v848_v36 = vld [vmem:[%s9759_s3 + $0x40] sm:$0xff]  ;;  %v847_v40 = vld [vmem:[%s9759_s3 + $0x38] sm:$0xff]  ;;  %696 = vst [vmem:[#allocation2 + $0x60] sm:$0xff] %v6230_v45  ;;  %v6499_v60 = vstv %s625_s26  ;;  %p363_p7 = scmp.lt.s32.totalorder %s5617_s23, 31 }
  0x17   : > { %s6333_s17 = scalar_lea.vmem %s9756_s0, %s5616_s28  ;;  %859 = vmatpush.msra.mxu1 %v852_v24  ;;  %v5680_v37 = vld [vmem:[%s9759_s3 + $0x160] sm:$0xff]  ;;  %v5657_v38 = vld [vmem:[%s9759_s3 + $0xa8] sm:$0xff]  ;;  %v5679_v41 = vld [vmem:[%s9759_s3 + $0x158] sm:$0xff]  ;;  %699 = vst [vmem:[#allocation2 + $0x78] sm:$0x1] %v6230_v45  ;;  %v630_v1 = vadd.s32 %v6499_v60, %v6496_v59 }
  0x18   : > { %v370_v4 = vld [vmem:[%s6333_s17] sm:$0xff]  ;;  %v371_v5 = vld [vmem:[%s6333_s17 + $0x8] sm:$0xff]  ;;  %v372_v6 = vld [vmem:[%s6333_s17 + $0x10] sm:$0xff]  ;;  %1062 = vmatpush.msra.mxu2 %v5663_v20  ;;  %1262 = vmatpush.msra.mxu3 %v5681_v35  ;;  %700 = vst [vmem:[#allocation2 + $0x80] sm:$0xff] %v6230_v45  ;;  %s9973_s23 = smov (!%p363_p7, %s5617_s23), 31 }
  0x19   : > { %5621 = vmatmul.msk.f32.vlgmr.msra.gmra.mxu0 %vm406_vm1, %v370_v4  ;;  %v373_v7 = vld [vmem:[%s6333_s17 + $0x18] sm:$0xff]  ;;  %v374_v8 = vld [vmem:[%s6333_s17 + $0x20] sm:$0xff]  ;;  %v375_v9 = vld [vmem:[%s6333_s17 + $0x28] sm:$0xff]  ;;  %860 = vmatpush.msra.mxu1 %v851_v27  ;;  %703 = vst [vmem:[#allocation2 + $0x98] sm:$0x1] %v6230_v45  ;;  %vm632_vm2 = vcmp.ge.s32.totalorder %v630_v1, 0 }
  0x1a   : > { %v376_v10 = vld [vmem:[%s6333_s17 + $0x30] sm:$0xff]  ;;  %v377_v11 = vld [vmem:[%s6333_s17 + $0x38] sm:$0xff]  ;;  %v378_v12 = vld [vmem:[%s6333_s17 + $0x40] sm:$0xff]  ;;  %1063 = vmatpush.msra.mxu2 %v5662_v22  ;;  %1263 = vmatpush.msra.mxu3 %v5680_v37  ;;  %704 = vst [vmem:[#allocation2 + $0xa0] sm:$0xff] %v6230_v45  ;;  %vm634_vm3 = vcmp.lt.s32.totalorder %v630_v1, 16 }
  0x1b   : > { %v379_v14 = vld [vmem:[%s6333_s17 + $0x48] sm:$0xff]  ;;  %v380_v21 = vld [vmem:[%s6333_s17 + $0x50] sm:$0xff]  ;;  %v381_v32 = vld [vmem:[%s6333_s17 + $0x58] sm:$0xff]  ;;  %861 = vmatpush.msra.mxu1 %v850_v30  ;;  %707 = vst [vmem:[#allocation2 + $0xb8] sm:$0x1] %v6230_v45 }
  0x1c   : > { %1064 = vmatpush.msra.mxu2 %v5661_v28  ;;  %v5656_v39 = vld [vmem:[%s9759_s3 + $0xa0] sm:$0xff]  ;;  %1264 = vmatpush.msra.mxu3 %v5679_v41  ;;  %v846_v43 = vld [vmem:[%s9759_s3 + $0x30] sm:$0xff]  ;;  %v845_v46 = vld [vmem:[%s9759_s3 + $0x28] sm:$0xff]  ;;  %708 = vst [vmem:[#allocation2 + $0xc0] sm:$0xff] %v6230_v45 }
  0x1d   : > { %862 = vmatpush.msra.mxu1 %v849_v34  ;;  %v382_v42 = vld [vmem:[%s6333_s17 + $0x60] sm:$0xff]  ;;  %v5678_v44 = vld [vmem:[%s9759_s3 + $0x150] sm:$0xff]  ;;  %v5677_v47 = vld [vmem:[%s9759_s3 + $0x148] sm:$0xff]  ;;  %711 = vst [vmem:[#allocation2 + $0xd8] sm:$0x1] %v6230_v45 }
  0x1e   : > { %1065 = vmatpush.msra.mxu2 %v5660_v29  ;;  %1265 = vmatpush.msra.mxu3 %v5678_v44  ;;  %v844_v48 = vld [vmem:[%s9759_s3 + $0x20] sm:$0xff]  ;;  %v5655_v50 = vld [vmem:[%s9759_s3 + $0x98] sm:$0xff]  ;;  %v383_v51 = vld [vmem:[%s6333_s17 + $0x68] sm:$0xff]  ;;  %9792 = vst [vmem:[#allocation6_spill] sm:$0xff] %v6496_v59 }
  0x1f   : > { %863 = vmatpush.msra.mxu1 %v848_v36  ;;  %v5676_v49 = vld [vmem:[%s9759_s3 + $0x140] sm:$0xff]  ;;  %v5654_v52 = vld [vmem:[%s9759_s3 + $0x90] sm:$0xff]  ;;  %v5653_v53 = vld [vmem:[%s9759_s3 + $0x88] sm:$0xff]  ;;  %712 = vst [vmem:[#allocation2 + $0xe0] sm:$0xff] %v6230_v45 }
  0x20   : > { %1066 = vmatpush.msra.mxu2 %v5659_v31  ;;  %1266 = vmatpush.msra.mxu3 %v5677_v47  ;;  %v5652_v55 = vld [vmem:[%s9759_s3 + $0x80] sm:$0xff]  ;;  %v843_v56 = vld [vmem:[%s9759_s3 + $0x18] sm:$0xff]  ;;  %v384_v58 = vld [vmem:[%s6333_s17 + $0x70] sm:$0xff]  ;;  %715 = vst [vmem:[#allocation2 + $0xf8] sm:$0x1] %v6230_v45 }
  0x21   : > { %5622 = vmatmul.msk.f32.gmra.mxu0 %vm406_vm1, %v371_v5  ;;  %864 = vmatpush.msra.mxu1 %v847_v40  ;;  %v5675_v57 = vld [vmem:[%s9759_s3 + $0x138] sm:$0xff]  ;;  %v842_v61 = vld [vmem:[%s9759_s3 + $0x10] sm:$0xff]  ;;  %716 = vst [vmem:[#allocation2 + $0x100] sm:$0xff] %v6230_v45  ;;  %v841_v63 = vld [vmem:[%s9759_s3 + $0x8] sm:$0xff] }
  0x22   : > { %1067 = vmatpush.msra.mxu2 %v5658_v33  ;;  %1267 = vmatpush.msra.mxu3 %v5676_v49  ;;  %v5674_v62 = vld [vmem:[%s9759_s3 + $0x130] sm:$0xff]  ;;  %719 = vst [vmem:[#allocation2 + $0x118] sm:$0x1] %v6230_v45  ;;  %v5673_v0 = vld [vmem:[%s9759_s3 + $0x128] sm:$0xff]  ;;  %v840_v2 = vld [vmem:[%s9759_s3] sm:$0xff] }
  0x23   : > { %865 = vmatpush.msra.mxu1 %v846_v43  ;;  %720 = vst [vmem:[#allocation2 + $0x120] sm:$0xff] %v6230_v45  ;;  %v5672_v3 = vld [vmem:[%s9759_s3 + $0x120] sm:$0xff]  ;;  %v5715_v4 = vld [vmem:[%s9759_s3 + $0x278] sm:$0xff]  ;;  %vm636_vm4 = vmand %vm632_vm2, %vm634_vm3  ;;  %vm4068_vm2 = vcmask 516096  }
  0x24   : > { %1068 = vmatpush.msra.mxu2 %v5657_v38  ;;  %1268 = vmatpush.msra.mxu3 %v5675_v57  ;;  %723 = vst [vmem:[#allocation2 + $0x138] sm:$0x1] %v6230_v45  ;;  %v5671_v5 = vld [vmem:[%s9759_s3 + $0x118] sm:$0xff]  ;;  %v5714_v13 = vld [vmem:[%s9759_s3 + $0x270] sm:$0xff]  ;;  %v386_v15 = vld [vmem:[%s6333_s17 + $0x80] sm:$0xff] }
  0x25   : > { %866 = vmatpush.msra.mxu1 %v845_v46  ;;  %724 = vst [vmem:[#allocation2 + $0x140] sm:$0xff] %v6230_v45  ;;  %v5698_v20 = vld [vmem:[%s9759_s3 + $0x1f0] sm:$0xff]  ;;  %v387_v22 = vld [vmem:[%s6333_s17 + $0x88] sm:$0xff]  ;;  %v5712_v35 = vld [vmem:[%s9759_s3 + $0x260] sm:$0xff] }
  0x26   : > { %1069 = vmatpush.msra.mxu2 %v5656_v39  ;;  %1269 = vmatpush.msra.mxu3 %v5674_v62  ;;  %727 = vst [vmem:[#allocation2 + $0x158] sm:$0x1] %v6230_v45  ;;  %v5713_v27 = vld [vmem:[%s9759_s3 + $0x268] sm:$0xff]  ;;  %v388_v30 = vld [vmem:[%s6333_s17 + $0x90] sm:$0xff]  ;;  %v389_v37 = vld [vmem:[%s6333_s17 + $0x98] sm:$0xff] }
  0x27   : > { %867 = vmatpush.msra.mxu1 %v844_v48  ;;  %728 = vst [vmem:[#allocation2 + $0x160] sm:$0xff] %v6230_v45  ;;  %v5697_v28 = vld [vmem:[%s9759_s3 + $0x1e8] sm:$0xff]  ;;  %v5696_v43 = vld [vmem:[%s9759_s3 + $0x1e0] sm:$0xff]  ;;  %v5695_v54 = vld [vmem:[%s9759_s3 + $0x1d8] sm:$0xff] }
  0x28   : > { %1070 = vmatpush.msra.mxu2 %v5655_v50  ;;  %1270 = vmatpush.msra.mxu3 %v5673_v0  ;;  %731 = vst [vmem:[#allocation2 + $0x178] sm:$0x1] %v6230_v45  ;;  %v390_v46 = vld [vmem:[%s6333_s17 + $0xa0] sm:$0xff]  ;;  %v5747_v57 = vld [vmem:[%s9759_s3 + $0x378] sm:$0xff] }
  0x29   : > { %5623 = vmatmul.msk.f32.gmra.mxu0 %vm406_vm1, %v372_v6  ;;  %868 = vmatpush.msra.mxu1 %v843_v56  ;;  %v385_v6 = vld [vmem:[%s6333_s17 + $0x78] sm:$0xff]  ;;  %732 = vst [vmem:[#allocation2 + $0x180] sm:$0xff] %v6230_v45  ;;  %v391_v56 = vld [vmem:[%s6333_s17 + $0xa8] sm:$0xff] }
  0x2a   : > { %1071 = vmatpush.msra.mxu2 %v5654_v52  ;;  %1271 = vmatpush.msra.mxu3 %v5672_v3  ;;  %735 = vst [vmem:[#allocation2 + $0x198] sm:$0x1] %v6230_v45  ;;  %v5744_v3 = vld [vmem:[%s9759_s3 + $0x360] sm:$0xff] }
  0x2b   : > { %869 = vmatpush.msra.mxu1 %v842_v61  ;;  %736 = vst [vmem:[#allocation2 + $0x1a0] sm:$0xff] %v6230_v45  ;;  %2070 = vmatpush.msrb.mxu0 %v5747_v57  ;;  %v5746_v61 = vld [vmem:[%s9759_s3 + $0x370] sm:$0xff] }
  0x2c   : > { %1072 = vmatpush.msra.mxu2 %v5653_v53  ;;  %1272 = vmatpush.msra.mxu3 %v5671_v5  ;;  %739 = vst [vmem:[#allocation2 + $0x1b8] sm:$0x1] %v6230_v45  ;;  %v5711_v53 = vld [vmem:[%s9759_s3 + $0x258] sm:$0xff]  ;;  %v392_v5 = vld [vmem:[%s6333_s17 + $0xb0] sm:$0xff] }
  0x2d   : > { %870 = vmatpush.msra.mxu1 %v841_v63  ;;  %2737 = vst [vmem:[#allocation3] sm:$0xff] %v6230_v45  ;;  %2071 = vmatpush.msrb.mxu0 %v5746_v61 }
  0x2e   : > { %1073 = vmatpush.msra.mxu2 %v5652_v55  ;;  %2740 = vst [vmem:[#allocation3 + $0x18] sm:$0x1] %v6230_v45 }
  0x2f   : > { %871 = vmatpush.msra.mxu1 %v840_v2  ;;  %2741 = vst [vmem:[#allocation3 + $0x20] sm:$0xff] %v6230_v45  ;;  %v5745_v2 = vld [vmem:[%s9759_s3 + $0x368] sm:$0xff] }
  0x30   : > { %1665 = vmatpush.msrb.mxu2 %v5715_v4  ;;  %2744 = vst [vmem:[#allocation3 + $0x38] sm:$0x1] %v6230_v45  ;;  %2072 = vmatpush.msrb.mxu0 %v5745_v2 }
  0x31   : > { %5624 = vmatmul.msk.f32.gmra.mxu0 %vm406_vm1, %v373_v7  ;;  %v5670_v7 = vld [vmem:[%s9759_s3 + $0x110] sm:$0xff]  ;;  %2745 = vst [vmem:[#allocation3 + $0x40] sm:$0xff] %v6230_v45 }
  0x32   : > { %1273 = vmatpush.msra.mxu3 %v5670_v7  ;;  %1666 = vmatpush.msrb.mxu2 %v5714_v13  ;;  %2748 = vst [vmem:[#allocation3 + $0x58] sm:$0x1] %v6230_v45  ;;  %v5742_v13 = vld [vmem:[%s9759_s3 + $0x350] sm:$0xff] }
  0x33   : > { %2749 = vst [vmem:[#allocation3 + $0x60] sm:$0xff] %v6230_v45  ;;  %2073 = vmatpush.msrb.mxu0 %v5744_v3 }
  0x34   : > { %2752 = vst [vmem:[#allocation3 + $0x78] sm:$0x1] %v6230_v45  ;;  %1667 = vmatpush.msrb.mxu2 %v5713_v27 }
  0x35   : > { %2753 = vst [vmem:[#allocation3 + $0x80] sm:$0xff] %v6230_v45 }
  0x36   : > { %2756 = vst [vmem:[#allocation3 + $0x98] sm:$0x1] %v6230_v45  ;;  %1668 = vmatpush.msrb.mxu2 %v5712_v35 }
  0x37   : > { %2757 = vst [vmem:[#allocation3 + $0xa0] sm:$0xff] %v6230_v45 }
  0x38   : > { %2760 = vst [vmem:[#allocation3 + $0xb8] sm:$0x1] %v6230_v45  ;;  %1669 = vmatpush.msrb.mxu2 %v5711_v53  ;;  %v5732_v53 = vld [vmem:[%s9759_s3 + $0x300] sm:$0xff] }
  0x39   : > { %5625 = vmatmul.msk.f32.gmra.mxu0 %vm406_vm1, %v374_v8  ;;  %v5699_v8 = vld [vmem:[%s9759_s3 + $0x1f8] sm:$0xff]  ;;  %2761 = vst [vmem:[#allocation3 + $0xc0] sm:$0xff] %v6230_v45 }
  0x3a   : > { %1463 = vmatpush.msrb.mxu1 %v5699_v8  ;;  %2764 = vst [vmem:[#allocation3 + $0xd8] sm:$0x1] %v6230_v45 }
  0x3b   : > { %2765 = vst [vmem:[#allocation3 + $0xe0] sm:$0xff] %v6230_v45 }
  0x3c   : > { %1464 = vmatpush.msrb.mxu1 %v5698_v20  ;;  %2768 = vst [vmem:[#allocation3 + $0xf8] sm:$0x1] %v6230_v45  ;;  %v393_v20 = vld [vmem:[%s6333_s17 + $0xb8] sm:$0xff] }
  0x3d   : > { %2769 = vst [vmem:[#allocation3 + $0x100] sm:$0xff] %v6230_v45 }
  0x3e   : > { %2772 = vst [vmem:[#allocation3 + $0x118] sm:$0x1] %v6230_v45  ;;  %1465 = vmatpush.msrb.mxu1 %v5697_v28  ;;  %v5738_v28 = vld [vmem:[%s9759_s3 + $0x330] sm:$0xff] }
  0x3f   : > { %2773 = vst [vmem:[#allocation3 + $0x120] sm:$0xff] %v6230_v45 }
  0x40   : > { %2776 = vst [vmem:[#allocation3 + $0x138] sm:$0x1] %v6230_v45  ;;  %1466 = vmatpush.msrb.mxu1 %v5696_v43  ;;  %v5734_v43 = vld [vmem:[%s9759_s3 + $0x310] sm:$0xff] }
  0x41   : > { %5626 = vmatmul.msk.f32.gmra.mxu0 %vm406_vm1, %v375_v9  ;;  %v5669_v9 = vld [vmem:[%s9759_s3 + $0x108] sm:$0xff]  ;;  %2777 = vst [vmem:[#allocation3 + $0x140] sm:$0xff] %v6230_v45 }
  0x42   : > { %1274 = vmatpush.msra.mxu3 %v5669_v9  ;;  %2780 = vst [vmem:[#allocation3 + $0x158] sm:$0x1] %v6230_v45  ;;  %1467 = vmatpush.msrb.mxu1 %v5695_v54  ;;  %v5743_v9 = vld [vmem:[%s9759_s3 + $0x358] sm:$0xff] }
  0x43   : > { %2781 = vst [vmem:[#allocation3 + $0x160] sm:$0xff] %v6230_v45  ;;  %2074 = vmatpush.msrb.mxu0 %v5743_v9  ;;  %v5691_v9 = vld [vmem:[%s9759_s3 + $0x1b8] sm:$0xff] }
  0x44   : > { %2784 = vst [vmem:[#allocation3 + $0x178] sm:$0x1] %v6230_v45 }
  0x45   : > { %2075 = vmatpush.msrb.mxu0 %v5742_v13  ;;  %v397_v13 = vld [vmem:[%s6333_s17 + $0xd8] sm:$0xff] }
  0x49   : > { %5627 = vmatmul.msk.f32.gmra.mxu0 %vm406_vm1, %v376_v10  ;;  %v5668_v10 = vld [vmem:[%s9759_s3 + $0x100] sm:$0xff] }
  0x4a   : > { %1275 = vmatpush.msra.mxu3 %v5668_v10 }
  0x51   : > { %5628 = vmatmul.msk.f32.gmra.mxu0 %vm406_vm1, %v377_v11  ;;  %v6557_v11 = vld [vmem:[%s9758_s2] ss:$0 sm:$0xff] }
  0x59   : > { %5629 = vmatmul.msk.f32.gmra.mxu0 %vm406_vm1, %v378_v12  ;;  %v6561_v12 = vsel %vm636_vm4, 1.0, %v6230_v45 }
  0x5a   : > { %v642_v17 = vperm.slane %v6561_v12, 0  ;;  %v644_v48 = vperm.slane %v6561_v12, 2  ;;  %v645_v8 = vperm.slane %v6561_v12, 3  ;;  %v647_v3 = vperm.slane %v6561_v12, 5 }
  0x61   : > { %5630 = vmatmul.msk.f32.gmra.mxu0 %vm406_vm1, %v379_v14 }
  0x69   : > { %5631 = vmatmul.msk.f32.gmra.mxu0 %vm406_vm1, %v380_v21 }
  0x71   : > { %5632 = vmatmul.msk.f32.gmra.mxu0 %vm406_vm1, %v381_v32  ;;  %v643_v32 = vperm.slane %v6561_v12, 1 }
  0x79   : > { %5633 = vmatmul.msk.f32.gmra.mxu0 %vm406_vm1, %v382_v42 }
  0x81   : > { %5634 = vmatmul.msk.f32.gmra.mxu0 %vm406_vm1, %v383_v51 }
  0x89   : > { %5635 = vmatmul.msk.f32.gmra.mxu0 %vm406_vm1, %v384_v58 }
  0x91   : > { %5636 = vmatmul.msk.f32.gmra.mxu0 %vm406_vm1, %v385_v6  ;;  %v5710_v6 = vld [vmem:[%s9759_s3 + $0x250] sm:$0xff] }
  0x92   : > { %1670 = vmatpush.msrb.mxu2 %v5710_v6 }
  0x96   : > { %v512_v14 = vpop.f32.mrf.mxu0 }
  0x97   : > { %v513_v16 = vadd.f32 %v6557_v11, %v512_v14 }
  0x99   : > { %v596_v18 = vmax.f32 %v513_v16, 0.0  ;;  %5637 = vmatmul.msk.f32.gmra.mxu0 %vm406_vm1, %v386_v15 }
  0x9b   : > { %v656_v19 = vmul.f32 %v642_v17, %v596_v18  ;;  %v5741_v18 = vld [vmem:[%s9759_s3 + $0x348] sm:$0xff] }
  0x9c   : > { %2076 = vmatpush.msrb.mxu0 %v5741_v18 }
  0x9d   : > { %740 = vst [vmem:[#allocation2 + $0x8] sm:$0xff] %v656_v19  ;;  %1074 = vmatmul.f32.vlgmr.msra.gmra.mxu2 %v656_v19 }
  0x9e   : > { %v515_v21 = vpop.f32.mrf.mxu0 }
  0x9f   : > { %v516_v23 = vadd.f32 %v6557_v11, %v515_v21 }
  0xa1   : > { %v597_v24 = vmax.f32 %v516_v23, 0.0  ;;  %5638 = vmatmul.msk.f32.gmra.mxu0 %vm406_vm1, %v387_v22  ;;  %v5740_v22 = vld [vmem:[%s9759_s3 + $0x340] sm:$0xff] }
  0xa2   : > { %2077 = vmatpush.msrb.mxu0 %v5740_v22  ;;  %v5706_v22 = vld [vmem:[%s9759_s3 + $0x230] sm:$0xff] }
  0xa3   : > { %v657_v25 = vmul.f32 %v642_v17, %v597_v24  ;;  %v5694_v17 = vld [vmem:[%s9759_s3 + $0x1d0] sm:$0xff]  ;;  %v5739_v24 = vld [vmem:[%s9759_s3 + $0x338] sm:$0xff] }
  0xa4   : > { %v792_v26 = vld [vmem:[#allocation2 + $0x7] sm:$0xff]  ;;  %1468 = vmatpush.msrb.mxu1 %v5694_v17  ;;  %2078 = vmatpush.msrb.mxu0 %v5739_v24 }
  0xa5   : > { %872 = vmatmul.f32.vlgmr.msra.gmra.mxu1 %v792_v26  ;;  %1077 = vmatmul.f32.gmra.mxu2 %v657_v25  ;;  %741 = vst [vmem:[#allocation2 + $0x10] sm:$0xff] %v657_v25 }
  0xa6   : > { %v518_v29 = vpop.f32.mrf.mxu0  ;;  %2079 = vmatpush.msrb.mxu0 %v5738_v28  ;;  %v648_v28 = vperm.slane %v6561_v12, 6 }
  0xa7   : > { %v519_v31 = vadd.f32 %v6557_v11, %v518_v29  ;;  %v5709_v29 = vld [vmem:[%s9759_s3 + $0x248] sm:$0xff] }
  0xa8   : > { %1671 = vmatpush.msrb.mxu2 %v5709_v29 }
  0xa9   : > { %v598_v33 = vmax.f32 %v519_v31, 0.0  ;;  %5639 = vmatmul.msk.f32.gmra.mxu0 %vm406_vm1, %v388_v30  ;;  %v5737_v30 = vld [vmem:[%s9759_s3 + $0x328] sm:$0xff] }
  0xaa   : > { %2080 = vmatpush.msrb.mxu0 %v5737_v30 }
  0xab   : > { %v6609_v34 = vmul.f32 %v643_v32, %v598_v33  ;;  %v5693_v33 = vld [vmem:[%s9759_s3 + $0x1c8] sm:$0xff] }
  0xac   : > { %v793_v41 = vld [vmem:[#allocation2 + $0xf] sm:$0xff]  ;;  %1469 = vmatpush.msrb.mxu1 %v5693_v33 }
  0xad   : > { %1080 = vmatmul.f32.gmra.mxu2 %v6609_v34  ;;  %742 = vst [vmem:[#allocation2 + $0x28] sm:$0xff] %v6609_v34  ;;  %v1195_v42 = vld [vmem:[#allocation2 + $0x9] sm:$0xff]  ;;  %875 = vmatmul.f32.gmra.mxu1 %v793_v41  ;;  %v1196_v52 = vld [vmem:[#allocation2 + $0x11] sm:$0xff] }
  0xae   : > { %v521_v36 = vpop.f32.mrf.mxu0  ;;  %1276 = vmatmul.f32.vlgmr.msra.gmra.mxu3 %v1195_v42  ;;  %v5690_v33 = vld [vmem:[%s9759_s3 + $0x1b0] sm:$0xff] }
  0xaf   : > { %v522_v38 = vadd.f32 %v6557_v11, %v521_v36  ;;  %v646_v36 = vperm.slane %v6561_v12, 4 }
  0xb1   : > { %v599_v39 = vmax.f32 %v522_v38, 0.0  ;;  %5640 = vmatmul.msk.f32.gmra.mxu0 %vm406_vm1, %v389_v37  ;;  %v5736_v37 = vld [vmem:[%s9759_s3 + $0x320] sm:$0xff] }
  0xb2   : > { %2081 = vmatpush.msrb.mxu0 %v5736_v37 }
  0xb3   : > { %v6620_v40 = vmul.f32 %v643_v32, %v599_v39  ;;  %v394_v32 = vld [vmem:[%s6333_s17 + $0xc0] sm:$0xff]  ;;  %v5735_v39 = vld [vmem:[%s9759_s3 + $0x318] sm:$0xff] }
  0xb4   : > { %v6631_v50 = vld [vmem:[#allocation2 + $0x27] sm:$0xff]  ;;  %2082 = vmatpush.msrb.mxu0 %v5735_v39 }
  0xb5   : > { %743 = vst [vmem:[#allocation2 + $0x30] sm:$0xff] %v6620_v40  ;;  %1083 = vmatmul.f32.gmra.mxu2 %v6620_v40  ;;  %878 = vmatmul.f32.gmra.mxu1 %v6631_v50 }
  0xb6   : > { %v524_v44 = vpop.f32.mrf.mxu0  ;;  %1279 = vmatmul.f32.gmra.mxu3 %v1196_v52  ;;  %2083 = vmatpush.msrb.mxu0 %v5734_v43 }
  0xb7   : > { %v525_v47 = vadd.f32 %v6557_v11, %v524_v44 }
  0xb9   : > { %v600_v49 = vmax.f32 %v525_v47, 0.0  ;;  %5641 = vmatmul.msk.f32.gmra.mxu0 %vm406_vm1, %v390_v46  ;;  %v5733_v46 = vld [vmem:[%s9759_s3 + $0x308] sm:$0xff]  ;;  %v5708_v47 = vld [vmem:[%s9759_s3 + $0x240] sm:$0xff] }
  0xba   : > { %1672 = vmatpush.msrb.mxu2 %v5708_v47  ;;  %2084 = vmatpush.msrb.mxu0 %v5733_v46  ;;  %v5705_v46 = vld [vmem:[%s9759_s3 + $0x228] sm:$0xff] }
  0xbb   : > { %v6633_v51 = vmul.f32 %v644_v48, %v600_v49  ;;  %v395_v49 = vld [vmem:[%s6333_s17 + $0xc8] sm:$0xff] }
  0xbc   : > { %v6653_v63 = vld [vmem:[#allocation2 + $0x2f] sm:$0xff]  ;;  %2085 = vmatpush.msrb.mxu0 %v5732_v53  ;;  %v649_v53 = vperm.slane %v6561_v12, 7  ;;  %v5704_v12 = vld [vmem:[%s9759_s3 + $0x220] sm:$0xff] }
  0xbd   : > { %744 = vst [vmem:[#allocation2 + $0x48] sm:$0xff] %v6633_v51  ;;  %1086 = vmatmul.f32.gmra.mxu2 %v6633_v51  ;;  %v6655_v0 = vld [vmem:[#allocation2 + $0x29] sm:$0xff]  ;;  %881 = vmatmul.f32.gmra.mxu1 %v6653_v63  ;;  %v6686_v16 = vld [vmem:[#allocation2 + $0x31] sm:$0xff] }
  0xbe   : > { %v527_v55 = vpop.f32.mrf.mxu0  ;;  %1282 = vmatmul.f32.gmra.mxu3 %v6655_v0  ;;  %v5689_v47 = vld [vmem:[%s9759_s3 + $0x1a8] sm:$0xff] }
  0xbf   : > { %v528_v58 = vadd.f32 %v6557_v11, %v527_v55 }
  0xc1   : > { %v601_v62 = vmax.f32 %v528_v58, 0.0  ;;  %5642 = vmatmul.msk.f32.gmra.mxu0 %vm406_vm1, %v391_v56  ;;  %v5692_v58 = vld [vmem:[%s9759_s3 + $0x1c0] sm:$0xff] }
  0xc2   : > { %1470 = vmatpush.msrb.mxu1 %v5692_v58 }
  0xc3   : > { %v6657_v1 = vmul.f32 %v644_v48, %v601_v62  ;;  %v396_v62 = vld [vmem:[%s6333_s17 + $0xd0] sm:$0xff] }
  0xc4   : > { %v6682_v14 = vld [vmem:[#allocation2 + $0x47] sm:$0xff]  ;;  %1471 = vmatpush.msrb.mxu1 %v5691_v9 }
  0xc5   : > { %745 = vst [vmem:[#allocation2 + $0x50] sm:$0xff] %v6657_v1  ;;  %1089 = vmatmul.f32.gmra.mxu2 %v6657_v1  ;;  %884 = vmatmul.f32.gmra.mxu1 %v6682_v14 }
  0xc6   : > { %v530_v4 = vpop.f32.mrf.mxu0  ;;  %1285 = vmatmul.f32.gmra.mxu3 %v6686_v16  ;;  %1472 = vmatpush.msrb.mxu1 %v5690_v33  ;;  %v5703_v33 = vld [vmem:[%s9759_s3 + $0x218] sm:$0xff] }
  0xc7   : > { %v531_v7 = vadd.f32 %v6557_v11, %v530_v4 }
  0xc8   : > { %1473 = vmatpush.msrb.mxu1 %v5689_v47  ;;  %v5687_v47 = vld [vmem:[%s9759_s3 + $0x198] sm:$0xff] }
  0xc9   : > { %v602_v10 = vmax.f32 %v531_v7, 0.0  ;;  %5643 = vmatmul.msk.f32.gmra.mxu0 %vm406_vm1, %v392_v5 }
  0xcb   : > { %v6684_v15 = vmul.f32 %v645_v8, %v602_v10 }
  0xcc   : > { %v6707_v25 = vld [vmem:[#allocation2 + $0x4f] sm:$0xff] }
  0xcd   : > { %746 = vst [vmem:[#allocation2 + $0x68] sm:$0xff] %v6684_v15  ;;  %1092 = vmatmul.f32.gmra.mxu2 %v6684_v15  ;;  %v6709_v26 = vld [vmem:[#allocation2 + $0x49] sm:$0xff]  ;;  %887 = vmatmul.f32.gmra.mxu1 %v6707_v25  ;;  %v6746_v44 = vld [vmem:[#allocation2 + $0x51] sm:$0xff] }
  0xce   : > { %v533_v19 = vpop.f32.mrf.mxu0  ;;  %1288 = vmatmul.f32.gmra.mxu3 %v6709_v26 }
  0xcf   : > { %v534_v21 = vadd.f32 %v6557_v11, %v533_v19 }
  0xd1   : > { %v603_v23 = vmax.f32 %v534_v21, 0.0  ;;  %5644 = vmatmul.msk.f32.gmra.mxu0 %vm406_vm1, %v393_v20 }
  0xd3   : > { %v6711_v27 = vmul.f32 %v645_v8, %v603_v23  ;;  %v5707_v8 = vld [vmem:[%s9759_s3 + $0x238] sm:$0xff] }
  0xd4   : > { %v6739_v41 = vld [vmem:[#allocation2 + $0x67] sm:$0xff]  ;;  %1673 = vmatpush.msrb.mxu2 %v5707_v8 }
  0xd5   : > { %747 = vst [vmem:[#allocation2 + $0x70] sm:$0xff] %v6711_v27  ;;  %1095 = vmatmul.f32.gmra.mxu2 %v6711_v27  ;;  %890 = vmatmul.f32.gmra.mxu1 %v6739_v41 }
  0xd6   : > { %v536_v31 = vpop.f32.mrf.mxu0  ;;  %1291 = vmatmul.f32.gmra.mxu3 %v6746_v44  ;;  %1674 = vmatpush.msrb.mxu2 %v5706_v22 }
  0xd7   : > { %v537_v35 = vadd.f32 %v6557_v11, %v536_v31 }
  0xd8   : > { %1675 = vmatpush.msrb.mxu2 %v5705_v46 }
  0xd9   : > { %v604_v38 = vmax.f32 %v537_v35, 0.0  ;;  %5645 = vmatmul.msk.f32.gmra.mxu0 %vm406_vm1, %v394_v32 }
  0xda   : > { %1676 = vmatpush.msrb.mxu2 %v5704_v12 }
  0xdb   : > { %v6741_v42 = vmul.f32 %v646_v36, %v604_v38 }
  0xdc   : > { %v6764_v55 = vld [vmem:[#allocation2 + $0x6f] sm:$0xff]  ;;  %1677 = vmatpush.msrb.mxu2 %v5703_v33 }
  0xdd   : > { %748 = vst [vmem:[#allocation2 + $0x88] sm:$0xff] %v6741_v42  ;;  %1098 = vmatmul.f32.gmra.mxu2 %v6741_v42  ;;  %v6766_v56 = vld [vmem:[#allocation2 + $0x69] sm:$0xff]  ;;  %893 = vmatmul.f32.gmra.mxu1 %v6764_v55  ;;  %v6785_v7 = vld [vmem:[#allocation2 + $0x71] sm:$0xff] }
  0xde   : > { %v539_v48 = vpop.f32.mrf.mxu0  ;;  %1294 = vmatmul.f32.gmra.mxu3 %v6766_v56  ;;  %v5686_v33 = vld [vmem:[%s9759_s3 + $0x190] sm:$0xff] }
  0xdf   : > { %v540_v52 = vadd.f32 %v6557_v11, %v539_v48 }
  0xe1   : > { %v605_v54 = vmax.f32 %v540_v52, 0.0  ;;  %5646 = vmatmul.msk.f32.gmra.mxu0 %vm406_vm1, %v395_v49  ;;  %v6848_v49 = vadd.s32 8, %v6496_v59 }
  0xe3   : > { %v6768_v57 = vmul.f32 %v646_v36, %v605_v54  ;;  %9793 = vst [vmem:[#allocation7_spill] sm:$0xff] %v6848_v49 }
  0xe4   : > { %v6781_v5 = vld [vmem:[#allocation2 + $0x87] sm:$0xff] }
  0xe5   : > { %749 = vst [vmem:[#allocation2 + $0x90] sm:$0xff] %v6768_v57  ;;  %1101 = vmatmul.f32.gmra.mxu2 %v6768_v57  ;;  %896 = vmatmul.f32.gmra.mxu1 %v6781_v5 }
  0xe6   : > { %v542_v61 = vpop.f32.mrf.mxu0  ;;  %1297 = vmatmul.f32.gmra.mxu3 %v6785_v7 }
  0xe7   : > { %v543_v2 = vadd.f32 %v6557_v11, %v542_v61  ;;  %v631_v61 = vadd.s32 %v6499_v60, %v6848_v49 }
  0xe9   : > { %v606_v4 = vmax.f32 %v543_v2, 0.0  ;;  %5647 = vmatmul.msk.f32.gmra.mxu0 %vm406_vm1, %v396_v62  ;;  %vm633_vm5 = vcmp.ge.s32.totalorder %v631_v61, 0  ;;  %vm635_vm6 = vcmp.lt.s32.totalorder %v631_v61, 16 }
  0xea   : > { %vm637_vm7 = vmand %vm633_vm5, %vm635_vm6  ;;  %vm5501_vm6 = vcmask 130048  }
  0xeb   : > { %v6783_v6 = vmul.f32 %v647_v3, %v606_v4 }
  0xec   : > { %v6800_v19 = vld [vmem:[#allocation2 + $0x8f] sm:$0xff] }
  0xed   : > { %750 = vst [vmem:[#allocation2 + $0xa8] sm:$0xff] %v6783_v6  ;;  %1104 = vmatmul.f32.gmra.mxu2 %v6783_v6  ;;  %v6802_v20 = vld [vmem:[#allocation2 + $0x89] sm:$0xff]  ;;  %899 = vmatmul.f32.gmra.mxu1 %v6800_v19  ;;  %v6820_v32 = vld [vmem:[#allocation2 + $0x91] sm:$0xff] }
  0xee   : > { %v545_v10 = vpop.f32.mrf.mxu0  ;;  %1300 = vmatmul.f32.gmra.mxu3 %v6802_v20 }
  0xef   : > { %v546_v17 = vadd.f32 %v6557_v11, %v545_v10 }
  0xf1   : > { %v607_v18 = vmax.f32 %v546_v17, 0.0  ;;  %5648 = vmatmul.msk.f32.gmra.mxu0 %vm406_vm1, %v397_v13  ;;  %v6877_v13 = vsel %vm637_vm7, 1.0, %v6230_v45  ;;  %v5688_v17 = vld [vmem:[%s9759_s3 + $0x1a0] sm:$0xff] }
  0xf2   : > { %1474 = vmatpush.msrb.mxu1 %v5688_v17  ;;  %v652_v49 = vperm.slane %v6877_v13, 2 }
  0xf3   : > { %v6804_v21 = vmul.f32 %v647_v3, %v607_v18 }
  0xf4   : > { %v6816_v30 = vld [vmem:[#allocation2 + $0xa7] sm:$0xff]  ;;  %1475 = vmatpush.msrb.mxu1 %v5687_v47 }
  0xf5   : > { %751 = vst [vmem:[#allocation2 + $0xb0] sm:$0xff] %v6804_v21  ;;  %1107 = vmatmul.f32.gmra.mxu2 %v6804_v21  ;;  %902 = vmatmul.f32.gmra.mxu1 %v6816_v30 }
  0xf6   : > { %v548_v23 = vpop.f32.mrf.mxu0  ;;  %1303 = vmatmul.f32.gmra.mxu3 %v6820_v32  ;;  %1476 = vmatpush.msrb.mxu1 %v5686_v33  ;;  %v5701_v33 = vld [vmem:[%s9759_s3 + $0x208] sm:$0xff] }
  0xf7   : > { %v549_v24 = vadd.f32 %v6557_v11, %v548_v23  ;;  %v650_v23 = vperm.slane %v6877_v13, 0 }
  0xf9   : > { %v608_v29 = vmax.f32 %v549_v24, 0.0  ;;  %2086 = vmatmul.f32.vlgmr.msrb.gmra.mxu0 %v6682_v14 }
  0xfb   : > { %v6818_v31 = vmul.f32 %v648_v28, %v608_v29 }
  0xfc   : > { %v6831_v38 = vld [vmem:[#allocation2 + $0xaf] sm:$0xff] }
  0xfd   : > { %752 = vst [vmem:[#allocation2 + $0xc8] sm:$0xff] %v6818_v31  ;;  %1110 = vmatmul.f32.gmra.mxu2 %v6818_v31  ;;  %v6833_v39 = vld [vmem:[#allocation2 + $0xa9] sm:$0xff]  ;;  %905 = vmatmul.f32.gmra.mxu1 %v6831_v38  ;;  %v6859_v2 = vld [vmem:[#allocation2 + $0xb1] sm:$0xff] }
  0xfe   : > { %v551_v35 = vpop.f32.mrf.mxu0  ;;  %1306 = vmatmul.f32.gmra.mxu3 %v6833_v39 }
  0xff   : > { %v552_v36 = vadd.f32 %v6557_v11, %v551_v35 }
 0x101   : > { %v609_v37 = vmax.f32 %v552_v36, 0.0  ;;  %2089 = vmatmul.f32.gmra.mxu0 %v6707_v25 }
 0x103   : > { %v6835_v43 = vmul.f32 %v648_v28, %v609_v37 }
 0x104   : > { %v6853_v58 = vld [vmem:[#allocation2 + $0xc7] sm:$0xff] }
 0x105   : > { %753 = vst [vmem:[#allocation2 + $0xd0] sm:$0xff] %v6835_v43  ;;  %1113 = vmatmul.f32.gmra.mxu2 %v6835_v43  ;;  %908 = vmatmul.f32.gmra.mxu1 %v6853_v58 }
 0x106   : > { %v554_v48 = vpop.f32.mrf.mxu0  ;;  %1309 = vmatmul.f32.gmra.mxu3 %v6859_v2 }
 0x107   : > { %v555_v52 = vadd.f32 %v6557_v11, %v554_v48  ;;  %v5731_v48 = vld [vmem:[%s9759_s3 + $0x2f8] sm:$0xff] }
 0x108   : > { %1867 = vmatpush.msrb.mxu3 %v5731_v48 }
 0x109   : > { %v610_v54 = vmax.f32 %v555_v52, 0.0  ;;  %2092 = vmatmul.f32.gmra.mxu0 %v6739_v41 }
 0x10b   : > { %v6857_v62 = vmul.f32 %v649_v53, %v610_v54 }
 0x10c   : > { %v6870_v8 = vld [vmem:[#allocation2 + $0xcf] sm:$0xff] }
 0x10d   : > { %754 = vst [vmem:[#allocation2 + $0xe8] sm:$0xff] %v6857_v62  ;;  %1116 = vmatmul.f32.gmra.mxu2 %v6857_v62  ;;  %v6872_v9 = vld [vmem:[#allocation2 + $0xc9] sm:$0xff]  ;;  %911 = vmatmul.f32.gmra.mxu1 %v6870_v8  ;;  %v6893_v29 = vld [vmem:[#allocation2 + $0xd1] sm:$0xff] }
 0x10e   : > { %v557_v3 = vpop.f32.mrf.mxu0  ;;  %1312 = vmatmul.f32.gmra.mxu3 %v6872_v9  ;;  %9795 = vst [vmem:[#allocation9_spill] sm:$0xff] %v6893_v29 }
 0x10f   : > { %v558_v60 = vadd.f32 %v6557_v11, %v557_v3  ;;  %v651_v3 = vperm.slane %v6877_v13, 1 }
 0x111   : > { %v611_v4 = vmax.f32 %v558_v60, 0.0  ;;  %2095 = vmatmul.f32.gmra.mxu0 %v6764_v55 }
 0x113   : > { %v6874_v10 = vmul.f32 %v649_v53, %v611_v4 }
 0x114   : > { %v6889_v24 = vld [vmem:[#allocation2 + $0xe7] sm:$0xff] }
 0x115   : > { %755 = vst [vmem:[#allocation2 + $0xf0] sm:$0xff] %v6874_v10  ;;  %1119 = vmatmul.f32.gmra.mxu2 %v6874_v10  ;;  %914 = vmatmul.f32.gmra.mxu1 %v6889_v24 }
 0x116   : > { %v560_v18 = vpop.f32.mrf.mxu0  ;;  %1315 = vmatmul.f32.gmra.mxu3 %v6893_v29 }
 0x117   : > { %v561_v22 = vadd.f32 %v6557_v11, %v560_v18  ;;  %v5702_v18 = vld [vmem:[%s9759_s3 + $0x210] sm:$0xff] }
 0x118   : > { %1678 = vmatpush.msrb.mxu2 %v5702_v18 }
 0x119   : > { %v612_v45 = vmax.f32 %v561_v22, 0.0  ;;  %2098 = vmatmul.f32.gmra.mxu0 %v6781_v5 }
 0x11a   : > { %1679 = vmatpush.msrb.mxu2 %v5701_v33  ;;  %v5728_v33 = vld [vmem:[%s9759_s3 + $0x2e0] sm:$0xff] }
 0x11b   : > { %v6891_v28 = vmul.f32 %v650_v23, %v612_v45 }
 0x11c   : > { %v6910_v52 = vld [vmem:[#allocation2 + $0xef] sm:$0xff] }
 0x11d   : > { %9794 = vst [vmem:[#allocation8_spill] sm:$0xff] %v6891_v28  ;;  %1122 = vmatmul.f32.gmra.mxu2 %v6891_v28  ;;  %v6912_v53 = vld [vmem:[#allocation2 + $0xe9] sm:$0xff]  ;;  %917 = vmatmul.f32.gmra.mxu1 %v6910_v52  ;;  %v6930_v45 = vld [vmem:[#allocation2 + $0xf1] sm:$0xff] }
 0x11e   : > { %756 = vst [vmem:[#allocation2 + $0x108] sm:$0xff] %v6891_v28  ;;  %v563_v35 = vpop.f32.mrf.mxu0  ;;  %1318 = vmatmul.f32.gmra.mxu3 %v6912_v53 }
 0x11f   : > { %v564_v36 = vadd.f32 %v6557_v11, %v563_v35  ;;  %9796 = vst [vmem:[#allocation10_spill] sm:$0xff] %v6910_v52  ;;  %v5730_v35 = vld [vmem:[%s9759_s3 + $0x2f0] sm:$0xff] }
 0x120   : > { %v1075_v37 = vpop.f32.mrf.mxu2  ;;  %9797 = vst [vmem:[#allocation11_spill] sm:$0xff] %v6912_v53  ;;  %1868 = vmatpush.msrb.mxu3 %v5730_v35 }
 0x121   : > { %v613_v46 = vmax.f32 %v564_v36, 0.0  ;;  %2101 = vmatmul.f32.gmra.mxu0 %v6800_v19  ;;  %9801 = vst [vmem:[#allocation15_spill] sm:$0xff] %v6930_v45 }
 0x122   : > { %v873_v60 = vpop.f32.mrf.mxu1 }
 0x123   : > { %v6914_v54 = vmul.f32 %v650_v23, %v613_v46 }
 0x125   : > { %9798 = vst [vmem:[#allocation12_spill] sm:$0xff] %v6914_v54  ;;  %1125 = vmatmul.f32.gmra.mxu2 %v6914_v54  ;;  %v6926_v22 = vld [vmem:[#allocation2 + $0x107] sm:$0xff] }
 0x126   : > { %757 = vst [vmem:[#allocation2 + $0x110] sm:$0xff] %v6914_v54  ;;  %v566_v61 = vpop.f32.mrf.mxu0  ;;  %920 = vmatmul.f32.gmra.mxu1 %v6926_v22  ;;  %1321 = vmatmul.f32.gmra.mxu3 %v6930_v45 }
 0x127   : > { %v567_v12 = vadd.f32 %v6557_v11, %v566_v61  ;;  %9799 = vst [vmem:[#allocation13_spill] sm:$0xff] %v6926_v22 }
 0x128   : > { %v1078_v4 = vpop.f32.mrf.mxu2 }
 0x129   : > { %v614_v17 = vmax.f32 %v567_v12, 0.0  ;;  %2104 = vmatmul.f32.gmra.mxu0 %v6816_v30 }
 0x12a   : > { %v876_v61 = vpop.f32.mrf.mxu1 }
 0x12b   : > { %v6928_v23 = vmul.f32 %v651_v3, %v614_v17 }
 0x12d   : > { %9800 = vst [vmem:[#allocation14_spill] sm:$0xff] %v6928_v23  ;;  %1128 = vmatmul.f32.gmra.mxu2 %v6928_v23  ;;  %v6946_v12 = vld [vmem:[#allocation2 + $0x10f] sm:$0xff] }
 0x12e   : > { %758 = vst [vmem:[#allocation2 + $0x128] sm:$0xff] %v6928_v23  ;;  %v569_v36 = vpop.f32.mrf.mxu0  ;;  %v6948_v17 = vld [vmem:[#allocation2 + $0x109] sm:$0xff]  ;;  %923 = vmatmul.f32.gmra.mxu1 %v6946_v12 }
 0x12f   : > { %v570_v46 = vadd.f32 %v6557_v11, %v569_v36  ;;  %9802 = vst [vmem:[#allocation16_spill] sm:$0xff] %v6948_v17  ;;  %1324 = vmatmul.f32.gmra.mxu3 %v6948_v17  ;;  %v1147_v36 = vadd.f32 %v1075_v37, %v873_v60  ;;  %v5685_v23 = vld [vmem:[%s9759_s3 + $0x188] sm:$0xff] }
 0x130   : > { %v6943_v47 = vpop.f32.mrf.mxu2  ;;  %v5729_v37 = vld [vmem:[%s9759_s3 + $0x2e8] sm:$0xff]  ;;  %1477 = vmatpush.msrb.mxu1 %v5685_v23  ;;  %v5727_v23 = vld [vmem:[%s9759_s3 + $0x2d8] sm:$0xff] }
 0x131   : > { %v615_v48 = vmax.f32 %v570_v46, 0.0  ;;  %2107 = vmatmul.f32.gmra.mxu0 %v6831_v38  ;;  %1869 = vmatpush.msrb.mxu3 %v5729_v37  ;;  %v1148_v37 = vadd.f32 %v1078_v4, %v876_v61  ;;  %v5725_v4 = vld [vmem:[%s9759_s3 + $0x2c8] sm:$0xff] }
 0x132   : > { %v879_v60 = vpop.f32.mrf.mxu1 }
 0x133   : > { %v6950_v18 = vmul.f32 %v651_v3, %v615_v48  ;;  %v1277_v3 = vpop.f32.mrf.mxu3  ;;  %1870 = vmatpush.msrb.mxu3 %v5728_v33  ;;  %v5726_v33 = vld [vmem:[%s9759_s3 + $0x2d0] sm:$0xff] }
 0x134   : > { %v6961_v48 = vadd.f32 %v1277_v3, %v1147_v36 }
 0x135   : > { %9803 = vst [vmem:[#allocation17_spill] sm:$0xff] %v6950_v18  ;;  %1131 = vmatmul.f32.gmra.mxu2 %v6950_v18  ;;  %1871 = vmatpush.msrb.mxu3 %v5727_v23  ;;  %v5700_v23 = vld [vmem:[%s9759_s3 + $0x200] sm:$0xff] }
 0x136   : > { %759 = vst [vmem:[#allocation2 + $0x130] sm:$0xff] %v6950_v18  ;;  %v572_v35 = vpop.f32.mrf.mxu0  ;;  %1680 = vmatpush.msrb.mxu2 %v5700_v23 }
 0x137   : > { %v573_v46 = vadd.f32 %v6557_v11, %v572_v35  ;;  %9804 = vst [vmem:[#allocation18_spill] sm:$0xff] %v6961_v48  ;;  %v6972_v35 = vld [vmem:[#allocation2 + $0x127] sm:$0xff]  ;;  %1872 = vmatpush.msrb.mxu3 %v5726_v33  ;;  %v5723_v33 = vld [vmem:[%s9759_s3 + $0x2b8] sm:$0xff] }
 0x138   : > { %v6964_v17 = vpop.f32.mrf.mxu2  ;;  %926 = vmatmul.f32.gmra.mxu1 %v6972_v35 }
 0x139   : > { %v616_v59 = vmax.f32 %v573_v46, 0.0  ;;  %2110 = vmatmul.f32.gmra.mxu0 %v6853_v58  ;;  %v6979_v46 = vld [vmem:[#allocation2 + $0x111] sm:$0xff]  ;;  %1873 = vmatpush.msrb.mxu3 %v5725_v4  ;;  %v653_v4 = vperm.slane %v6877_v13, 3 }
 0x13a   : > { %9806 = vst [vmem:[#allocation20_spill] sm:$0xff] %v6979_v46  ;;  %1327 = vmatmul.f32.gmra.mxu3 %v6979_v46  ;;  %v882_v61 = vpop.f32.mrf.mxu1 }
 0x13b   : > { %v6977_v36 = vmul.f32 %v652_v49, %v616_v59  ;;  %v1280_v48 = vpop.f32.mrf.mxu3 }
 0x13c   : > { %v6992_v46 = vadd.f32 %v1280_v48, %v1148_v37  ;;  %v5724_v48 = vld [vmem:[%s9759_s3 + $0x2c0] sm:$0xff] }
 0x13d   : > { %9805 = vst [vmem:[#allocation19_spill] sm:$0xff] %v6977_v36  ;;  %1134 = vmatmul.f32.gmra.mxu2 %v6977_v36  ;;  %1874 = vmatpush.msrb.mxu3 %v5724_v48  ;;  %v5722_v48 = vld [vmem:[%s9759_s3 + $0x2b0] sm:$0xff] }
 0x13e   : > { %760 = vst [vmem:[#allocation2 + $0x148] sm:$0xff] %v6977_v36  ;;  %v575_v3 = vpop.f32.mrf.mxu0  ;;  %v7005_v36 = vld [vmem:[#allocation2 + $0x129] sm:$0xff] }
 0x13f   : > { %v576_v59 = vadd.f32 %v6557_v11, %v575_v3  ;;  %9807 = vst [vmem:[#allocation21_spill] sm:$0xff] %v6992_v46  ;;  %v7003_v3 = vld [vmem:[#allocation2 + $0x12f] sm:$0xff]  ;;  %1875 = vmatpush.msrb.mxu3 %v5723_v33 }
 0x140   : > { %v6995_v45 = vpop.f32.mrf.mxu2  ;;  %9808 = vst [vmem:[#allocation22_spill] sm:$0xff] %v7005_v36  ;;  %929 = vmatmul.f32.gmra.mxu1 %v7003_v3 }
 0x141   : > { %v617_v18 = vmax.f32 %v576_v59, 0.0  ;;  %2113 = vmatmul.f32.gmra.mxu0 %v6870_v8  ;;  %v5684_v59 = vld [vmem:[%s9759_s3 + $0x180] sm:$0xff]  ;;  %1876 = vmatpush.msrb.mxu3 %v5722_v48  ;;  %v1150_v48 = vadd.f32 %v6964_v17, %v882_v61  ;;  %v5717_v17 = vld [vmem:[%s9759_s3 + $0x288] sm:$0xff] }
 0x142   : > { %1330 = vmatmul.f32.gmra.mxu3 %v7005_v36  ;;  %1478 = vmatpush.msrb.mxu1 %v5684_v59 }
 0x143   : > { %v7010_v37 = vmul.f32 %v652_v49, %v617_v18  ;;  %v1149_v49 = vadd.f32 %v6943_v47, %v879_v60  ;;  %v1283_v36 = vpop.f32.mrf.mxu3  ;;  %v5721_v47 = vld [vmem:[%s9759_s3 + $0x2a8] sm:$0xff]  ;;  %v885_v60 = vpop.f32.mrf.mxu1 }
 0x144   : > { %1877 = vmatpush.msrb.mxu3 %v5721_v47 }
 0x145   : > { %9809 = vst [vmem:[#allocation23_spill] sm:$0xff] %v7010_v37  ;;  %1137 = vmatmul.f32.gmra.mxu2 %v7010_v37  ;;  %v7028_v46 = vadd.f32 %v1283_v36, %v1149_v49  ;;  %v7036_v59 = vld [vmem:[#allocation2 + $0x147] sm:$0xff]  ;;  %v5779_v49 = vld [vmem:[%s9759_s3 + $0x478] sm:$0xff] }
 0x146   : > { %761 = vst [vmem:[#allocation2 + $0x150] sm:$0xff] %v7010_v37  ;;  %v578_v23 = vpop.f32.mrf.mxu0  ;;  %v5720_v36 = vld [vmem:[%s9759_s3 + $0x2a0] sm:$0xff]  ;;  %2474 = vmatpush.msra.mxu2 %v5779_v49 }
 0x147   : > { %v579_v18 = vadd.f32 %v6557_v11, %v578_v23  ;;  %9810 = vst [vmem:[#allocation24_spill] sm:$0xff] %v7028_v46  ;;  %v7043_v23 = vld [vmem:[#allocation2 + $0x131] sm:$0xff]  ;;  %1878 = vmatpush.msrb.mxu3 %v5720_v36 }
 0x148   : > { %v7031_v53 = vpop.f32.mrf.mxu2  ;;  %9812 = vst [vmem:[#allocation26_spill] sm:$0xff] %v7043_v23  ;;  %932 = vmatmul.f32.gmra.mxu1 %v7036_v59  ;;  %v5763_v36 = vld [vmem:[%s9759_s3 + $0x3f8] sm:$0xff] }
 0x149   : > { %v618_v54 = vmax.f32 %v579_v18, 0.0  ;;  %2116 = vmatmul.f32.gmra.mxu0 %v6889_v24  ;;  %2272 = vmatpush.msra.mxu1 %v5763_v36 }
 0x14a   : > { %1333 = vmatmul.f32.gmra.mxu3 %v7043_v23  ;;  %v5718_v23 = vld [vmem:[%s9759_s3 + $0x290] sm:$0xff] }
 0x14b   : > { %v7038_v33 = vmul.f32 %v653_v4, %v618_v54  ;;  %v5719_v54 = vld [vmem:[%s9759_s3 + $0x298] sm:$0xff]  ;;  %v1286_v46 = vpop.f32.mrf.mxu3  ;;  %v888_v61 = vpop.f32.mrf.mxu1 }
 0x14c   : > { %1879 = vmatpush.msrb.mxu3 %v5719_v54  ;;  %v7060_v37 = vadd.f32 %v1286_v46, %v1150_v48  ;;  %v5716_v54 = vld [vmem:[%s9759_s3 + $0x280] sm:$0xff] }
 0x14d   : > { %9811 = vst [vmem:[#allocation25_spill] sm:$0xff] %v7038_v33  ;;  %1140 = vmatmul.f32.gmra.mxu2 %v7038_v33  ;;  %v7069_v49 = vld [vmem:[#allocation2 + $0x14f] sm:$0xff] }
 0x14e   : > { %762 = vst [vmem:[#allocation2 + $0x168] sm:$0xff] %v7038_v33  ;;  %v581_v18 = vpop.f32.mrf.mxu0  ;;  %1880 = vmatpush.msrb.mxu3 %v5718_v23  ;;  %v1151_v23 = vadd.f32 %v6995_v45, %v885_v60  ;;  %v7095_v60 = vld [vmem:[#allocation2 + $0x151] sm:$0xff] }
 0x14f   : > { %v582_v47 = vadd.f32 %v6557_v11, %v581_v18  ;;  %9813 = vst [vmem:[#allocation27_spill] sm:$0xff] %v7060_v37  ;;  %v7071_v18 = vld [vmem:[#allocation2 + $0x149] sm:$0xff] }
 0x150   : > { %v1093_v29 = vpop.f32.mrf.mxu2  ;;  %9814 = vst [vmem:[#allocation28_spill] sm:$0xff] %v7071_v18  ;;  %1881 = vmatpush.msrb.mxu3 %v5717_v17  ;;  %935 = vmatmul.f32.gmra.mxu1 %v7069_v49 }
 0x151   : > { %v619_v28 = vmax.f32 %v582_v47, 0.0  ;;  %2119 = vmatmul.f32.gmra.mxu0 %v6910_v52  ;;  %9818 = vst [vmem:[#allocation32_spill] sm:$0xff] %v7095_v60 }
 0x152   : > { %1336 = vmatmul.f32.gmra.mxu3 %v7071_v18  ;;  %v5778_v18 = vld [vmem:[%s9759_s3 + $0x470] sm:$0xff] }
 0x153   : > { %v7073_v46 = vmul.f32 %v653_v4, %v619_v28  ;;  %1882 = vmatpush.msrb.mxu3 %v5716_v54  ;;  %v654_v4 = vperm.slane %v6877_v13, 4  ;;  %v1289_v47 = vpop.f32.mrf.mxu3  ;;  %v891_v33 = vpop.f32.mrf.mxu1  ;;  %2475 = vmatpush.msra.mxu2 %v5778_v18  ;;  %v5762_v54 = vld [vmem:[%s9759_s3 + $0x3f0] sm:$0xff]  ;;  %v1152_v18 = vadd.f32 %v7031_v53, %v888_v61 }
 0x154   : > { %v7085_v36 = vadd.f32 %v1289_v47, %v1151_v23  ;;  %2273 = vmatpush.msra.mxu1 %v5762_v54  ;;  %v1153_v61 = vadd.f32 %v1093_v29, %v891_v33  ;;  %v6185_v33 = vld [vmem:[%s9758_s2] ss:$0 sm:$0xff] }
 0x155   : > { %9815 = vst [vmem:[#allocation29_spill] sm:$0xff] %v7073_v46  ;;  %1143 = vmatmul.f32.gmra.mxu2 %v7073_v46 }
 0x156   : > { %763 = vst [vmem:[#allocation2 + $0x170] sm:$0xff] %v7073_v46  ;;  %v584_v48 = vpop.f32.mrf.mxu0  ;;  %v7091_v46 = vld [vmem:[#allocation2 + $0x167] sm:$0xff] }
 0x157   : > { %v585_v28 = vadd.f32 %v6557_v11, %v584_v48  ;;  %9816 = vst [vmem:[#allocation30_spill] sm:$0xff] %v7085_v36 }
 0x158   : > { %v1096_v37 = vpop.f32.mrf.mxu2  ;;  %938 = vmatmul.f32.gmra.mxu1 %v7091_v46 }
 0x159   : > { %v620_v17 = vmax.f32 %v585_v28, 0.0  ;;  %2122 = vmatmul.f32.gmra.mxu0 %v6926_v22 }
 0x15a   : > { %1339 = vmatmul.f32.gmra.mxu3 %v7095_v60 }
 0x15b   : > { %v7093_v45 = vmul.f32 %v654_v4, %v620_v17  ;;  %v1292_v28 = vpop.f32.mrf.mxu3 }
 0x15c   : > { %v7106_v47 = vadd.f32 %v1292_v28, %v1152_v18 }
 0x15d   : > { %9817 = vst [vmem:[#allocation31_spill] sm:$0xff] %v7093_v45  ;;  %1681 = vmatmul.f32.vlgmr.msrb.gmra.mxu2 %v6609_v34  ;;  %v7109_v36 = vld [vmem:[#allocation2 + $0x16f] sm:$0xff] }
 0x15e   : > { %764 = vst [vmem:[#allocation2 + $0x188] sm:$0xff] %v7093_v45  ;;  %v587_v48 = vpop.f32.mrf.mxu0  ;;  %v894_v45 = vpop.f32.mrf.mxu1  ;;  %v7111_v22 = vld [vmem:[#allocation2 + $0x169] sm:$0xff]  ;;  %v7130_v29 = vld [vmem:[#allocation2 + $0x171] sm:$0xff] }
 0x15f   : > { %v588_v23 = vadd.f32 %v6557_v11, %v587_v48  ;;  %v5777_v34 = vld [vmem:[%s9759_s3 + $0x468] sm:$0xff]  ;;  %v655_v48 = vperm.slane %v6877_v13, 5  ;;  %v1154_v13 = vadd.f32 %v1096_v37, %v894_v45  ;;  %v5760_v37 = vld [vmem:[%s9759_s3 + $0x3e0] sm:$0xff] }
 0x160   : > { %v1099_v60 = vpop.f32.mrf.mxu2  ;;  %941 = vmatmul.f32.gmra.mxu1 %v7109_v36  ;;  %2476 = vmatpush.msra.mxu2 %v5777_v34 }
 0x161   : > { %v621_v17 = vmax.f32 %v588_v23, 0.0  ;;  %2125 = vmatmul.f32.gmra.mxu0 %v6946_v12 }
 0x162   : > { %1342 = vmatmul.f32.gmra.mxu3 %v7111_v22 }
 0x163   : > { %v7113_v52 = vmul.f32 %v654_v4, %v621_v17  ;;  %v1295_v4 = vpop.f32.mrf.mxu3  ;;  %v5761_v17 = vld [vmem:[%s9759_s3 + $0x3e8] sm:$0xff] }
 0x164   : > { %v7124_v18 = vadd.f32 %v1295_v4, %v1153_v61  ;;  %2274 = vmatpush.msra.mxu1 %v5761_v17 }
 0x165   : > { %9819 = vst [vmem:[#allocation33_spill] sm:$0xff] %v7113_v52  ;;  %1684 = vmatmul.f32.gmra.mxu2 %v6620_v40 }
 0x166   : > { %765 = vst [vmem:[#allocation2 + $0x190] sm:$0xff] %v7113_v52  ;;  %v590_v53 = vpop.f32.mrf.mxu0  ;;  %v897_v52 = vpop.f32.mrf.mxu1  ;;  %2275 = vmatpush.msra.mxu1 %v5760_v37  ;;  %v5757_v37 = vld [vmem:[%s9759_s3 + $0x3c8] sm:$0xff] }
 0x167   : > { %v591_v54 = vadd.f32 %v6557_v11, %v590_v53  ;;  %v1155_v45 = vadd.f32 %v1099_v60, %v897_v52 }
 0x168   : > { %v1102_v28 = vpop.f32.mrf.mxu2  ;;  %1479 = vmatmul.f32.vlgmr.msrb.gmra.mxu1 %v6631_v50  ;;  %v5776_v50 = vld [vmem:[%s9759_s3 + $0x460] sm:$0xff] }
 0x169   : > { %v622_v23 = vmax.f32 %v591_v54, 0.0  ;;  %2128 = vmatmul.f32.gmra.mxu0 %v6972_v35  ;;  %2477 = vmatpush.msra.mxu2 %v5776_v50 }
 0x16a   : > { %1345 = vmatmul.f32.gmra.mxu3 %v7130_v29 }
 0x16b   : > { %v682_v40 = vmul.f32 %v655_v48, %v622_v23  ;;  %v1298_v53 = vpop.f32.mrf.mxu3 }
 0x16c   : > { %v7138_v61 = vadd.f32 %v1298_v53, %v1154_v13 }
 0x16d   : > { %766 = vst [vmem:[#allocation2 + $0x1a8] sm:$0xff] %v682_v40  ;;  %1687 = vmatmul.f32.gmra.mxu2 %v6633_v51 }
 0x16e   : > { %v593_v11 = vpop.f32.mrf.mxu0  ;;  %v900_v23 = vpop.f32.mrf.mxu1 }
 0x16f   : > { %v594_v34 = vadd.f32 %v6185_v33, %v593_v11 }
 0x170   : > { %v1105_v4 = vpop.f32.mrf.mxu2  ;;  %1482 = vmatmul.f32.gmra.mxu1 %v6653_v63  ;;  %v5775_v63 = vld [vmem:[%s9759_s3 + $0x458] sm:$0xff] }
 0x171   : > { %v623_v54 = vmax.f32 %v594_v34, 0.0  ;;  %2131 = vmatmul.f32.gmra.mxu0 %v7003_v3  ;;  %2478 = vmatpush.msra.mxu2 %v5775_v63  ;;  %v5774_v34 = vld [vmem:[%s9759_s3 + $0x450] sm:$0xff] }
 0x172   : > { %1883 = vmatmul.f32.vlgmr.msrb.gmra.mxu3 %v6655_v0  ;;  %v1156_v0 = vadd.f32 %v1102_v28, %v900_v23 }
 0x173   : > { %v683_v51 = vmul.f32 %v655_v48, %v623_v54  ;;  %v1301_v17 = vpop.f32.mrf.mxu3  ;;  %2479 = vmatpush.msra.mxu2 %v5774_v34 }
 0x174   : > { %v7150_v40 = vadd.f32 %v1301_v17, %v1155_v45 }
 0x175   : > { %767 = vst [vmem:[#allocation2 + $0x1b0] sm:$0xff] %v683_v51  ;;  %1690 = vmatmul.f32.gmra.mxu2 %v6657_v1 }
 0x176   : > { %v903_v48 = vpop.f32.mrf.mxu1 }
 0x178   : > { %v1108_v11 = vpop.f32.mrf.mxu2  ;;  %1485 = vmatmul.f32.gmra.mxu1 %v6682_v14  ;;  %v5759_v14 = vld [vmem:[%s9759_s3 + $0x3d8] sm:$0xff] }
 0x179   : > { %2134 = vmatmul.f32.gmra.mxu0 %v7036_v59  ;;  %2276 = vmatpush.msra.mxu1 %v5759_v14 }
 0x17a   : > { %1886 = vmatmul.f32.gmra.mxu3 %v6686_v16 }
 0x17b   : > { %v1304_v1 = vpop.f32.mrf.mxu3 }
 0x17c   : > { %v7159_v52 = vadd.f32 %v1304_v1, %v1156_v0 }
 0x17d   : > { %1693 = vmatmul.f32.gmra.mxu2 %v6684_v15  ;;  %v1157_v15 = vadd.f32 %v1105_v4, %v903_v48 }
 0x17e   : > { %v906_v13 = vpop.f32.mrf.mxu1 }
 0x180   : > { %v1111_v60 = vpop.f32.mrf.mxu2  ;;  %1488 = vmatmul.f32.gmra.mxu1 %v6707_v25  ;;  %v5758_v25 = vld [vmem:[%s9759_s3 + $0x3d0] sm:$0xff] }
 0x181   : > { %2137 = vmatmul.f32.gmra.mxu0 %v7069_v49  ;;  %2277 = vmatpush.msra.mxu1 %v5758_v25 }
 0x182   : > { %1889 = vmatmul.f32.gmra.mxu3 %v6709_v26  ;;  %v1158_v26 = vadd.f32 %v1108_v11, %v906_v13  ;;  %v5772_v11 = vld [vmem:[%s9759_s3 + $0x440] sm:$0xff]  ;;  %v5755_v13 = vld [vmem:[%s9759_s3 + $0x3b8] sm:$0xff] }
 0x183   : > { %v1307_v16 = vpop.f32.mrf.mxu3  ;;  %2278 = vmatpush.msra.mxu1 %v5757_v37  ;;  %v5768_v37 = vld [vmem:[%s9759_s3 + $0x420] sm:$0xff] }
 0x184   : > { %v7168_v28 = vadd.f32 %v1307_v16, %v1157_v15 }
 0x185   : > { %1696 = vmatmul.f32.gmra.mxu2 %v6711_v27 }
 0x186   : > { %v909_v53 = vpop.f32.mrf.mxu1 }
 0x188   : > { %v1114_v33 = vpop.f32.mrf.mxu2  ;;  %1491 = vmatmul.f32.gmra.mxu1 %v6739_v41  ;;  %v5773_v41 = vld [vmem:[%s9759_s3 + $0x448] sm:$0xff] }
 0x189   : > { %2140 = vmatmul.f32.gmra.mxu0 %v7091_v46  ;;  %2480 = vmatpush.msra.mxu2 %v5773_v41 }
 0x18a   : > { %1892 = vmatmul.f32.gmra.mxu3 %v6746_v44 }
 0x18b   : > { %v1310_v27 = vpop.f32.mrf.mxu3  ;;  %2481 = vmatpush.msra.mxu2 %v5772_v11 }
 0x18c   : > { %v7180_v54 = vadd.f32 %v1310_v27, %v1158_v26 }
 0x18d   : > { %1699 = vmatmul.f32.gmra.mxu2 %v6741_v42  ;;  %v1159_v42 = vadd.f32 %v1111_v60, %v909_v53 }
 0x18e   : > { %v912_v50 = vpop.f32.mrf.mxu1 }
 0x190   : > { %v1117_v4 = vpop.f32.mrf.mxu2  ;;  %1494 = vmatmul.f32.gmra.mxu1 %v6764_v55  ;;  %v1160_v55 = vadd.f32 %v1114_v33, %v912_v50  ;;  %v5770_v33 = vld [vmem:[%s9759_s3 + $0x430] sm:$0xff]  ;;  %v5753_v50 = vld [vmem:[%s9759_s3 + $0x3a8] sm:$0xff] }
 0x191   : > { %2143 = vmatmul.f32.gmra.mxu0 %v7109_v36 }
 0x192   : > { %1895 = vmatmul.f32.gmra.mxu3 %v6766_v56 }
 0x193   : > { %v1313_v44 = vpop.f32.mrf.mxu3 }
 0x194   : > { %v7189_v23 = vadd.f32 %v1313_v44, %v1159_v42 }
 0x195   : > { %1702 = vmatmul.f32.gmra.mxu2 %v6768_v57 }
 0x196   : > { %v915_v45 = vpop.f32.mrf.mxu1 }
 0x198   : > { %v1120_v51 = vpop.f32.mrf.mxu2  ;;  %1497 = vmatmul.f32.gmra.mxu1 %v6781_v5  ;;  %v5756_v5 = vld [vmem:[%s9759_s3 + $0x3c0] sm:$0xff] }
 0x199   : > { %2279 = vmatpush.msra.mxu1 %v5756_v5 }
 0x19a   : > { %1898 = vmatmul.f32.gmra.mxu3 %v6785_v7 }
 0x19b   : > { %v1316_v56 = vpop.f32.mrf.mxu3  ;;  %2280 = vmatpush.msra.mxu1 %v5755_v13 }
 0x19c   : > { %v7197_v57 = vadd.f32 %v1316_v56, %v1160_v55  ;;  %v9822_v55 = vld [vmem:[#allocation10_spill] sm:$0xff]  ;;  %v9823_v56 = vld [vmem:[#allocation11_spill] sm:$0xff] }
 0x19d   : > { %1705 = vmatmul.f32.gmra.mxu2 %v6783_v6  ;;  %v1161_v6 = vadd.f32 %v1117_v4, %v915_v45 }
 0x19e   : > { %v918_v48 = vpop.f32.mrf.mxu1 }
 0x1a0   : > { %v1123_v17 = vpop.f32.mrf.mxu2  ;;  %1500 = vmatmul.f32.gmra.mxu1 %v6800_v19  ;;  %v5771_v19 = vld [vmem:[%s9759_s3 + $0x438] sm:$0xff] }
 0x1a1   : > { %2482 = vmatpush.msra.mxu2 %v5771_v19  ;;  %v5767_v19 = vld [vmem:[%s9759_s3 + $0x418] sm:$0xff] }
 0x1a2   : > { %1901 = vmatmul.f32.gmra.mxu3 %v6802_v20  ;;  %v1162_v20 = vadd.f32 %v1120_v51, %v918_v48 }
 0x1a3   : > { %v1319_v7 = vpop.f32.mrf.mxu3  ;;  %2483 = vmatpush.msra.mxu2 %v5770_v33  ;;  %v9828_v33 = vld [vmem:[#allocation16_spill] sm:$0xff] }
 0x1a4   : > { %v7208_v63 = vadd.f32 %v1319_v7, %v1161_v6 }
 0x1a5   : > { %1708 = vmatmul.f32.gmra.mxu2 %v6804_v21 }
 0x1a6   : > { %v921_v1 = vpop.f32.mrf.mxu1 }
 0x1a8   : > { %v1126_v0 = vpop.f32.mrf.mxu2  ;;  %1503 = vmatmul.f32.gmra.mxu1 %v6816_v30  ;;  %v1163_v30 = vadd.f32 %v1123_v17, %v921_v1  ;;  %v9824_v17 = vld [vmem:[#allocation12_spill] sm:$0xff]  ;;  %v9826_v1 = vld [vmem:[#allocation15_spill] sm:$0xff] }
 0x1aa   : > { %1904 = vmatmul.f32.gmra.mxu3 %v6820_v32 }
 0x1ab   : > { %v1322_v21 = vpop.f32.mrf.mxu3 }
 0x1ac   : > { %v7216_v60 = vadd.f32 %v1322_v21, %v1162_v20  ;;  %v9827_v20 = vld [vmem:[#allocation14_spill] sm:$0xff] }
 0x1ad   : > { %1711 = vmatmul.f32.gmra.mxu2 %v6818_v31 }
 0x1ae   : > { %v924_v15 = vpop.f32.mrf.mxu1 }
 0x1b0   : > { %v1129_v14 = vpop.f32.mrf.mxu2  ;;  %1506 = vmatmul.f32.gmra.mxu1 %v6831_v38  ;;  %v5754_v38 = vld [vmem:[%s9759_s3 + $0x3b0] sm:$0xff] }
 0x1b1   : > { %2281 = vmatpush.msra.mxu1 %v5754_v38 }
 0x1b2   : > { %1907 = vmatmul.f32.gmra.mxu3 %v6833_v39  ;;  %v1164_v39 = vadd.f32 %v1126_v0, %v924_v15  ;;  %v9825_v0 = vld [vmem:[#allocation13_spill] sm:$0xff] }
 0x1b3   : > { %v1325_v31 = vpop.f32.mrf.mxu3  ;;  %2282 = vmatpush.msra.mxu1 %v5753_v50 }
 0x1b4   : > { %v7224_v32 = vadd.f32 %v1325_v31, %v1163_v30  ;;  %v5751_v30 = vld [vmem:[%s9759_s3 + $0x398] sm:$0xff] }
 0x1b5   : > { %1714 = vmatmul.f32.gmra.mxu2 %v6835_v43  ;;  %v5797_v31 = vld [vmem:[%s9761_s5 + $0xf8] sm:$0xff] }
 0x1b6   : > { %v927_v34 = vpop.f32.mrf.mxu1  ;;  %2882 = vmatpush.msra.mxu3 %v5797_v31 }
 0x1b8   : > { %v1132_v16 = vpop.f32.mrf.mxu2  ;;  %1509 = vmatmul.f32.gmra.mxu1 %v6853_v58  ;;  %v5769_v58 = vld [vmem:[%s9759_s3 + $0x428] sm:$0xff] }
 0x1b9   : > { %2484 = vmatpush.msra.mxu2 %v5769_v58  ;;  %v2844_v58 = vld [vmem:[%s9761_s5 + $0x78] sm:$0xff] }
 0x1ba   : > { %1910 = vmatmul.f32.gmra.mxu3 %v6859_v2  ;;  %v1165_v2 = vadd.f32 %v1129_v14, %v927_v34  ;;  %v9829_v34 = vld [vmem:[#allocation17_spill] sm:$0xff]  ;;  %2959 = vmatpush.msra.mxu0 %v2844_v58  ;;  %v5794_v58 = vld [vmem:[%s9761_s5 + $0xe0] sm:$0xff] }
 0x1bb   : > { %2485 = vmatpush.msra.mxu2 %v5768_v37 }
 0x1bd   : > { %1717 = vmatmul.f32.gmra.mxu2 %v6857_v62  ;;  %v1328_v43 = vpop.f32.mrf.mxu3 }
 0x1be   : > { %v7235_v53 = vadd.f32 %v1328_v43, %v1164_v39  ;;  %v930_v26 = vpop.f32.mrf.mxu1  ;;  %2486 = vmatpush.msra.mxu2 %v5767_v19  ;;  %v9836_v19 = vld [vmem:[#allocation24_spill] sm:$0xff] }
 0x1bf   : > { %v1166_v42 = vadd.f32 %v1132_v16, %v930_v26  ;;  %v5766_v26 = vld [vmem:[%s9759_s3 + $0x410] sm:$0xff] }
 0x1c0   : > { %v1135_v25 = vpop.f32.mrf.mxu2  ;;  %1512 = vmatmul.f32.gmra.mxu1 %v6870_v8  ;;  %v9820_v8 = vld [vmem:[#allocation9_spill] sm:$0xff]  ;;  %2487 = vmatpush.msra.mxu2 %v5766_v26  ;;  %v5748_v26 = vld [vmem:[%s9759_s3 + $0x380] sm:$0xff] }
 0x1c2   : > { %1913 = vmatmul.f32.gmra.mxu3 %v6872_v9  ;;  %v9821_v9 = vld [vmem:[#allocation8_spill] sm:$0xff] }
 0x1c5   : > { %1720 = vmatmul.f32.gmra.mxu2 %v6874_v10  ;;  %v1331_v62 = vpop.f32.mrf.mxu3 }
 0x1c6   : > { %v7243_v27 = vadd.f32 %v1331_v62, %v1165_v2  ;;  %v933_v41 = vpop.f32.mrf.mxu1 }
 0x1c7   : > { %v1167_v11 = vadd.f32 %v1135_v25, %v933_v41  ;;  %v5750_v41 = vld [vmem:[%s9759_s3 + $0x390] sm:$0xff] }
 0x1c8   : > { %v1138_v4 = vpop.f32.mrf.mxu2  ;;  %1515 = vmatmul.f32.gmra.mxu1 %v6889_v24  ;;  %v5752_v24 = vld [vmem:[%s9759_s3 + $0x3a0] sm:$0xff] }
 0x1c9   : > { %2283 = vmatpush.msra.mxu1 %v5752_v24  ;;  %v9834_v24 = vld [vmem:[#allocation22_spill] sm:$0xff] }
 0x1ca   : > { %1916 = vmatmul.f32.gmra.mxu3 %v9820_v8  ;;  %v5796_v8 = vld [vmem:[%s9761_s5 + $0xf0] sm:$0xff] }
 0x1cb   : > { %2284 = vmatpush.msra.mxu1 %v5751_v30  ;;  %2883 = vmatpush.msra.mxu3 %v5796_v8  ;;  %v9838_v30 = vld [vmem:[#allocation25_spill] sm:$0xff]  ;;  %v9843_v8 = vld [vmem:[#allocation32_spill] sm:$0xff] }
 0x1cd   : > { %1723 = vmatmul.f32.gmra.mxu2 %v9821_v9  ;;  %v1334_v10 = vpop.f32.mrf.mxu3  ;;  %v9832_v9 = vld [vmem:[#allocation19_spill] sm:$0xff]  ;;  %2285 = vmatpush.msra.mxu1 %v5750_v41 }
 0x1ce   : > { %v7251_v44 = vadd.f32 %v1334_v10, %v1166_v42  ;;  %v936_v45 = vpop.f32.mrf.mxu1  ;;  %v2027_v41 = vld [vmem:[#allocation2 + $0x1a7] sm:$0xff] }
 0x1cf   : > { %v1168_v21 = vadd.f32 %v1138_v4, %v936_v45  ;;  %v9831_v4 = vld [vmem:[#allocation20_spill] sm:$0xff]  ;;  %v9833_v45 = vld [vmem:[#allocation21_spill] sm:$0xff] }
 0x1d0   : > { %v1141_v51 = vpop.f32.mrf.mxu2  ;;  %1518 = vmatmul.f32.gmra.mxu1 %v9822_v55 }
 0x1d2   : > { %1919 = vmatmul.f32.gmra.mxu3 %v9823_v56  ;;  %v7304_v56 = vld [vmem:[#allocation2 + $0x187] sm:$0xff] }
 0x1d3   : > { %2146 = vmatmul.f32.gmra.mxu0 %v7304_v56 }
 0x1d5   : > { %1726 = vmatmul.f32.gmra.mxu2 %v9824_v17  ;;  %v1337_v48 = vpop.f32.mrf.mxu3 }
 0x1d6   : > { %v7262_v5 = vadd.f32 %v1337_v48, %v1167_v11  ;;  %v939_v7 = vpop.f32.mrf.mxu1  ;;  %v5765_v11 = vld [vmem:[%s9759_s3 + $0x408] sm:$0xff]  ;;  %v2843_v48 = vld [vmem:[%s9761_s5 + $0x70] sm:$0xff] }
 0x1d7   : > { %v1169_v38 = vadd.f32 %v1141_v51, %v939_v7  ;;  %2488 = vmatpush.msra.mxu2 %v5765_v11  ;;  %2960 = vmatpush.msra.mxu0 %v2843_v48  ;;  %v9845_v11 = vld [vmem:[#allocation33_spill] sm:$0xff] }
 0x1d8   : > { %v1144_v6 = vpop.f32.mrf.mxu2  ;;  %1521 = vmatmul.f32.gmra.mxu1 %v9825_v0  ;;  %v5795_v0 = vld [vmem:[%s9761_s5 + $0xe8] sm:$0xff] }
 0x1d9   : > { %2884 = vmatpush.msra.mxu3 %v5795_v0 }
 0x1da   : > { %1922 = vmatmul.f32.gmra.mxu3 %v9826_v1 }
 0x1db   : > { %2885 = vmatpush.msra.mxu3 %v5794_v58 }
 0x1dd   : > { %1729 = vmatmul.f32.gmra.mxu2 %v9827_v20  ;;  %v1340_v14 = vpop.f32.mrf.mxu3 }
 0x1de   : > { %v7270_v13 = vadd.f32 %v1340_v14, %v1168_v21  ;;  %v942_v16 = vpop.f32.mrf.mxu1  ;;  %v2026_v21 = vld [vmem:[#allocation2 + $0x18f] sm:$0xff]  ;;  %v9837_v14 = vld [vmem:[#allocation26_spill] sm:$0xff] }
 0x1df   : > { %v1170_v42 = vadd.f32 %v1144_v6, %v942_v16  ;;  %v9835_v6 = vld [vmem:[#allocation23_spill] sm:$0xff]  ;;  %2149 = vmatmul.f32.gmra.mxu0 %v2026_v21  ;;  %v5764_v16 = vld [vmem:[%s9759_s3 + $0x400] sm:$0xff] }
 0x1e0   : > { %v1682_v15 = vpop.f32.mrf.mxu2  ;;  %1524 = vmatmul.f32.gmra.mxu1 %v6946_v12  ;;  %v9830_v12 = vld [vmem:[#allocation18_spill] sm:$0xff]  ;;  %2489 = vmatpush.msra.mxu2 %v5764_v16  ;;  %v2207_v16 = vld [vmem:[#allocation2 + $0x48] sm:$0xff] }
 0x1e2   : > { %1925 = vmatmul.f32.gmra.mxu3 %v9828_v33  ;;  %v2842_v33 = vld [vmem:[%s9761_s5 + $0x68] sm:$0xff] }
 0x1e3   : > { %2961 = vmatpush.msra.mxu0 %v2842_v33 }
 0x1e5   : > { %1732 = vmatmul.f32.gmra.mxu2 %v9829_v34  ;;  %v1343_v39 = vpop.f32.mrf.mxu3 }
 0x1e6   : > { %v7281_v43 = vadd.f32 %v1343_v39, %v1169_v38  ;;  %v1480_v2 = vpop.f32.mrf.mxu1  ;;  %v9840_v39 = vld [vmem:[#allocation28_spill] sm:$0xff] }
 0x1e7   : > { %v1552_v62 = vadd.f32 %v1480_v2, %v9830_v12  ;;  %v9841_v2 = vld [vmem:[#allocation29_spill] sm:$0xff]  ;;  %2152 = vmatmul.f32.gmra.mxu0 %v2027_v41  ;;  %v2209_v41 = vld [vmem:[#allocation2 + $0x68] sm:$0xff] }
 0x1e8   : > { %v1685_v25 = vpop.f32.mrf.mxu2  ;;  %1527 = vmatmul.f32.gmra.mxu1 %v6972_v35 }
 0x1e9   : > { %v7292_v50 = vadd.f32 %v1682_v15, %v1552_v62 }
 0x1ea   : > { %1928 = vmatmul.f32.gmra.mxu3 %v9831_v4  ;;  %v9842_v4 = vld [vmem:[#allocation30_spill] sm:$0xff] }
 0x1ed   : > { %1735 = vmatmul.f32.gmra.mxu2 %v9832_v9  ;;  %v1346_v10 = vpop.f32.mrf.mxu3 }
 0x1ee   : > { %v7301_v51 = vadd.f32 %v1346_v10, %v1170_v42  ;;  %v1483_v37 = vpop.f32.mrf.mxu1  ;;  %v2841_v42 = vld [vmem:[%s9761_s5 + $0x60] sm:$0xff]  ;;  %v9844_v10 = vld [vmem:[#allocation31_spill] sm:$0xff] }
 0x1ef   : > { %v1553_v55 = vadd.f32 %v1483_v37, %v9833_v45  ;;  %2962 = vmatpush.msra.mxu0 %v2841_v42  ;;  %v5793_v37 = vld [vmem:[%s9761_s5 + $0xd8] sm:$0xff]  ;;  %v2837_v42 = vld [vmem:[%s9761_s5 + $0x40] sm:$0xff] }
 0x1f0   : > { %v1688_v35 = vpop.f32.mrf.mxu2  ;;  %1530 = vmatmul.f32.gmra.mxu1 %v7003_v3  ;;  %v5749_v3 = vld [vmem:[%s9759_s3 + $0x388] sm:$0xff]  ;;  %2886 = vmatpush.msra.mxu3 %v5793_v37 }
 0x1f1   : > { %v7308_v17 = vadd.f32 %v1685_v25, %v1553_v55  ;;  %2286 = vmatpush.msra.mxu1 %v5749_v3  ;;  %v2028_v55 = vld [vmem:[#allocation2 + $0x1af] sm:$0xff] }
 0x1f2   : > { %1931 = vmatmul.f32.gmra.mxu3 %v9834_v24  ;;  %2155 = vmatmul.f32.gmra.mxu0 %v2028_v55  ;;  %v2414_v55 = vld [vmem:[#allocation2 + $0x91] sm:$0xff] }
 0x1f3   : > { %2287 = vmatpush.msra.mxu1 %v5748_v26 }
 0x1f5   : > { %1738 = vmatmul.f32.gmra.mxu2 %v9835_v6  ;;  %v2840_v6 = vld [vmem:[%s9761_s5 + $0x58] sm:$0xff] }
 0x1f6   : > { %v1486_v1 = vpop.f32.mrf.mxu1  ;;  %2963 = vmatpush.msra.mxu0 %v2840_v6  ;;  %v7419_v6 = vpop.f32.mrf.mxu3 }
 0x1f7   : > { %v1554_v20 = vadd.f32 %v1486_v1, %v9836_v19 }
 0x1f8   : > { %v1691_v7 = vpop.f32.mrf.mxu2  ;;  %1533 = vmatmul.f32.gmra.mxu1 %v7036_v59  ;;  %v9839_v59 = vld [vmem:[#allocation27_spill] sm:$0xff] }
 0x1f9   : > { %v7327_v15 = vadd.f32 %v1688_v35, %v1554_v20  ;;  %v7378_v20 = vld [vmem:[#allocation2 + $0x189] sm:$0xff] }
 0x1fa   : > { %1934 = vmatmul.f32.gmra.mxu3 %v9837_v14 }
 0x1fd   : > { %1741 = vmatmul.f32.gmra.mxu2 %v9838_v30  ;;  %v5791_v30 = vld [vmem:[%s9761_s5 + $0xc8] sm:$0xff] }
 0x1fe   : > { %v1489_v34 = vpop.f32.mrf.mxu1 }
 0x1ff   : > { %v1555_v38 = vadd.f32 %v1489_v34, %v9839_v59  ;;  %v2411_v34 = vld [vmem:[#allocation2 + $0x69] sm:$0xff] }
 0x200   : > { %v1694_v31 = vpop.f32.mrf.mxu2  ;;  %1536 = vmatmul.f32.gmra.mxu1 %v7069_v49 }
 0x201   : > { %v7339_v25 = vadd.f32 %v1691_v7, %v1555_v38  ;;  %v2838_v38 = vld [vmem:[%s9761_s5 + $0x48] sm:$0xff] }
 0x202   : > { %1937 = vmatmul.f32.gmra.mxu3 %v9840_v39 }
 0x205   : > { %1744 = vmatmul.f32.gmra.mxu2 %v9841_v2  ;;  %v2412_v2 = vld [vmem:[#allocation2 + $0x71] sm:$0xff] }
 0x206   : > { %v1492_v62 = vpop.f32.mrf.mxu1 }
 0x207   : > { %v1556_v49 = vadd.f32 %v1492_v62, %v9842_v4 }
 0x208   : > { %v1697_v12 = vpop.f32.mrf.mxu2  ;;  %1539 = vmatmul.f32.gmra.mxu1 %v7091_v46 }
 0x209   : > { %v7351_v9 = vadd.f32 %v1694_v31, %v1556_v49  ;;  %v7390_v31 = vld [vmem:[#allocation2 + $0x191] sm:$0xff] }
 0x20a   : > { %1940 = vmatmul.f32.gmra.mxu3 %v9843_v8 }
 0x20d   : > { %1747 = vmatmul.f32.gmra.mxu2 %v9844_v10 }
 0x20e   : > { %v1495_v45 = vpop.f32.mrf.mxu1 }
 0x20f   : > { %v1557_v46 = vadd.f32 %v1495_v45, %v7106_v47  ;;  %v5792_v47 = vld [vmem:[%s9761_s5 + $0xd0] sm:$0xff] }
 0x210   : > { %v1700_v35 = vpop.f32.mrf.mxu2  ;;  %1542 = vmatmul.f32.gmra.mxu1 %v7109_v36  ;;  %2887 = vmatpush.msra.mxu3 %v5792_v47  ;;  %v2210_v45 = vld [vmem:[#allocation2 + $0x70] sm:$0xff] }
 0x211   : > { %v7363_v24 = vadd.f32 %v1697_v12, %v1557_v46  ;;  %v5790_v12 = vld [vmem:[%s9761_s5 + $0xc0] sm:$0xff]  ;;  %v2415_v47 = vld [vmem:[#allocation2 + $0xa9] sm:$0xff] }
 0x212   : > { %1943 = vmatmul.f32.gmra.mxu3 %v7111_v22  ;;  %v2409_v22 = vld [vmem:[#allocation2 + $0x49] sm:$0xff] }
 0x213   : > { %2888 = vmatpush.msra.mxu3 %v5791_v30 }
 0x215   : > { %1750 = vmatmul.f32.gmra.mxu2 %v9845_v11  ;;  %2889 = vmatpush.msra.mxu3 %v5790_v12 }
 0x216   : > { %v1498_v7 = vpop.f32.mrf.mxu1 }
 0x217   : > { %v1558_v3 = vadd.f32 %v1498_v7, %v7124_v18 }
 0x218   : > { %v1703_v48 = vpop.f32.mrf.mxu2  ;;  %1545 = vmatmul.f32.gmra.mxu1 %v7304_v56  ;;  %v2839_v56 = vld [vmem:[%s9761_s5 + $0x50] sm:$0xff] }
 0x219   : > { %v7372_v36 = vadd.f32 %v1700_v35, %v1558_v3  ;;  %2964 = vmatpush.msra.mxu0 %v2839_v56  ;;  %v5789_v35 = vld [vmem:[%s9761_s5 + $0xb8] sm:$0xff] }
 0x21a   : > { %1946 = vmatmul.f32.gmra.mxu3 %v7130_v29  ;;  %v2410_v29 = vld [vmem:[#allocation2 + $0x51] sm:$0xff] }
 0x21b   : > { %2965 = vmatpush.msra.mxu0 %v2838_v38  ;;  %2890 = vmatpush.msra.mxu3 %v5789_v35 }
 0x21d   : > { %2490 = vmatmul.f32.vlgmr.msra.gmra.mxu2 %v2409_v22  ;;  %2966 = vmatpush.msra.mxu0 %v2837_v42  ;;  %v2211_v22 = vld [vmem:[#allocation2 + $0x88] sm:$0xff]  ;;  %v2418_v42 = vld [vmem:[#allocation2 + $0xd1] sm:$0xff] }
 0x21e   : > { %v1501_v1 = vpop.f32.mrf.mxu1 }
 0x21f   : > { %v1559_v19 = vadd.f32 %v1501_v1, %v7138_v61  ;;  %v7427_v1 = vpop.f32.mrf.mxu0 }
 0x220   : > { %v1706_v0 = vpop.f32.mrf.mxu2  ;;  %1548 = vmatmul.f32.gmra.mxu1 %v2026_v21 }
 0x221   : > { %v7381_v18 = vadd.f32 %v1703_v48, %v1559_v19  ;;  %v2836_v48 = vld [vmem:[%s9761_s5 + $0x38] sm:$0xff] }
 0x222   : > { %1949 = vmatmul.f32.gmra.mxu3 %v7378_v20  ;;  %2967 = vmatpush.msra.mxu0 %v2836_v48  ;;  %v2833_v48 = vld [vmem:[%s9761_s5 + $0x20] sm:$0xff] }
 0x225   : > { %2493 = vmatmul.f32.gmra.mxu2 %v2410_v29 }
 0x226   : > { %v1504_v61 = vpop.f32.mrf.mxu1 }
 0x227   : > { %v1560_v21 = vadd.f32 %v1504_v61, %v7150_v40  ;;  %v2208_v40 = vld [vmem:[#allocation2 + $0x50] sm:$0xff] }
 0x228   : > { %v1709_v14 = vpop.f32.mrf.mxu2  ;;  %2288 = vmatmul.f32.vlgmr.msra.gmra.mxu1 %v2207_v16  ;;  %v2416_v61 = vld [vmem:[#allocation2 + $0xb1] sm:$0xff] }
 0x229   : > { %v7393_v33 = vadd.f32 %v1706_v0, %v1560_v21  ;;  %v5788_v0 = vld [vmem:[%s9761_s5 + $0xb0] sm:$0xff] }
 0x22a   : > { %1952 = vmatmul.f32.gmra.mxu3 %v7390_v31  ;;  %v2835_v21 = vld [vmem:[%s9761_s5 + $0x30] sm:$0xff] }
 0x22b   : > { %2891 = vmatpush.msra.mxu3 %v5788_v0  ;;  %2968 = vmatpush.msra.mxu0 %v2835_v21  ;;  %v2832_v21 = vld [vmem:[%s9761_s5 + $0x18] sm:$0xff] }
 0x22d   : > { %2496 = vmatmul.f32.gmra.mxu2 %v2411_v34  ;;  %v5787_v34 = vld [vmem:[%s9761_s5 + $0xa8] sm:$0xff] }
 0x22e   : > { %v1507_v39 = vpop.f32.mrf.mxu1  ;;  %2892 = vmatpush.msra.mxu3 %v5787_v34 }
 0x22f   : > { %v1561_v26 = vadd.f32 %v1507_v39, %v7159_v52  ;;  %v2413_v52 = vld [vmem:[#allocation2 + $0x89] sm:$0xff] }
 0x230   : > { %v1712_v59 = vpop.f32.mrf.mxu2  ;;  %2291 = vmatmul.f32.gmra.mxu1 %v2208_v40  ;;  %v2213_v39 = vld [vmem:[#allocation2 + $0xa8] sm:$0xff] }
 0x231   : > { %v7399_v58 = vadd.f32 %v1709_v14, %v1561_v26  ;;  %v7430_v14 = vpop.f32.mrf.mxu3  ;;  %v2417_v40 = vld [vmem:[#allocation2 + $0xc9] sm:$0xff] }
 0x235   : > { %2499 = vmatmul.f32.gmra.mxu2 %v2412_v2 }
 0x236   : > { %v1510_v4 = vpop.f32.mrf.mxu1 }
 0x237   : > { %v1562_v49 = vadd.f32 %v1510_v4, %v7168_v28 }
 0x238   : > { %v1715_v62 = vpop.f32.mrf.mxu2  ;;  %2294 = vmatmul.f32.gmra.mxu1 %v2209_v41 }
 0x239   : > { %v7405_v8 = vadd.f32 %v1712_v59, %v1562_v49  ;;  %v7440_v59 = vpop.f32.mrf.mxu0  ;;  %v7445_v2 = vpop.f32.mrf.mxu3 }
 0x23d   : > { %2502 = vmatmul.f32.gmra.mxu2 %v2413_v52 }
 0x23e   : > { %v1513_v37 = vpop.f32.mrf.mxu1 }
 0x23f   : > { %v1563_v28 = vadd.f32 %v1513_v37, %v7180_v54 }
 0x240   : > { %v1718_v10 = vpop.f32.mrf.mxu2  ;;  %2297 = vmatmul.f32.gmra.mxu1 %v2210_v45 }
 0x241   : > { %v7414_v46 = vadd.f32 %v1715_v62, %v1563_v28  ;;  %v2834_v62 = vld [vmem:[%s9761_s5 + $0x28] sm:$0xff]  ;;  %v7451_v41 = vpop.f32.mrf.mxu0  ;;  %v7458_v35 = vpop.f32.mrf.mxu3 }
 0x242   : > { %2969 = vmatpush.msra.mxu0 %v2834_v62 }
 0x244   : > { %2970 = vmatpush.msra.mxu0 %v2833_v48 }
 0x245   : > { %2505 = vmatmul.f32.gmra.mxu2 %v2414_v55 }
 0x246   : > { %v1516_v7 = vpop.f32.mrf.mxu1  ;;  %2971 = vmatpush.msra.mxu0 %v2832_v21  ;;  %v2220_v21 = vld [vmem:[#allocation2 + $0x110] sm:$0xff] }
 0x247   : > { %v1564_v3 = vadd.f32 %v1516_v7, %v7189_v23  ;;  %v2212_v23 = vld [vmem:[#allocation2 + $0x90] sm:$0xff] }
 0x248   : > { %v1721_v11 = vpop.f32.mrf.mxu2  ;;  %2300 = vmatmul.f32.gmra.mxu1 %v2211_v22  ;;  %v5785_v22 = vld [vmem:[%s9761_s5 + $0x98] sm:$0xff] }
 0x249   : > { %v7422_v54 = vadd.f32 %v1718_v10, %v1564_v3  ;;  %v5786_v10 = vld [vmem:[%s9761_s5 + $0xa0] sm:$0xff]  ;;  %v7466_v7 = vpop.f32.mrf.mxu0 }
 0x24a   : > { %2893 = vmatpush.msra.mxu3 %v5786_v10  ;;  %v2831_v10 = vld [vmem:[%s9761_s5 + $0x10] sm:$0xff] }
 0x24b   : > { %2972 = vmatpush.msra.mxu0 %v2831_v10 }
 0x24c   : > { %2894 = vmatpush.msra.mxu3 %v5785_v22 }
 0x24d   : > { %2508 = vmatmul.f32.gmra.mxu2 %v2415_v47  ;;  %v7471_v47 = vpop.f32.mrf.mxu3 }
 0x24e   : > { %v1519_v29 = vpop.f32.mrf.mxu1 }
 0x24f   : > { %v1565_v56 = vadd.f32 %v1519_v29, %v7197_v57 }
 0x250   : > { %v1724_v19 = vpop.f32.mrf.mxu2  ;;  %2303 = vmatmul.f32.gmra.mxu1 %v2212_v23 }
 0x251   : > { %v7432_v30 = vadd.f32 %v1721_v11, %v1565_v56  ;;  %v2419_v11 = vld [vmem:[#allocation2 + $0xe9] sm:$0xff]  ;;  %v2420_v56 = vld [vmem:[#allocation2 + $0xf1] sm:$0xff]  ;;  %v7476_v23 = vpop.f32.mrf.mxu0 }
 0x255   : > { %2511 = vmatmul.f32.gmra.mxu2 %v2416_v61 }
 0x256   : > { %v1522_v57 = vpop.f32.mrf.mxu1 }
 0x257   : > { %v1566_v38 = vadd.f32 %v1522_v57, %v7208_v63  ;;  %v2214_v63 = vld [vmem:[#allocation2 + $0xb0] sm:$0xff]  ;;  %v7482_v57 = vpop.f32.mrf.mxu3 }
 0x258   : > { %v1727_v16 = vpop.f32.mrf.mxu2  ;;  %2306 = vmatmul.f32.gmra.mxu1 %v2213_v39  ;;  %v2421_v39 = vld [vmem:[#allocation2 + $0x109] sm:$0xff] }
 0x259   : > { %v7443_v26 = vadd.f32 %v1724_v19, %v1566_v38  ;;  %v2216_v19 = vld [vmem:[#allocation2 + $0xd0] sm:$0xff]  ;;  %v7489_v62 = vpop.f32.mrf.mxu0 }
 0x25d   : > { %2514 = vmatmul.f32.gmra.mxu2 %v2417_v40  ;;  %v5784_v40 = vld [vmem:[%s9761_s5 + $0x90] sm:$0xff] }
 0x25e   : > { %v1525_v4 = vpop.f32.mrf.mxu1  ;;  %2895 = vmatpush.msra.mxu3 %v5784_v40 }
 0x25f   : > { %v1567_v49 = vadd.f32 %v1525_v4, %v7216_v60  ;;  %v2215_v60 = vld [vmem:[#allocation2 + $0xc8] sm:$0xff] }
 0x260   : > { %v1730_v12 = vpop.f32.mrf.mxu2  ;;  %2309 = vmatmul.f32.gmra.mxu1 %v2214_v63 }
 0x261   : > { %v7453_v52 = vadd.f32 %v1727_v16, %v1567_v49  ;;  %v7506_v48 = vpop.f32.mrf.mxu0 }
 0x265   : > { %2517 = vmatmul.f32.gmra.mxu2 %v2418_v42  ;;  %v2422_v42 = vld [vmem:[#allocation2 + $0x111] sm:$0xff] }
 0x266   : > { %v1528_v28 = vpop.f32.mrf.mxu1 }
 0x267   : > { %v1568_v45 = vadd.f32 %v1528_v28, %v7224_v32 }
 0x268   : > { %v1733_v37 = vpop.f32.mrf.mxu2  ;;  %2312 = vmatmul.f32.gmra.mxu1 %v2215_v60 }
 0x269   : > { %v7461_v55 = vadd.f32 %v1730_v12, %v1568_v45  ;;  %v5783_v45 = vld [vmem:[%s9761_s5 + $0x88] sm:$0xff] }
 0x26a   : > { %2896 = vmatpush.msra.mxu3 %v5783_v45  ;;  %v7535_v45 = vstv %s2687_s24  ;;  %s4020_s24 = sadd.s32 4294967295, %s6475_s21 }
 0x26d   : > { %2520 = vmatmul.f32.gmra.mxu2 %v2419_v11  ;;  %v5845_v11 = vld [vmem:[%s9761_s5 + $0x278] sm:$0xff] }
 0x26e   : > { %v1531_v32 = vpop.f32.mrf.mxu1  ;;  %3342 = vmatpush.msrb.mxu1 %v5845_v11 }
 0x26f   : > { %v1569_v0 = vadd.f32 %v1531_v32, %v7235_v53  ;;  %v2217_v53 = vld [vmem:[#allocation2 + $0xe8] sm:$0xff] }
 0x270   : > { %v1736_v3 = vpop.f32.mrf.mxu2  ;;  %2315 = vmatmul.f32.gmra.mxu1 %v2216_v19  ;;  %v2423_v32 = vld [vmem:[#allocation2 + $0x129] sm:$0xff] }
 0x271   : > { %v7474_v29 = vadd.f32 %v1733_v37, %v1569_v0  ;;  %v7497_v37 = vpop.f32.mrf.mxu3 }
 0x275   : > { %2523 = vmatmul.f32.gmra.mxu2 %v2420_v56 }
 0x276   : > { %v1534_v16 = vpop.f32.mrf.mxu1 }
 0x277   : > { %v1570_v34 = vadd.f32 %v1534_v16, %v7243_v27  ;;  %v2218_v27 = vld [vmem:[#allocation2 + $0xf0] sm:$0xff] }
 0x278   : > { %v1739_v61 = vpop.f32.mrf.mxu2  ;;  %2318 = vmatmul.f32.gmra.mxu1 %v2217_v53  ;;  %v2830_v53 = vld [vmem:[%s9761_s5 + $0x8] sm:$0xff] }
 0x279   : > { %v7484_v38 = vadd.f32 %v1736_v3, %v1570_v34  ;;  %v2219_v3 = vld [vmem:[#allocation2 + $0x108] sm:$0xff]  ;;  %v7510_v0 = vpop.f32.mrf.mxu3  ;;  %v2424_v34 = vld [vmem:[#allocation2 + $0x131] sm:$0xff]  ;;  %2973 = vmatpush.msra.mxu0 %v2830_v53 }
 0x27a   : > { %v5843_v53 = vld [vmem:[%s9761_s5 + $0x268] sm:$0xff] }
 0x27d   : > { %2526 = vmatmul.f32.gmra.mxu2 %v2421_v39  ;;  %v5844_v39 = vld [vmem:[%s9761_s5 + $0x270] sm:$0xff] }
 0x27e   : > { %v1537_v4 = vpop.f32.mrf.mxu1  ;;  %3343 = vmatpush.msrb.mxu1 %v5844_v39 }
 0x27f   : > { %v1571_v49 = vadd.f32 %v1537_v4, %v7251_v44 }
 0x280   : > { %v1742_v12 = vpop.f32.mrf.mxu2  ;;  %2321 = vmatmul.f32.gmra.mxu1 %v2218_v27  ;;  %v2829_v27 = vld [vmem:[%s9761_s5] sm:$0xff] }
 0x281   : > { %v7492_v63 = vadd.f32 %v1739_v61, %v1571_v49  ;;  %2974 = vmatpush.msra.mxu0 %v2829_v27  ;;  %3344 = vmatpush.msrb.mxu1 %v5843_v53  ;;  %v5842_v53 = vld [vmem:[%s9761_s5 + $0x260] sm:$0xff] }
 0x283   : > { %3345 = vmatpush.msrb.mxu1 %v5842_v53  ;;  %v5854_v53 = vld [vmem:[%s9761_s5 + $0x2c0] sm:$0xff] }
 0x285   : > { %2529 = vmatmul.f32.gmra.mxu2 %v2422_v42  ;;  %v2221_v42 = vld [vmem:[#allocation2 + $0x128] sm:$0xff] }
 0x286   : > { %v1540_v60 = vpop.f32.mrf.mxu1 }
 0x287   : > { %v1572_v44 = vadd.f32 %v1540_v60, %v7262_v5  ;;  %v5782_v5 = vld [vmem:[%s9761_s5 + $0x80] sm:$0xff] }
 0x288   : > { %v1745_v28 = vpop.f32.mrf.mxu2  ;;  %2324 = vmatmul.f32.gmra.mxu1 %v2219_v3  ;;  %2897 = vmatpush.msra.mxu3 %v5782_v5  ;;  %v9846_v3 = vld [vmem:[#allocation6_spill] sm:$0xff] }
 0x289   : > { %v7508_v22 = vadd.f32 %v1742_v12, %v1572_v44  ;;  %v7526_v12 = vpop.f32.mrf.mxu3 }
 0x28d   : > { %2532 = vmatmul.f32.gmra.mxu2 %v2423_v32 }
 0x28e   : > { %v1543_v56 = vpop.f32.mrf.mxu1 }
 0x28f   : > { %v1573_v61 = vadd.f32 %v1543_v56, %v7270_v13  ;;  %v7524_v13 = vpop.f32.mrf.mxu0 }
 0x290   : > { %v1748_v19 = vpop.f32.mrf.mxu2  ;;  %2327 = vmatmul.f32.gmra.mxu1 %v2220_v21  ;;  %v2426_v21 = vld [vmem:[#allocation2 + $0x151] sm:$0xff] }
 0x291   : > { %v7516_v16 = vadd.f32 %v1745_v28, %v1573_v61  ;;  %v2425_v28 = vld [vmem:[#allocation2 + $0x149] sm:$0xff]  ;;  %v7542_v56 = vpop.f32.mrf.mxu3 }
 0x292   : > { %v2222_v61 = vld [vmem:[#allocation2 + $0x130] sm:$0xff] }
 0x295   : > { %2535 = vmatmul.f32.gmra.mxu2 %v2424_v34  ;;  %v5813_v34 = vld [vmem:[%s9761_s5 + $0x178] sm:$0xff] }
 0x296   : > { %v1546_v4 = vpop.f32.mrf.mxu1  ;;  %3073 = vmatpush.msrb.mxu3 %v5813_v34  ;;  %v5812_v34 = vld [vmem:[%s9761_s5 + $0x170] sm:$0xff] }
 0x297   : > { %v1574_v49 = vadd.f32 %v1546_v4, %v7281_v43  ;;  %v7537_v60 = vpop.f32.mrf.mxu0  ;;  %v2689_v43 = vadd.s32 %v7535_v45, %v9846_v3 }
 0x298   : > { %v1751_v40 = vpop.f32.mrf.mxu2  ;;  %2330 = vmatmul.f32.gmra.mxu1 %v2221_v42  ;;  %v7569_v42 = vld [vmem:[%s9760_s4] ss:$0 sm:$0xff]  ;;  %3074 = vmatpush.msrb.mxu3 %v5812_v34  ;;  %v2428_v34 = vld [vmem:[#allocation2 + $0x171] sm:$0xff] }
 0x299   : > { %v7533_v10 = vadd.f32 %v1748_v19, %v1574_v49  ;;  %v1956_v19 = vadd.f32 %v7419_v6, %v7292_v50  ;;  %vm2691_vm8 = vcmp.ge.s32.totalorder %v2689_v43, 0  ;;  %vm2693_vm9 = vcmp.lt.s32.totalorder %v2689_v43, 16  ;;  %v5861_v50 = vld [vmem:[%s9761_s5 + $0x2f8] sm:$0xff]  ;;  %v5859_v49 = vld [vmem:[%s9761_s5 + $0x2e8] sm:$0xff] }
 0x29a   : > { %3476 = vmatpush.msrb.mxu2 %v5861_v50  ;;  %vm2695_vm10 = vmand %vm2691_vm8, %vm2693_vm9  ;;  %v2427_v43 = vld [vmem:[#allocation2 + $0x169] sm:$0xff]  ;;  %v7590_v50 = vpop.f32.mrf.mxu3 }
 0x29b   : > { %v2159_v6 = vadd.f32 %v7427_v1, %v1956_v19 }
 0x29d   : > { %2538 = vmatmul.f32.gmra.mxu2 %v2425_v28  ;;  %v2223_v28 = vld [vmem:[#allocation2 + $0x148] sm:$0xff] }
 0x29e   : > { %v1549_v11 = vpop.f32.mrf.mxu1 }
 0x29f   : > { %v1575_v32 = vadd.f32 %v1549_v11, %v7301_v51  ;;  %v5860_v51 = vld [vmem:[%s9761_s5 + $0x2f0] sm:$0xff]  ;;  %v7571_v11 = vld [vmem:[#allocation2] sm:$0xff] }
 0x2a0   : > { %v2491_v44 = vpop.f32.mrf.mxu2  ;;  %2333 = vmatmul.f32.gmra.mxu1 %v2222_v61  ;;  %3477 = vmatpush.msrb.mxu2 %v5860_v51  ;;  %v7574_v1 = vsel %vm2695_vm10, 1.0, %v7571_v11  ;;  %v1957_v61 = vadd.f32 %v7430_v14, %v7308_v17  ;;  %v5857_v17 = vld [vmem:[%s9761_s5 + $0x2d8] sm:$0xff]  ;;  %v5856_v51 = vld [vmem:[%s9761_s5 + $0x2d0] sm:$0xff] }
 0x2a1   : > { %v7546_v5 = vadd.f32 %v1751_v40, %v1575_v32  ;;  %v7561_v40 = vpop.f32.mrf.mxu0  ;;  %v5858_v32 = vld [vmem:[%s9761_s5 + $0x2e0] sm:$0xff] }
 0x2a2   : > { %3478 = vmatpush.msrb.mxu2 %v5859_v49 }
 0x2a4   : > { %3479 = vmatpush.msrb.mxu2 %v5858_v32 }
 0x2a5   : > { %2541 = vmatmul.f32.gmra.mxu2 %v2426_v21  ;;  %v5829_v21 = vld [vmem:[%s9761_s5 + $0x1f8] sm:$0xff] }
 0x2a6   : > { %v2289_v4 = vpop.f32.mrf.mxu1  ;;  %3208 = vmatpush.msrb.mxu0 %v5829_v21  ;;  %3480 = vmatpush.msrb.mxu2 %v5857_v17  ;;  %v2224_v21 = vld [vmem:[#allocation2 + $0x150] sm:$0xff] }
 0x2a7   : > { %v2361_v27 = vadd.f32 %v2289_v4, %v2159_v6  ;;  %v2160_v4 = vadd.f32 %v7440_v59, %v1957_v61  ;;  %v1958_v59 = vadd.f32 %v7445_v2, %v7327_v15  ;;  %v5828_v17 = vld [vmem:[%s9761_s5 + $0x1f0] sm:$0xff]  ;;  %v5853_v2 = vld [vmem:[%s9761_s5 + $0x2b8] sm:$0xff] }
 0x2a8   : > { %v2494_v39 = vpop.f32.mrf.mxu2  ;;  %2336 = vmatmul.f32.gmra.mxu1 %v2223_v28  ;;  %3481 = vmatpush.msrb.mxu2 %v5856_v51  ;;  %v5855_v28 = vld [vmem:[%s9761_s5 + $0x2c8] sm:$0xff]  ;;  %v5841_v51 = vld [vmem:[%s9761_s5 + $0x258] sm:$0xff] }
 0x2a9   : > { %v2563_v19 = vadd.f32 %v2491_v44, %v2361_v27  ;;  %v2701_v44 = vperm.slane %v7574_v1, 0  ;;  %3209 = vmatpush.msrb.mxu0 %v5828_v17  ;;  %3346 = vmatpush.msrb.mxu1 %v5841_v51  ;;  %v2225_v17 = vld [vmem:[#allocation2 + $0x168] sm:$0xff]  ;;  %v5810_v51 = vld [vmem:[%s9761_s5 + $0x160] sm:$0xff] }
 0x2aa   : > { %3482 = vmatpush.msrb.mxu2 %v5855_v28 }
 0x2ab   : > { %v2639_v14 = vadd.f32 %v7569_v42, %v2563_v19  ;;  %v7604_v19 = vpop.f32.mrf.mxu0 }
 0x2ac   : > { %3483 = vmatpush.msrb.mxu2 %v5854_v53 }
 0x2ad   : > { %2544 = vmatmul.f32.gmra.mxu2 %v2427_v43  ;;  %v2663_v6 = vmax.f32 %v2639_v14, 0.0  ;;  %v5811_v14 = vld [vmem:[%s9761_s5 + $0x168] sm:$0xff] }
 0x2ae   : > { %v2292_v27 = vpop.f32.mrf.mxu1  ;;  %3075 = vmatpush.msrb.mxu3 %v5811_v14  ;;  %3484 = vmatpush.msrb.mxu2 %v5853_v2 }
 0x2af   : > { %v2713_v43 = vmul.f32 %v2701_v44, %v2663_v6  ;;  %v2362_v32 = vadd.f32 %v2292_v27, %v2160_v4  ;;  %v5840_v6 = vld [vmem:[%s9761_s5 + $0x250] sm:$0xff]  ;;  %v2161_v27 = vadd.f32 %v7451_v41, %v1958_v59  ;;  %v5838_v41 = vld [vmem:[%s9761_s5 + $0x240] sm:$0xff]  ;;  %v1959_v59 = vadd.f32 %v7458_v35, %v7339_v25  ;;  %v5837_v25 = vld [vmem:[%s9761_s5 + $0x238] sm:$0xff] }
 0x2b0   : > { %v2497_v49 = vpop.f32.mrf.mxu2  ;;  %2339 = vmatmul.f32.gmra.mxu1 %v2224_v21  ;;  %v5839_v21 = vld [vmem:[%s9761_s5 + $0x248] sm:$0xff]  ;;  %3076 = vmatpush.msrb.mxu3 %v5810_v51  ;;  %v5848_v51 = vld [vmem:[%s9761_s5 + $0x290] sm:$0xff] }
 0x2b1   : > { %2785 = vst [vmem:[#allocation3 + $0x8] sm:$0xff] %v2713_v43  ;;  %v2564_v61 = vadd.f32 %v2494_v39, %v2362_v32  ;;  %2898 = vmatmul.f32.vlgmr.msra.gmra.mxu3 %v2713_v43  ;;  %v7624_v39 = vpop.f32.mrf.mxu3  ;;  %3347 = vmatpush.msrb.mxu1 %v5840_v6  ;;  %v5852_v43 = vld [vmem:[%s9761_s5 + $0x2b0] sm:$0xff]  ;;  %v5850_v6 = vld [vmem:[%s9761_s5 + $0x2a0] sm:$0xff] }
 0x2b2   : > { %3485 = vmatpush.msrb.mxu2 %v5852_v43 }
 0x2b3   : > { %v2640_v15 = vadd.f32 %v7569_v42, %v2564_v61  ;;  %3348 = vmatpush.msrb.mxu1 %v5839_v21  ;;  %v7650_v2 = vpop.f32.mrf.mxu0 }
 0x2b5   : > { %2547 = vmatmul.f32.gmra.mxu2 %v2428_v34  ;;  %v2664_v4 = vmax.f32 %v2640_v15, 0.0  ;;  %v5851_v15 = vld [vmem:[%s9761_s5 + $0x2a8] sm:$0xff]  ;;  %3349 = vmatpush.msrb.mxu1 %v5838_v41 }
 0x2b6   : > { %v2295_v32 = vpop.f32.mrf.mxu1  ;;  %3486 = vmatpush.msrb.mxu2 %v5851_v15 }
 0x2b7   : > { %v2714_v34 = vmul.f32 %v2701_v44, %v2664_v4  ;;  %v2363_v61 = vadd.f32 %v2295_v32, %v2161_v27  ;;  %v5827_v44 = vld [vmem:[%s9761_s5 + $0x1e8] sm:$0xff]  ;;  %v5836_v4 = vld [vmem:[%s9761_s5 + $0x230] sm:$0xff]  ;;  %v2162_v27 = vadd.f32 %v7466_v7, %v1959_v59  ;;  %3350 = vmatpush.msrb.mxu1 %v5837_v25  ;;  %v5849_v32 = vld [vmem:[%s9761_s5 + $0x298] sm:$0xff]  ;;  %v1960_v59 = vadd.f32 %v7471_v47, %v7351_v9 }
 0x2b8   : > { %v2500_v28 = vpop.f32.mrf.mxu2  ;;  %v2809_v53 = vld [vmem:[#allocation3 + $0x7] sm:$0xff]  ;;  %2342 = vmatmul.f32.gmra.mxu1 %v2225_v17  ;;  %3210 = vmatpush.msrb.mxu0 %v5827_v44  ;;  %v5833_v25 = vld [vmem:[%s9761_s5 + $0x218] sm:$0xff] }
 0x2b9   : > { %2786 = vst [vmem:[#allocation3 + $0x10] sm:$0xff] %v2714_v34  ;;  %v2565_v14 = vadd.f32 %v2497_v49, %v2363_v61  ;;  %2975 = vmatmul.f32.vlgmr.msra.gmra.mxu0 %v2809_v53  ;;  %2901 = vmatmul.f32.gmra.mxu3 %v2714_v34  ;;  %v2702_v49 = vperm.slane %v7574_v1, 1  ;;  %v7668_v21 = vpop.f32.mrf.mxu3  ;;  %v2226_v53 = vld [vmem:[#allocation2 + $0x170] sm:$0xff]  ;;  %v5835_v7 = vld [vmem:[%s9761_s5 + $0x228] sm:$0xff]  ;;  %v5826_v44 = vld [vmem:[%s9761_s5 + $0x1e0] sm:$0xff] }
 0x2ba   : > { %3487 = vmatpush.msrb.mxu2 %v5850_v6  ;;  %3351 = vmatpush.msrb.mxu1 %v5836_v4  ;;  %v5834_v9 = vld [vmem:[%s9761_s5 + $0x220] sm:$0xff] }
 0x2bb   : > { %v2641_v35 = vadd.f32 %v7569_v42, %v2565_v14  ;;  %3211 = vmatpush.msrb.mxu0 %v5826_v44  ;;  %v7693_v15 = vpop.f32.mrf.mxu0  ;;  %v5846_v4 = vld [vmem:[%s9761_s5 + $0x280] sm:$0xff] }
 0x2bc   : > { %3488 = vmatpush.msrb.mxu2 %v5849_v32  ;;  %3352 = vmatpush.msrb.mxu1 %v5835_v7  ;;  %v2431_v7 = vld [vmem:[#allocation2 + $0x1a9] sm:$0xff] }
 0x2bd   : > { %2550 = vmatmul.f32.gmra.mxu2 %v7378_v20  ;;  %v2665_v20 = vmax.f32 %v2641_v35, 0.0  ;;  %v2163_v35 = vadd.f32 %v7476_v23, %v1960_v59  ;;  %v5832_v23 = vld [vmem:[%s9761_s5 + $0x210] sm:$0xff]  ;;  %v5809_v59 = vld [vmem:[%s9761_s5 + $0x158] sm:$0xff] }
 0x2be   : > { %v2298_v34 = vpop.f32.mrf.mxu1  ;;  %3489 = vmatpush.msrb.mxu2 %v5848_v51  ;;  %3353 = vmatpush.msrb.mxu1 %v5834_v9 }
 0x2bf   : > { %v7670_v61 = vmul.f32 %v2702_v49, %v2665_v20  ;;  %v2364_v17 = vadd.f32 %v2298_v34, %v2162_v27  ;;  %3077 = vmatpush.msrb.mxu3 %v5809_v59 }
 0x2c0   : > { %v2503_v43 = vpop.f32.mrf.mxu2  ;;  %v2810_v41 = vld [vmem:[#allocation3 + $0xf] sm:$0xff]  ;;  %2345 = vmatmul.f32.gmra.mxu1 %v2226_v53 }
 0x2c1   : > { %2787 = vst [vmem:[#allocation3 + $0x28] sm:$0xff] %v7670_v61  ;;  %v2566_v14 = vadd.f32 %v2500_v28, %v2364_v17  ;;  %2978 = vmatmul.f32.gmra.mxu0 %v2810_v41  ;;  %2904 = vmatmul.f32.gmra.mxu3 %v7670_v61  ;;  %v5847_v28 = vld [vmem:[%s9761_s5 + $0x288] sm:$0xff]  ;;  %v7704_v34 = vpop.f32.mrf.mxu3  ;;  %v1961_v41 = vadd.f32 %v7482_v57, %v7363_v24  ;;  %v2703_v57 = vperm.slane %v7574_v1, 2 }
 0x2c2   : > { %3490 = vmatpush.msrb.mxu2 %v5847_v28  ;;  %3354 = vmatpush.msrb.mxu1 %v5833_v25  ;;  %v2227_v17 = vld [vmem:[#allocation2 + $0x188] sm:$0xff] }
 0x2c3   : > { %v2642_v47 = vadd.f32 %v7569_v42, %v2566_v14  ;;  %v5831_v14 = vld [vmem:[%s9761_s5 + $0x208] sm:$0xff]  ;;  %v2164_v51 = vadd.f32 %v7489_v62, %v1961_v41  ;;  %v2432_v62 = vld [vmem:[#allocation2 + $0x1b1] sm:$0xff] }
 0x2c4   : > { %3491 = vmatpush.msrb.mxu2 %v5846_v4  ;;  %3355 = vmatpush.msrb.mxu1 %v5832_v23  ;;  %v5808_v23 = vld [vmem:[%s9761_s5 + $0x150] sm:$0xff] }
 0x2c5   : > { %2553 = vmatmul.f32.gmra.mxu2 %v7390_v31  ;;  %v2666_v31 = vmax.f32 %v2642_v47, 0.0  ;;  %v7728_v47 = vpop.f32.mrf.mxu0  ;;  %3078 = vmatpush.msrb.mxu3 %v5808_v23 }
 0x2c6   : > { %v2301_v20 = vpop.f32.mrf.mxu1  ;;  %3356 = vmatpush.msrb.mxu1 %v5831_v14 }
 0x2c7   : > { %v7702_v27 = vmul.f32 %v2702_v49, %v2666_v31  ;;  %v2365_v32 = vadd.f32 %v2301_v20, %v2163_v35  ;;  %v2228_v35 = vld [vmem:[#allocation2 + $0x190] sm:$0xff]  ;;  %v1962_v20 = vadd.f32 %v7497_v37, %v7372_v36 }
 0x2c8   : > { %v2506_v6 = vpop.f32.mrf.mxu2  ;;  %v7706_v53 = vld [vmem:[#allocation3 + $0x27] sm:$0xff]  ;;  %2348 = vmatmul.f32.gmra.mxu1 %v2227_v17  ;;  %v5825_v17 = vld [vmem:[%s9761_s5 + $0x1d8] sm:$0xff] }
 0x2c9   : > { %2788 = vst [vmem:[#allocation3 + $0x30] sm:$0xff] %v7702_v27  ;;  %v2567_v49 = vadd.f32 %v2503_v43, %v2365_v32  ;;  %2981 = vmatmul.f32.gmra.mxu0 %v7706_v53  ;;  %2907 = vmatmul.f32.gmra.mxu3 %v7702_v27  ;;  %v5830_v43 = vld [vmem:[%s9761_s5 + $0x200] sm:$0xff]  ;;  %v7744_v41 = vpop.f32.mrf.mxu3 }
 0x2ca   : > { %3357 = vmatpush.msrb.mxu1 %v5830_v43  ;;  %3212 = vmatpush.msrb.mxu0 %v5825_v17  ;;  %v2229_v43 = vld [vmem:[#allocation2 + $0x1a8] sm:$0xff]  ;;  %v1970_v3 = vadd.f32 %v7744_v41, %v7443_v26 }
 0x2cb   : > { %v2643_v24 = vadd.f32 %v7569_v42, %v2567_v49 }
 0x2cd   : > { %2556 = vmatmul.f32.gmra.mxu2 %v2431_v7  ;;  %v2667_v44 = vmax.f32 %v2643_v24, 0.0  ;;  %v7751_v24 = vpop.f32.mrf.mxu0 }
 0x2ce   : > { %v2304_v28 = vpop.f32.mrf.mxu1 }
 0x2cf   : > { %v7730_v25 = vmul.f32 %v2703_v57, %v2667_v44  ;;  %v2366_v31 = vadd.f32 %v2304_v28, %v2164_v51  ;;  %v1963_v51 = vadd.f32 %v7510_v0, %v7381_v18  ;;  %v2704_v0 = vperm.slane %v7574_v1, 3 }
 0x2d0   : > { %v2509_v9 = vpop.f32.mrf.mxu2  ;;  %v7732_v4 = vld [vmem:[#allocation3 + $0x2f] sm:$0xff]  ;;  %2351 = vmatmul.f32.gmra.mxu1 %v2228_v35 }
 0x2d1   : > { %2789 = vst [vmem:[#allocation3 + $0x48] sm:$0xff] %v7730_v25  ;;  %v2568_v32 = vadd.f32 %v2506_v6, %v2366_v31  ;;  %2984 = vmatmul.f32.gmra.mxu0 %v7732_v4  ;;  %2910 = vmatmul.f32.gmra.mxu3 %v7730_v25  ;;  %v2165_v6 = vadd.f32 %v7506_v48, %v1962_v20  ;;  %v7759_v48 = vld [vmem:[#allocation3 + $0x29] sm:$0xff] }
 0x2d2   : > { %v5807_v31 = vld [vmem:[%s9761_s5 + $0x148] sm:$0xff]  ;;  %v2166_v20 = vadd.f32 %v7524_v13, %v1963_v51 }
 0x2d3   : > { %v2644_v36 = vadd.f32 %v7569_v42, %v2568_v32  ;;  %3079 = vmatpush.msrb.mxu3 %v5807_v31  ;;  %v5823_v13 = vld [vmem:[%s9761_s5 + $0x1c8] sm:$0xff] }
 0x2d5   : > { %2559 = vmatmul.f32.gmra.mxu2 %v2432_v62  ;;  %v2668_v37 = vmax.f32 %v2644_v36, 0.0  ;;  %v2230_v36 = vld [vmem:[#allocation2 + $0x1b0] sm:$0xff]  ;;  %v7790_v51 = vpop.f32.mrf.mxu0 }
 0x2d6   : > { %v2307_v7 = vpop.f32.mrf.mxu1 }
 0x2d7   : > { %v7749_v59 = vmul.f32 %v2703_v57, %v2668_v37  ;;  %v2367_v14 = vadd.f32 %v2307_v7, %v2165_v6  ;;  %v5824_v57 = vld [vmem:[%s9761_s5 + $0x1d0] sm:$0xff]  ;;  %v1964_v6 = vadd.f32 %v7526_v12, %v7393_v33 }
 0x2d8   : > { %v2512_v49 = vpop.f32.mrf.mxu2  ;;  %v7753_v44 = vld [vmem:[#allocation3 + $0x47] sm:$0xff]  ;;  %2354 = vmatmul.f32.gmra.mxu1 %v2229_v43  ;;  %3213 = vmatpush.msrb.mxu0 %v5824_v57 }
 0x2d9   : > { %2790 = vst [vmem:[#allocation3 + $0x50] sm:$0xff] %v7749_v59  ;;  %v2569_v28 = vadd.f32 %v2509_v9, %v2367_v14  ;;  %2987 = vmatmul.f32.gmra.mxu0 %v7753_v44  ;;  %2913 = vmatmul.f32.gmra.mxu3 %v7749_v59  ;;  %v7771_v9 = vpop.f32.mrf.mxu3  ;;  %v7782_v14 = vld [vmem:[#allocation3 + $0x31] sm:$0xff]  ;;  %v5806_v43 = vld [vmem:[%s9761_s5 + $0x140] sm:$0xff] }
 0x2da   : > { %3214 = vmatpush.msrb.mxu0 %v5823_v13  ;;  %3080 = vmatpush.msrb.mxu3 %v5806_v43 }
 0x2db   : > { %v2645_v18 = vadd.f32 %v7569_v42, %v2569_v28 }
 0x2dd   : > { %3492 = vmatmul.f32.vlgmr.msrb.gmra.mxu2 %v7759_v48  ;;  %v2669_v35 = vmax.f32 %v2645_v18, 0.0 }
 0x2de   : > { %v2310_v62 = vpop.f32.mrf.mxu1 }
 0x2df   : > { %v7774_v17 = vmul.f32 %v2704_v0, %v2669_v35  ;;  %v2368_v23 = vadd.f32 %v2310_v62, %v2166_v20  ;;  %v1965_v62 = vadd.f32 %v7542_v56, %v7399_v58  ;;  %v2705_v58 = vperm.slane %v7574_v1, 4  ;;  %v7816_v56 = vpop.f32.mrf.mxu0 }
 0x2e0   : > { %v2515_v32 = vpop.f32.mrf.mxu2  ;;  %v7776_v37 = vld [vmem:[#allocation3 + $0x4f] sm:$0xff]  ;;  %2357 = vmatmul.f32.gmra.mxu1 %v2230_v36 }
 0x2e1   : > { %2791 = vst [vmem:[#allocation3 + $0x68] sm:$0xff] %v7774_v17  ;;  %v2570_v7 = vadd.f32 %v2512_v49, %v2368_v23  ;;  %2990 = vmatmul.f32.gmra.mxu0 %v7776_v37  ;;  %2916 = vmatmul.f32.gmra.mxu3 %v7774_v17  ;;  %v2167_v49 = vadd.f32 %v7537_v60, %v1964_v6  ;;  %v7796_v57 = vpop.f32.mrf.mxu3  ;;  %v7807_v60 = vld [vmem:[#allocation3 + $0x49] sm:$0xff] }
 0x2e3   : > { %v2646_v33 = vadd.f32 %v7569_v42, %v2570_v7 }
 0x2e5   : > { %3495 = vmatmul.f32.gmra.mxu2 %v7782_v14  ;;  %v2670_v12 = vmax.f32 %v2646_v33, 0.0 }
 0x2e6   : > { %v2313_v31 = vpop.f32.mrf.mxu1 }
 0x2e7   : > { %v7798_v18 = vmul.f32 %v2704_v0, %v2670_v12  ;;  %v2369_v35 = vadd.f32 %v2313_v31, %v2167_v49  ;;  %v5822_v0 = vld [vmem:[%s9761_s5 + $0x1c0] sm:$0xff]  ;;  %v1966_v49 = vadd.f32 %v7590_v50, %v7405_v8 }
 0x2e8   : > { %v2518_v28 = vpop.f32.mrf.mxu2  ;;  %v7800_v20 = vld [vmem:[#allocation3 + $0x67] sm:$0xff]  ;;  %3358 = vmatmul.f32.vlgmr.msrb.gmra.mxu1 %v7670_v61  ;;  %3215 = vmatpush.msrb.mxu0 %v5822_v0 }
 0x2e9   : > { %2792 = vst [vmem:[#allocation3 + $0x70] sm:$0xff] %v7798_v18  ;;  %v2571_v23 = vadd.f32 %v2515_v32, %v2369_v35  ;;  %2993 = vmatmul.f32.gmra.mxu0 %v7800_v20  ;;  %2919 = vmatmul.f32.gmra.mxu3 %v7798_v18  ;;  %v2168_v32 = vadd.f32 %v7561_v40, %v1965_v62  ;;  %v7821_v33 = vpop.f32.mrf.mxu3  ;;  %v7830_v40 = vld [vmem:[#allocation3 + $0x51] sm:$0xff] }
 0x2ea   : > { %v5805_v35 = vld [vmem:[%s9761_s5 + $0x138] sm:$0xff]  ;;  %v2169_v50 = vadd.f32 %v7604_v19, %v1966_v49 }
 0x2eb   : > { %v2647_v36 = vadd.f32 %v7569_v42, %v2571_v23  ;;  %3081 = vmatpush.msrb.mxu3 %v5805_v35 }
 0x2ed   : > { %3498 = vmatmul.f32.gmra.mxu2 %v7807_v60  ;;  %v2671_v61 = vmax.f32 %v2647_v36, 0.0 }
 0x2ee   : > { %v2316_v7 = vpop.f32.mrf.mxu1 }
 0x2ef   : > { %v7819_v13 = vmul.f32 %v2705_v58, %v2671_v61  ;;  %v2370_v43 = vadd.f32 %v2316_v7, %v2168_v32  ;;  %v1967_v32 = vadd.f32 %v7624_v39, %v7414_v46  ;;  %v2706_v39 = vperm.slane %v7574_v1, 5 }
 0x2f0   : > { %v2521_v6 = vpop.f32.mrf.mxu2  ;;  %v7823_v12 = vld [vmem:[#allocation3 + $0x6f] sm:$0xff]  ;;  %3361 = vmatmul.f32.gmra.mxu1 %v7702_v27 }
 0x2f1   : > { %2793 = vst [vmem:[#allocation3 + $0x88] sm:$0xff] %v7819_v13  ;;  %v2572_v31 = vadd.f32 %v2518_v28, %v2370_v43  ;;  %2996 = vmatmul.f32.gmra.mxu0 %v7823_v12  ;;  %2922 = vmatmul.f32.gmra.mxu3 %v7819_v13  ;;  %v7839_v28 = vpop.f32.mrf.mxu0  ;;  %v7850_v19 = vld [vmem:[#allocation3 + $0x69] sm:$0xff]  ;;  %v7858_v49 = vpop.f32.mrf.mxu3 }
 0x2f2   : > { %v5804_v43 = vld [vmem:[%s9761_s5 + $0x130] sm:$0xff] }
 0x2f3   : > { %v2648_v62 = vadd.f32 %v7569_v42, %v2572_v31  ;;  %3082 = vmatpush.msrb.mxu3 %v5804_v43 }
 0x2f5   : > { %3501 = vmatmul.f32.gmra.mxu2 %v7830_v40  ;;  %v2672_v8 = vmax.f32 %v2648_v62, 0.0 }
 0x2f6   : > { %v2319_v23 = vpop.f32.mrf.mxu1 }
 0x2f7   : > { %v7841_v0 = vmul.f32 %v2705_v58, %v2672_v8  ;;  %v2371_v36 = vadd.f32 %v2319_v23, %v2169_v50  ;;  %v5821_v58 = vld [vmem:[%s9761_s5 + $0x1b8] sm:$0xff] }
 0x2f8   : > { %v2524_v27 = vpop.f32.mrf.mxu2  ;;  %v7843_v61 = vld [vmem:[#allocation3 + $0x87] sm:$0xff]  ;;  %3364 = vmatmul.f32.gmra.mxu1 %v7730_v25  ;;  %3216 = vmatpush.msrb.mxu0 %v5821_v58 }
 0x2f9   : > { %2794 = vst [vmem:[#allocation3 + $0x90] sm:$0xff] %v7841_v0  ;;  %v2573_v7 = vadd.f32 %v2521_v6, %v2371_v36  ;;  %2999 = vmatmul.f32.gmra.mxu0 %v7843_v61  ;;  %2925 = vmatmul.f32.gmra.mxu3 %v7841_v0  ;;  %v2170_v6 = vadd.f32 %v7650_v2, %v1967_v32  ;;  %v7867_v50 = vpop.f32.mrf.mxu0  ;;  %v7876_v2 = vld [vmem:[#allocation3 + $0x71] sm:$0xff]  ;;  %v5803_v58 = vld [vmem:[%s9761_s5 + $0x128] sm:$0xff] }
 0x2fa   : > { %v1968_v36 = vadd.f32 %v7668_v21, %v7422_v54  ;;  %v5820_v32 = vld [vmem:[%s9761_s5 + $0x1b0] sm:$0xff]  ;;  %3083 = vmatpush.msrb.mxu3 %v5803_v58  ;;  %v7887_v21 = vpop.f32.mrf.mxu3 }
 0x2fb   : > { %v2649_v46 = vadd.f32 %v7569_v42, %v2573_v7  ;;  %3217 = vmatpush.msrb.mxu0 %v5820_v32 }
 0x2fd   : > { %3504 = vmatmul.f32.gmra.mxu2 %v7850_v19  ;;  %v2673_v25 = vmax.f32 %v2649_v46, 0.0 }
 0x2fe   : > { %v2322_v35 = vpop.f32.mrf.mxu1 }
 0x2ff   : > { %v7865_v62 = vmul.f32 %v2706_v39, %v2673_v25  ;;  %v2372_v8 = vadd.f32 %v2322_v35, %v2170_v6 }
 0x300   : > { %v2527_v31 = vpop.f32.mrf.mxu2  ;;  %v7869_v23 = vld [vmem:[#allocation3 + $0x8f] sm:$0xff]  ;;  %3367 = vmatmul.f32.gmra.mxu1 %v7749_v59 }
 0x301   : > { %2795 = vst [vmem:[#allocation3 + $0xa8] sm:$0xff] %v7865_v62  ;;  %v2574_v7 = vadd.f32 %v2524_v27, %v2372_v8  ;;  %3002 = vmatmul.f32.gmra.mxu0 %v7869_v23  ;;  %2928 = vmatmul.f32.gmra.mxu3 %v7865_v62  ;;  %v2171_v27 = vadd.f32 %v7693_v15, %v1968_v36  ;;  %v7899_v32 = vld [vmem:[#allocation3 + $0x89] sm:$0xff]  ;;  %v7907_v36 = vpop.f32.mrf.mxu0 }
 0x302   : > { %v1969_v8 = vadd.f32 %v7704_v34, %v7432_v30  ;;  %v5819_v15 = vld [vmem:[%s9761_s5 + $0x1a8] sm:$0xff]  ;;  %v2707_v34 = vperm.slane %v7574_v1, 6 }
 0x303   : > { %v2650_v54 = vadd.f32 %v7569_v42, %v2574_v7  ;;  %3218 = vmatpush.msrb.mxu0 %v5819_v15 }
 0x305   : > { %3507 = vmatmul.f32.gmra.mxu2 %v7876_v2  ;;  %v2674_v59 = vmax.f32 %v2650_v54, 0.0  ;;  %v7914_v54 = vpop.f32.mrf.mxu3 }
 0x306   : > { %v2325_v46 = vpop.f32.mrf.mxu1 }
 0x307   : > { %v7890_v25 = vmul.f32 %v2706_v39, %v2674_v59  ;;  %v2373_v6 = vadd.f32 %v2325_v46, %v2171_v27  ;;  %v5802_v39 = vld [vmem:[%s9761_s5 + $0x120] sm:$0xff] }
 0x308   : > { %v2530_v43 = vpop.f32.mrf.mxu2  ;;  %v7892_v35 = vld [vmem:[#allocation3 + $0xa7] sm:$0xff]  ;;  %3370 = vmatmul.f32.gmra.mxu1 %v7774_v17  ;;  %3084 = vmatpush.msrb.mxu3 %v5802_v39 }
 0x309   : > { %2796 = vst [vmem:[#allocation3 + $0xb0] sm:$0xff] %v7890_v25  ;;  %v2575_v7 = vadd.f32 %v2527_v31, %v2373_v6  ;;  %3005 = vmatmul.f32.gmra.mxu0 %v7892_v35  ;;  %2931 = vmatmul.f32.gmra.mxu3 %v7890_v25  ;;  %v2172_v31 = vadd.f32 %v7728_v47, %v1969_v8  ;;  %v7925_v47 = vld [vmem:[#allocation3 + $0x91] sm:$0xff]  ;;  %v5818_v8 = vld [vmem:[%s9761_s5 + $0x1a0] sm:$0xff]  ;;  %v7930_v15 = vpop.f32.mrf.mxu0 }
 0x30a   : > { %3219 = vmatpush.msrb.mxu0 %v5818_v8 }
 0x30b   : > { %v2651_v30 = vadd.f32 %v7569_v42, %v2575_v7 }
 0x30d   : > { %3510 = vmatmul.f32.gmra.mxu2 %v7899_v32  ;;  %v2675_v17 = vmax.f32 %v2651_v30, 0.0 }
 0x30e   : > { %v2328_v59 = vpop.f32.mrf.mxu1 }
 0x30f   : > { %v7916_v27 = vmul.f32 %v2707_v34, %v2675_v17  ;;  %v2374_v46 = vadd.f32 %v2328_v59, %v2172_v31  ;;  %v7938_v31 = vpop.f32.mrf.mxu3 }
 0x310   : > { %v2533_v58 = vpop.f32.mrf.mxu2  ;;  %v7918_v6 = vld [vmem:[#allocation3 + $0xaf] sm:$0xff]  ;;  %3373 = vmatmul.f32.gmra.mxu1 %v7798_v18  ;;  %v2173_v18 = vadd.f32 %v7751_v24, %v1970_v3  ;;  %v5801_v24 = vld [vmem:[%s9761_s5 + $0x118] sm:$0xff] }
 0x311   : > { %2797 = vst [vmem:[#allocation3 + $0xc8] sm:$0xff] %v7916_v27  ;;  %v2576_v7 = vadd.f32 %v2530_v43, %v2374_v46  ;;  %3008 = vmatmul.f32.gmra.mxu0 %v7918_v6  ;;  %2934 = vmatmul.f32.gmra.mxu3 %v7916_v27  ;;  %v1971_v46 = vadd.f32 %v7771_v9, %v7453_v52  ;;  %v7947_v3 = vld [vmem:[#allocation3 + $0xa9] sm:$0xff]  ;;  %v2708_v52 = vperm.slane %v7574_v1, 7  ;;  %v7956_v9 = vpop.f32.mrf.mxu0 }
 0x312   : > { %3085 = vmatpush.msrb.mxu3 %v5801_v24 }
 0x313   : > { %v2652_v26 = vadd.f32 %v7569_v42, %v2576_v7 }
 0x315   : > { %3513 = vmatmul.f32.gmra.mxu2 %v7925_v47  ;;  %v2676_v41 = vmax.f32 %v2652_v26, 0.0 }
 0x316   : > { %v2331_v39 = vpop.f32.mrf.mxu1 }
 0x317   : > { %v7936_v30 = vmul.f32 %v2707_v34, %v2676_v41  ;;  %v2375_v17 = vadd.f32 %v2331_v39, %v2173_v18  ;;  %v9848_v41 = vld [vmem:[#allocation7_spill] sm:$0xff]  ;;  %v7978_v24 = vpop.f32.mrf.mxu3 }
 0x318   : > { %v2536_v43 = vpop.f32.mrf.mxu2  ;;  %v7940_v59 = vld [vmem:[#allocation3 + $0xc7] sm:$0xff]  ;;  %3376 = vmatmul.f32.gmra.mxu1 %v7819_v13  ;;  %v2690_v18 = vadd.s32 %v7535_v45, %v9848_v41  ;;  %v5817_v45 = vld [vmem:[%s9761_s5 + $0x198] sm:$0xff] }
 0x319   : > { %9847 = vst [vmem:[#allocation9_spill] sm:$0xff] %v7940_v59  ;;  %v2577_v7 = vadd.f32 %v2533_v58, %v2375_v17  ;;  %3011 = vmatmul.f32.gmra.mxu0 %v7940_v59  ;;  %2937 = vmatmul.f32.gmra.mxu3 %v7936_v30  ;;  %v2174_v58 = vadd.f32 %v7790_v51, %v1971_v46  ;;  %v7970_v51 = vld [vmem:[#allocation3 + $0xb1] sm:$0xff] }
 0x31a   : > { %2798 = vst [vmem:[#allocation3 + $0xd0] sm:$0xff] %v7936_v30  ;;  %v5800_v46 = vld [vmem:[%s9761_s5 + $0x110] sm:$0xff]  ;;  %vm2692_vm11 = vcmp.ge.s32.totalorder %v2690_v18, 0  ;;  %vm2694_vm12 = vcmp.lt.s32.totalorder %v2690_v18, 16  ;;  %3220 = vmatpush.msrb.mxu0 %v5817_v45 }
 0x31b   : > { %v2653_v34 = vadd.f32 %v7569_v42, %v2577_v7  ;;  %v1972_v7 = vadd.f32 %v7796_v57, %v7461_v55  ;;  %3086 = vmatpush.msrb.mxu3 %v5800_v46  ;;  %v7983_v57 = vpop.f32.mrf.mxu0  ;;  %vm2696_vm13 = vmand %vm2692_vm11, %vm2694_vm12 }
 0x31c   : > { %v7989_v18 = vsel %vm2696_vm13, 1.0, %v7571_v11  ;;  %v5799_v11 = vld [vmem:[%s9761_s5 + $0x108] sm:$0xff] }
 0x31d   : > { %3516 = vmatmul.f32.gmra.mxu2 %v7947_v3  ;;  %v2677_v13 = vmax.f32 %v2653_v34, 0.0  ;;  %3087 = vmatpush.msrb.mxu3 %v5799_v11  ;;  %v5798_v11 = vld [vmem:[%s9761_s5 + $0x100] sm:$0xff] }
 0x31e   : > { %v2334_v26 = vpop.f32.mrf.mxu1 }
 0x31f   : > { %v7961_v39 = vmul.f32 %v2708_v52, %v2677_v13  ;;  %v2376_v17 = vadd.f32 %v2334_v26, %v2174_v58  ;;  %3088 = vmatpush.msrb.mxu3 %v5798_v11  ;;  %v2710_v11 = vperm.slane %v7989_v18, 1 }
 0x320   : > { %v2539_v8 = vpop.f32.mrf.mxu2  ;;  %3379 = vmatmul.f32.gmra.mxu1 %v7841_v0 }
 0x321   : > { %v7963_v59 = vld [vmem:[#allocation3 + $0xcf] sm:$0xff]  ;;  %2799 = vst [vmem:[#allocation3 + $0xe8] sm:$0xff] %v7961_v39  ;;  %v2578_v1 = vadd.f32 %v2536_v43, %v2376_v17  ;;  %2940 = vmatmul.f32.gmra.mxu3 %v7961_v39  ;;  %v2175_v43 = vadd.f32 %v7816_v56, %v1972_v7 }
 0x322   : > { %3014 = vmatmul.f32.gmra.mxu0 %v7963_v59  ;;  %v7998_v56 = vld [vmem:[#allocation3 + $0xc9] sm:$0xff] }
 0x323   : > { %v2654_v55 = vadd.f32 %v7569_v42, %v2578_v1  ;;  %v1973_v1 = vadd.f32 %v7821_v33, %v7474_v29  ;;  %v2709_v33 = vperm.slane %v7989_v18, 0 }
 0x325   : > { %3519 = vmatmul.f32.gmra.mxu2 %v7970_v51  ;;  %v2678_v0 = vmax.f32 %v2654_v55, 0.0  ;;  %v2176_v7 = vadd.f32 %v7839_v28, %v1973_v1  ;;  %v8013_v55 = vpop.f32.mrf.mxu0  ;;  %v8024_v28 = vld [vmem:[#allocation3 + $0xd1] sm:$0xff]  ;;  %v5815_v1 = vld [vmem:[%s9761_s5 + $0x188] sm:$0xff] }
 0x326   : > { %v2337_v13 = vpop.f32.mrf.mxu1 }
 0x327   : > { %v7986_v58 = vmul.f32 %v2708_v52, %v2678_v0  ;;  %v2377_v26 = vadd.f32 %v2337_v13, %v2175_v43  ;;  %v5816_v52 = vld [vmem:[%s9761_s5 + $0x190] sm:$0xff] }
 0x328   : > { %v2542_v34 = vpop.f32.mrf.mxu2  ;;  %v7991_v17 = vld [vmem:[#allocation3 + $0xe7] sm:$0xff]  ;;  %3382 = vmatmul.f32.gmra.mxu1 %v7865_v62  ;;  %3221 = vmatpush.msrb.mxu0 %v5816_v52  ;;  %v8010_v62 = vpop.f32.mrf.mxu3 }
 0x329   : > { %2800 = vst [vmem:[#allocation3 + $0xf0] sm:$0xff] %v7986_v58  ;;  %v2579_v45 = vadd.f32 %v2539_v8, %v2377_v26  ;;  %2943 = vmatmul.f32.gmra.mxu3 %v7986_v58 }
 0x32a   : > { %3017 = vmatmul.f32.gmra.mxu0 %v7991_v17 }
 0x32b   : > { %v2655_v29 = vadd.f32 %v7569_v42, %v2579_v45  ;;  %v1974_v45 = vadd.f32 %v7858_v49, %v7484_v38  ;;  %3222 = vmatpush.msrb.mxu0 %v5815_v1  ;;  %v1975_v1 = vadd.f32 %v7887_v21, %v7492_v63 }
 0x32d   : > { %3522 = vmatmul.f32.gmra.mxu2 %v7998_v56  ;;  %v2679_v8 = vmax.f32 %v2655_v29, 0.0  ;;  %v2178_v63 = vadd.f32 %v7907_v36, %v1975_v1 }
 0x32e   : > { %v2340_v0 = vpop.f32.mrf.mxu1 }
 0x32f   : > { %v8015_v43 = vmul.f32 %v2709_v33, %v2679_v8  ;;  %v2378_v13 = vadd.f32 %v2340_v0, %v2176_v7 }
 0x330   : > { %v2545_v46 = vpop.f32.mrf.mxu2  ;;  %v8017_v26 = vld [vmem:[#allocation3 + $0xef] sm:$0xff]  ;;  %3385 = vmatmul.f32.gmra.mxu1 %v7890_v25 }
 0x331   : > { %2801 = vst [vmem:[#allocation3 + $0x108] sm:$0xff] %v8015_v43  ;;  %v2580_v52 = vadd.f32 %v2542_v34, %v2378_v13  ;;  %2946 = vmatmul.f32.gmra.mxu3 %v8015_v43  ;;  %v2177_v34 = vadd.f32 %v7867_v50, %v1974_v45  ;;  %v8072_v1 = vld [vmem:[#allocation3 + $0xf1] sm:$0xff] }
 0x332   : > { %3020 = vmatmul.f32.gmra.mxu0 %v8017_v26 }
 0x333   : > { %v2656_v38 = vadd.f32 %v7569_v42, %v2580_v52  ;;  %v5814_v52 = vld [vmem:[%s9761_s5 + $0x180] sm:$0xff] }
 0x334   : > { %v8035_v49 = vpop.f32.mrf.mxu3  ;;  %3223 = vmatpush.msrb.mxu0 %v5814_v52 }
 0x335   : > { %3525 = vmatmul.f32.gmra.mxu2 %v8024_v28  ;;  %v2680_v25 = vmax.f32 %v2656_v38, 0.0 }
 0x336   : > { %v2343_v29 = vpop.f32.mrf.mxu1  ;;  %v8038_v8 = vpop.f32.mrf.mxu0 }
 0x337   : > { %v8040_v7 = vmul.f32 %v2709_v33, %v2680_v25  ;;  %v2379_v0 = vadd.f32 %v2343_v29, %v2177_v34  ;;  %v8052_v33 = vld [vmem:[#allocation3 + $0xe9] sm:$0xff] }
 0x338   : > { %v2548_v13 = vpop.f32.mrf.mxu2  ;;  %v8042_v41 = vld [vmem:[#allocation3 + $0x107] sm:$0xff]  ;;  %3388 = vmatmul.f32.gmra.mxu1 %v7916_v27 }
 0x339   : > { %2802 = vst [vmem:[#allocation3 + $0x110] sm:$0xff] %v8040_v7  ;;  %v2581_v50 = vadd.f32 %v2545_v46, %v2379_v0  ;;  %2949 = vmatmul.f32.gmra.mxu3 %v8040_v7  ;;  %v1976_v0 = vadd.f32 %v7914_v54, %v7508_v22  ;;  %v5909_v54 = vld [vmem:[%s9761_s5 + $0x478] sm:$0xff] }
 0x33a   : > { %3023 = vmatmul.f32.gmra.mxu0 %v8042_v41  ;;  %3879 = vmatpush.msra.mxu1 %v5909_v54 }
 0x33b   : > { %v2657_v45 = vadd.f32 %v7569_v42, %v2581_v50  ;;  %v5877_v50 = vld [vmem:[%s9761_s5 + $0x378] sm:$0xff]  ;;  %6122 = vmatpush.msra.mxu2 %v5909_v54 }
 0x33c   : > { %v8059_v21 = vpop.f32.mrf.mxu3  ;;  %3611 = vmatpush.msra.mxu3 %v5877_v50  ;;  %v5907_v50 = vld [vmem:[%s9761_s5 + $0x468] sm:$0xff]  ;;  %v5893_v54 = vld [vmem:[%s9761_s5 + $0x3f8] sm:$0xff] }
 0x33d   : > { %3528 = vmatmul.f32.gmra.mxu2 %v8052_v33  ;;  %v2681_v38 = vmax.f32 %v2657_v45, 0.0  ;;  %3745 = vmatpush.msra.mxu0 %v5893_v54  ;;  %v5892_v54 = vld [vmem:[%s9761_s5 + $0x3f0] sm:$0xff] }
 0x33e   : > { %v2346_v27 = vpop.f32.mrf.mxu1  ;;  %v8061_v46 = vpop.f32.mrf.mxu0 }
 0x33f   : > { %v8063_v25 = vmul.f32 %v2710_v11, %v2681_v38  ;;  %v2380_v34 = vadd.f32 %v2346_v27, %v2178_v63  ;;  %v5908_v38 = vld [vmem:[%s9761_s5 + $0x470] sm:$0xff]  ;;  %3746 = vmatpush.msra.mxu0 %v5892_v54 }
 0x340   : > { %v8065_v29 = vld [vmem:[#allocation3 + $0x10f] sm:$0xff]  ;;  %3391 = vmatmul.f32.gmra.mxu1 %v7936_v30  ;;  %v2551_v36 = vpop.f32.mrf.mxu2  ;;  %6123 = vmatpush.msra.mxu2 %v5908_v38 }
 0x341   : > { %2803 = vst [vmem:[#allocation3 + $0x128] sm:$0xff] %v8063_v25  ;;  %v2582_v52 = vadd.f32 %v2548_v13, %v2380_v34  ;;  %2952 = vmatmul.f32.gmra.mxu3 %v8063_v25  ;;  %v2179_v13 = vadd.f32 %v7930_v15, %v1976_v0  ;;  %3880 = vmatpush.msra.mxu1 %v5908_v38  ;;  %v8098_v15 = vld [vmem:[#allocation3 + $0x109] sm:$0xff] }
 0x342   : > { %3026 = vmatmul.f32.gmra.mxu0 %v8065_v29  ;;  %6124 = vmatpush.msra.mxu2 %v5907_v50  ;;  %v1977_v0 = vadd.f32 %v7938_v31, %v7516_v16  ;;  %v2711_v31 = vperm.slane %v7989_v18, 2 }
 0x343   : > { %v2658_v22 = vadd.f32 %v7569_v42, %v2582_v52  ;;  %3881 = vmatpush.msra.mxu1 %v5907_v50 }
 0x344   : > { %v8084_v45 = vpop.f32.mrf.mxu3 }
 0x345   : > { %3531 = vmatmul.f32.gmra.mxu2 %v8072_v1  ;;  %v2682_v30 = vmax.f32 %v2658_v22, 0.0 }
 0x346   : > { %v2349_v63 = vpop.f32.mrf.mxu1  ;;  %v8089_v27 = vpop.f32.mrf.mxu0 }
 0x347   : > { %9849 = vst [vmem:[#allocation8_spill] sm:$0xff] %v8089_v27  ;;  %v8091_v34 = vmul.f32 %v2710_v11, %v2682_v30  ;;  %v2381_v52 = vadd.f32 %v2349_v63, %v2179_v13  ;;  %v5876_v30 = vld [vmem:[%s9761_s5 + $0x370] sm:$0xff]  ;;  %v5906_v13 = vld [vmem:[%s9761_s5 + $0x460] sm:$0xff]  ;;  %v2180_v63 = vadd.f32 %v7956_v9, %v1977_v0 }
 0x348   : > { %v8096_v22 = vld [vmem:[#allocation3 + $0x127] sm:$0xff]  ;;  %3394 = vmatmul.f32.gmra.mxu1 %v7961_v39  ;;  %v2554_v39 = vpop.f32.mrf.mxu2  ;;  %3612 = vmatpush.msra.mxu3 %v5876_v30 }
 0x349   : > { %2804 = vst [vmem:[#allocation3 + $0x130] sm:$0xff] %v8091_v34  ;;  %v2583_v11 = vadd.f32 %v2551_v36, %v2381_v52  ;;  %2955 = vmatmul.f32.gmra.mxu3 %v8091_v34  ;;  %v5905_v36 = vld [vmem:[%s9761_s5 + $0x458] sm:$0xff]  ;;  %3882 = vmatpush.msra.mxu1 %v5906_v13  ;;  %v3036_v0 = vld [vmem:[#allocation3 + $0x9] sm:$0xff] }
 0x34a   : > { %3029 = vmatmul.f32.gmra.mxu0 %v8096_v22  ;;  %6125 = vmatpush.msra.mxu2 %v5906_v13 }
 0x34b   : > { %v2659_v16 = vadd.f32 %v7569_v42, %v2583_v11  ;;  %v5904_v42 = vld [vmem:[%s9761_s5 + $0x450] sm:$0xff]  ;;  %3883 = vmatpush.msra.mxu1 %v5905_v36 }
 0x34c   : > { %v8122_v52 = vpop.f32.mrf.mxu3  ;;  %6126 = vmatpush.msra.mxu2 %v5905_v36  ;;  %v8141_v36 = vld [vmem:[#allocation3 + $0x111] sm:$0xff] }
 0x34d   : > { %3534 = vmatmul.f32.gmra.mxu2 %v8098_v15  ;;  %v2683_v38 = vmax.f32 %v2659_v16, 0.0  ;;  %9850 = vst [vmem:[#allocation10_spill] sm:$0xff] %v8122_v52  ;;  %3884 = vmatpush.msra.mxu1 %v5904_v42  ;;  %v1978_v16 = vadd.f32 %v7978_v24, %v7533_v10  ;;  %v6187_v10 = vld [vmem:[%s9760_s4] ss:$0 sm:$0xff] }
 0x34e   : > { %v2352_v50 = vpop.f32.mrf.mxu1  ;;  %v8127_v11 = vpop.f32.mrf.mxu0  ;;  %6127 = vmatpush.msra.mxu2 %v5904_v42 }
 0x34f   : > { %9851 = vst [vmem:[#allocation11_spill] sm:$0xff] %v8127_v11  ;;  %v8132_v30 = vmul.f32 %v2711_v31, %v2683_v38  ;;  %v2382_v13 = vadd.f32 %v2352_v50, %v2180_v63  ;;  %v5875_v38 = vld [vmem:[%s9761_s5 + $0x368] sm:$0xff] }
 0x350   : > { %v8134_v9 = vld [vmem:[#allocation3 + $0x12f] sm:$0xff]  ;;  %3397 = vmatmul.f32.gmra.mxu1 %v7986_v58  ;;  %3613 = vmatpush.msra.mxu3 %v5875_v38  ;;  %v5902_v58 = vld [vmem:[%s9761_s5 + $0x440] sm:$0xff]  ;;  %v2557_v50 = vpop.f32.mrf.mxu2 }
 0x351   : > { %2805 = vst [vmem:[#allocation3 + $0x148] sm:$0xff] %v8132_v30  ;;  %v2584_v11 = vadd.f32 %v2554_v39, %v2382_v13  ;;  %v5903_v63 = vld [vmem:[%s9761_s5 + $0x448] sm:$0xff]  ;;  %3089 = vmatmul.f32.vlgmr.msrb.gmra.mxu3 %v3036_v0  ;;  %v2181_v39 = vadd.f32 %v7983_v57, %v1978_v16  ;;  %v5901_v13 = vld [vmem:[%s9761_s5 + $0x438] sm:$0xff]  ;;  %v1979_v57 = vadd.f32 %v8010_v62, %v7546_v5  ;;  %v2712_v62 = vperm.slane %v7989_v18, 3 }
 0x352   : > { %3032 = vmatmul.f32.gmra.mxu0 %v8134_v9  ;;  %3885 = vmatpush.msra.mxu1 %v5903_v63  ;;  %v8166_v27 = vld [vmem:[#allocation3 + $0x129] sm:$0xff] }
 0x353   : > { %v2660_v24 = vadd.f32 %v6187_v10, %v2584_v11  ;;  %6128 = vmatpush.msra.mxu2 %v5903_v63  ;;  %v3037_v63 = vld [vmem:[#allocation3 + $0x11] sm:$0xff] }
 0x354   : > { %v8157_v54 = vpop.f32.mrf.mxu3  ;;  %3886 = vmatpush.msra.mxu1 %v5902_v58 }
 0x355   : > { %3537 = vmatmul.f32.gmra.mxu2 %v8141_v36  ;;  %v2684_v42 = vmax.f32 %v2660_v24, 0.0  ;;  %v5874_v24 = vld [vmem:[%s9761_s5 + $0x360] sm:$0xff] }
 0x356   : > { %v2355_v0 = vpop.f32.mrf.mxu1  ;;  %v8162_v11 = vpop.f32.mrf.mxu0  ;;  %6129 = vmatpush.msra.mxu2 %v5902_v58  ;;  %3887 = vmatpush.msra.mxu1 %v5901_v13  ;;  %v5900_v58 = vld [vmem:[%s9761_s5 + $0x430] sm:$0xff] }
 0x357   : > { %v8164_v38 = vmul.f32 %v2711_v31, %v2684_v42  ;;  %v2383_v52 = vadd.f32 %v2355_v0, %v2181_v39  ;;  %v5891_v31 = vld [vmem:[%s9761_s5 + $0x3e8] sm:$0xff]  ;;  %3614 = vmatpush.msra.mxu3 %v5874_v24  ;;  %v5898_v42 = vld [vmem:[%s9761_s5 + $0x420] sm:$0xff]  ;;  %v5873_v24 = vld [vmem:[%s9761_s5 + $0x358] sm:$0xff] }
 0x358   : > { %6130 = vmatpush.msra.mxu2 %v5901_v13  ;;  %3400 = vmatmul.f32.gmra.mxu1 %v8015_v43  ;;  %v2182_v43 = vadd.f32 %v8013_v55, %v1979_v57  ;;  %v5897_v55 = vld [vmem:[%s9761_s5 + $0x418] sm:$0xff] }
 0x359   : > { %2806 = vst [vmem:[#allocation3 + $0x150] sm:$0xff] %v8164_v38  ;;  %v2585_v16 = vadd.f32 %v2557_v50, %v2383_v52  ;;  %3092 = vmatmul.f32.gmra.mxu3 %v3037_v63  ;;  %3747 = vmatpush.msra.mxu0 %v5891_v31  ;;  %v2560_v63 = vpop.f32.mrf.mxu2  ;;  %v5890_v31 = vld [vmem:[%s9761_s5 + $0x3e0] sm:$0xff] }
 0x35a   : > { %3224 = vmatmul.f32.vlgmr.msrb.gmra.mxu0 %v7706_v53  ;;  %v5899_v53 = vld [vmem:[%s9761_s5 + $0x428] sm:$0xff]  ;;  %3888 = vmatpush.msra.mxu1 %v5900_v58 }
 0x35b   : > { %v2661_v5 = vadd.f32 %v6187_v10, %v2585_v16  ;;  %6131 = vmatpush.msra.mxu2 %v5900_v58  ;;  %v8200_v16 = vld [vmem:[#allocation3 + $0x131] sm:$0xff]  ;;  %3748 = vmatpush.msra.mxu0 %v5890_v31 }
 0x35c   : > { %v8188_v39 = vpop.f32.mrf.mxu3  ;;  %3889 = vmatpush.msra.mxu1 %v5899_v53  ;;  %3615 = vmatpush.msra.mxu3 %v5873_v24 }
 0x35d   : > { %3540 = vmatmul.f32.gmra.mxu2 %v8166_v27  ;;  %v2685_v52 = vmax.f32 %v2661_v5, 0.0 }
 0x35e   : > { %v2358_v50 = vpop.f32.mrf.mxu1  ;;  %v8193_v13 = vpop.f32.mrf.mxu0  ;;  %6132 = vmatpush.msra.mxu2 %v5899_v53  ;;  %3890 = vmatpush.msra.mxu1 %v5898_v42 }
 0x35f   : > { %v2735_v18 = vmul.f32 %v2712_v62, %v2685_v52  ;;  %v2384_v0 = vadd.f32 %v2358_v50, %v2182_v43 }
 0x360   : > { %6133 = vmatpush.msra.mxu2 %v5898_v42  ;;  %3403 = vmatmul.f32.gmra.mxu1 %v8040_v7  ;;  %v5896_v7 = vld [vmem:[%s9761_s5 + $0x410] sm:$0xff]  ;;  %v5889_v42 = vld [vmem:[%s9761_s5 + $0x3d8] sm:$0xff] }
 0x361   : > { %2807 = vst [vmem:[#allocation3 + $0x168] sm:$0xff] %v2735_v18  ;;  %v2586_v57 = vadd.f32 %v2560_v63, %v2384_v0  ;;  %3095 = vmatmul.f32.gmra.mxu3 %v7759_v48  ;;  %3891 = vmatpush.msra.mxu1 %v5897_v55  ;;  %v8225_v52 = vld [vmem:[#allocation3 + $0x149] sm:$0xff] }
 0x362   : > { %3227 = vmatmul.f32.gmra.mxu0 %v7732_v4  ;;  %6134 = vmatpush.msra.mxu2 %v5897_v55  ;;  %v5895_v4 = vld [vmem:[%s9761_s5 + $0x408] sm:$0xff]  ;;  %v5888_v0 = vld [vmem:[%s9761_s5 + $0x3d0] sm:$0xff] }
 0x363   : > { %v2662_v58 = vadd.f32 %v6187_v10, %v2586_v57  ;;  %3892 = vmatpush.msra.mxu1 %v5896_v7  ;;  %v5894_v10 = vld [vmem:[%s9761_s5 + $0x400] sm:$0xff]  ;;  %3749 = vmatpush.msra.mxu0 %v5889_v42  ;;  %v5887_v57 = vld [vmem:[%s9761_s5 + $0x3c8] sm:$0xff]  ;;  %v5884_v42 = vld [vmem:[%s9761_s5 + $0x3b0] sm:$0xff] }
 0x364   : > { %v8216_v53 = vpop.f32.mrf.mxu3  ;;  %6135 = vmatpush.msra.mxu2 %v5896_v7 }
 0x365   : > { %3543 = vmatmul.f32.gmra.mxu2 %v8200_v16  ;;  %v2686_v5 = vmax.f32 %v2662_v58, 0.0  ;;  %3893 = vmatpush.msra.mxu1 %v5895_v4 }
 0x366   : > { %v8218_v48 = vpop.f32.mrf.mxu0  ;;  %6136 = vmatpush.msra.mxu2 %v5895_v4  ;;  %3750 = vmatpush.msra.mxu0 %v5888_v0  ;;  %v8288_v4 = vpop.f32.mrf.mxu1 }
 0x367   : > { %v2736_v43 = vmul.f32 %v2712_v62, %v2686_v5  ;;  %3894 = vmatpush.msra.mxu1 %v5894_v10 }
 0x368   : > { %3406 = vmatmul.f32.gmra.mxu1 %v8063_v25  ;;  %6137 = vmatpush.msra.mxu2 %v5894_v10  ;;  %v8241_v25 = vld [vmem:[#allocation3 + $0x151] sm:$0xff] }
 0x369   : > { %2808 = vst [vmem:[#allocation3 + $0x170] sm:$0xff] %v2736_v43  ;;  %3098 = vmatmul.f32.gmra.mxu3 %v7782_v14  ;;  %3751 = vmatpush.msra.mxu0 %v5887_v57  ;;  %v5868_v43 = vld [vmem:[%s9761_s5 + $0x330] sm:$0xff] }
 0x36a   : > { %3230 = vmatmul.f32.gmra.mxu0 %v7753_v44  ;;  %v5872_v44 = vld [vmem:[%s9761_s5 + $0x350] sm:$0xff] }
 0x36b   : > { %3616 = vmatpush.msra.mxu3 %v5872_v44  ;;  %v5867_v44 = vld [vmem:[%s9761_s5 + $0x328] sm:$0xff] }
 0x36c   : > { %v8232_v62 = vpop.f32.mrf.mxu3 }
 0x36d   : > { %3546 = vmatmul.f32.gmra.mxu2 %v8225_v52 }
 0x36e   : > { %v8234_v50 = vpop.f32.mrf.mxu0  ;;  %v8303_v10 = vpop.f32.mrf.mxu1 }
 0x370   : > { %3409 = vmatmul.f32.gmra.mxu1 %v8091_v34  ;;  %v5871_v34 = vld [vmem:[%s9761_s5 + $0x348] sm:$0xff] }
 0x371   : > { %3101 = vmatmul.f32.gmra.mxu3 %v7807_v60 }
 0x372   : > { %3233 = vmatmul.f32.gmra.mxu0 %v7776_v37  ;;  %3617 = vmatpush.msra.mxu3 %v5871_v34  ;;  %v3860_v37 = vld [vmem:[#allocation3 + $0x169] sm:$0xff] }
 0x373   : > { %v5883_v34 = vld [vmem:[%s9761_s5 + $0x3a8] sm:$0xff] }
 0x374   : > { %v8245_v14 = vpop.f32.mrf.mxu3 }
 0x375   : > { %3549 = vmatmul.f32.gmra.mxu2 %v8241_v25 }
 0x376   : > { %v8247_v18 = vpop.f32.mrf.mxu0 }
 0x378   : > { %3412 = vmatmul.f32.gmra.mxu1 %v8132_v30  ;;  %v3861_v30 = vld [vmem:[#allocation3 + $0x171] sm:$0xff] }
 0x379   : > { %3104 = vmatmul.f32.gmra.mxu3 %v7830_v40 }
 0x37a   : > { %3236 = vmatmul.f32.gmra.mxu0 %v7800_v20  ;;  %v5870_v20 = vld [vmem:[%s9761_s5 + $0x340] sm:$0xff] }
 0x37b   : > { %3618 = vmatpush.msra.mxu3 %v5870_v20  ;;  %v5865_v20 = vld [vmem:[%s9761_s5 + $0x318] sm:$0xff] }
 0x37c   : > { %v8258_v63 = vpop.f32.mrf.mxu3 }
 0x37d   : > { %3949 = vmatmul.f32.vlgmr.msra.gmra.mxu2 %v3860_v37  ;;  %v9852_v37 = vld [vmem:[#allocation9_spill] sm:$0xff] }
 0x37e   : > { %v8260_v55 = vpop.f32.mrf.mxu0 }
 0x380   : > { %3415 = vmatmul.f32.gmra.mxu1 %v8164_v38  ;;  %v5869_v38 = vld [vmem:[%s9761_s5 + $0x338] sm:$0xff] }
 0x381   : > { %3107 = vmatmul.f32.gmra.mxu3 %v7850_v19 }
 0x382   : > { %3239 = vmatmul.f32.gmra.mxu0 %v7823_v12  ;;  %v5886_v12 = vld [vmem:[%s9761_s5 + $0x3c0] sm:$0xff]  ;;  %3619 = vmatpush.msra.mxu3 %v5869_v38 }
 0x383   : > { %3752 = vmatpush.msra.mxu0 %v5886_v12 }
 0x384   : > { %v8271_v31 = vpop.f32.mrf.mxu3  ;;  %3620 = vmatpush.msra.mxu3 %v5868_v43 }
 0x385   : > { %3952 = vmatmul.f32.gmra.mxu2 %v3861_v30 }
 0x386   : > { %v8273_v24 = vpop.f32.mrf.mxu0  ;;  %3621 = vmatpush.msra.mxu3 %v5867_v44 }
 0x388   : > { %3895 = vmatmul.f32.vlgmr.msra.gmra.mxu1 %v7807_v60  ;;  %v5885_v60 = vld [vmem:[%s9761_s5 + $0x3b8] sm:$0xff] }
 0x389   : > { %3110 = vmatmul.f32.gmra.mxu3 %v7876_v2  ;;  %3753 = vmatpush.msra.mxu0 %v5885_v60 }
 0x38a   : > { %3242 = vmatmul.f32.gmra.mxu0 %v7843_v61 }
 0x38b   : > { %3754 = vmatpush.msra.mxu0 %v5884_v42  ;;  %v5864_v42 = vld [vmem:[%s9761_s5 + $0x310] sm:$0xff] }
 0x38c   : > { %v8284_v7 = vpop.f32.mrf.mxu3 }
 0x38d   : > { %3755 = vmatpush.msra.mxu0 %v5883_v34  ;;  %v5880_v34 = vld [vmem:[%s9761_s5 + $0x390] sm:$0xff] }
 0x38e   : > { %v8286_v58 = vpop.f32.mrf.mxu0 }
 0x390   : > { %3898 = vmatmul.f32.gmra.mxu1 %v7830_v40 }
 0x391   : > { %3113 = vmatmul.f32.gmra.mxu3 %v7899_v32 }
 0x392   : > { %3245 = vmatmul.f32.gmra.mxu0 %v7869_v23 }
 0x394   : > { %v8296_v61 = vpop.f32.mrf.mxu3 }
 0x396   : > { %v8298_v5 = vpop.f32.mrf.mxu0 }
 0x398   : > { %3901 = vmatmul.f32.gmra.mxu1 %v7850_v19  ;;  %v8321_v19 = vpop.f32.mrf.mxu1 }
 0x399   : > { %3116 = vmatmul.f32.gmra.mxu3 %v7925_v47 }
 0x39a   : > { %3248 = vmatmul.f32.gmra.mxu0 %v7892_v35 }
 0x39c   : > { %v8308_v40 = vpop.f32.mrf.mxu3 }
 0x39f   : > { %v8310_v23 = vpop.f32.mrf.mxu0 }
 0x3a0   : > { %3904 = vmatmul.f32.gmra.mxu1 %v7876_v2  ;;  %v5866_v2 = vld [vmem:[%s9761_s5 + $0x320] sm:$0xff] }
 0x3a1   : > { %3119 = vmatmul.f32.gmra.mxu3 %v7947_v3 }
 0x3a2   : > { %3251 = vmatmul.f32.gmra.mxu0 %v7918_v6  ;;  %3622 = vmatpush.msra.mxu3 %v5866_v2  ;;  %v8336_v6 = vpop.f32.mrf.mxu1 }
 0x3a4   : > { %v8323_v35 = vpop.f32.mrf.mxu3  ;;  %3623 = vmatpush.msra.mxu3 %v5865_v20 }
 0x3a6   : > { %3624 = vmatpush.msra.mxu3 %v5864_v42 }
 0x3a7   : > { %v8325_v0 = vpop.f32.mrf.mxu0 }
 0x3a8   : > { %3907 = vmatmul.f32.gmra.mxu1 %v7899_v32  ;;  %v5882_v32 = vld [vmem:[%s9761_s5 + $0x3a0] sm:$0xff] }
 0x3a9   : > { %3122 = vmatmul.f32.gmra.mxu3 %v7970_v51  ;;  %3756 = vmatpush.msra.mxu0 %v5882_v32  ;;  %v5879_v32 = vld [vmem:[%s9761_s5 + $0x388] sm:$0xff] }
 0x3aa   : > { %3254 = vmatmul.f32.gmra.mxu0 %v9852_v37  ;;  %v8355_v60 = vpop.f32.mrf.mxu1  ;;  %v5863_v37 = vld [vmem:[%s9761_s5 + $0x308] sm:$0xff] }
 0x3ab   : > { %3625 = vmatpush.msra.mxu3 %v5863_v37 }
 0x3ac   : > { %v8338_v57 = vpop.f32.mrf.mxu3 }
 0x3af   : > { %v8340_v30 = vpop.f32.mrf.mxu0 }
 0x3b0   : > { %3910 = vmatmul.f32.gmra.mxu1 %v7925_v47  ;;  %v5881_v47 = vld [vmem:[%s9761_s5 + $0x398] sm:$0xff] }
 0x3b1   : > { %3125 = vmatmul.f32.gmra.mxu3 %v7998_v56  ;;  %3757 = vmatpush.msra.mxu0 %v5881_v47 }
 0x3b2   : > { %3257 = vmatmul.f32.gmra.mxu0 %v7963_v59  ;;  %v8370_v44 = vpop.f32.mrf.mxu1 }
 0x3b3   : > { %3758 = vmatpush.msra.mxu0 %v5880_v34 }
 0x3b4   : > { %v8351_v12 = vpop.f32.mrf.mxu3 }
 0x3b5   : > { %3759 = vmatpush.msra.mxu0 %v5879_v32 }
 0x3b7   : > { %v8353_v38 = vpop.f32.mrf.mxu0 }
 0x3b8   : > { %3913 = vmatmul.f32.gmra.mxu1 %v7947_v3 }
 0x3b9   : > { %3128 = vmatmul.f32.gmra.mxu3 %v8024_v28 }
 0x3ba   : > { %3260 = vmatmul.f32.gmra.mxu0 %v7991_v17 }
 0x3bc   : > { %v8363_v59 = vpop.f32.mrf.mxu3 }
 0x3bf   : > { %v8365_v43 = vpop.f32.mrf.mxu0 }
 0x3c0   : > { %3916 = vmatmul.f32.gmra.mxu1 %v7970_v51  ;;  %v8388_v51 = vpop.f32.mrf.mxu1 }
 0x3c1   : > { %3131 = vmatmul.f32.gmra.mxu3 %v8052_v33 }
 0x3c2   : > { %3263 = vmatmul.f32.gmra.mxu0 %v8017_v26 }
 0x3c4   : > { %v8375_v3 = vpop.f32.mrf.mxu3 }
 0x3c7   : > { %v8377_v17 = vpop.f32.mrf.mxu0 }
 0x3c8   : > { %3919 = vmatmul.f32.gmra.mxu1 %v7998_v56  ;;  %v2977_v56 = vadd.f32 %v8038_v8, %v8035_v49  ;;  %v8405_v20 = vpop.f32.mrf.mxu1  ;;  %v2980_v49 = vadd.f32 %v8061_v46, %v8059_v21  ;;  %v8434_v46 = vld [vmem:[#allocation3 + $0x147] sm:$0xff] }
 0x3c9   : > { %3134 = vmatmul.f32.gmra.mxu3 %v8072_v1 }
 0x3ca   : > { %3266 = vmatmul.f32.gmra.mxu0 %v8042_v41  ;;  %v5862_v41 = vld [vmem:[%s9761_s5 + $0x300] sm:$0xff] }
 0x3cb   : > { %3626 = vmatpush.msra.mxu3 %v5862_v41 }
 0x3cc   : > { %v8390_v26 = vpop.f32.mrf.mxu3 }
 0x3cf   : > { %v8392_v2 = vpop.f32.mrf.mxu0 }
 0x3d0   : > { %3922 = vmatmul.f32.gmra.mxu1 %v8024_v28  ;;  %v5878_v28 = vld [vmem:[%s9761_s5 + $0x380] sm:$0xff]  ;;  %v8423_v32 = vpop.f32.mrf.mxu1 }
 0x3d1   : > { %3137 = vmatmul.f32.gmra.mxu3 %v8098_v15  ;;  %3760 = vmatpush.msra.mxu0 %v5878_v28  ;;  %9853 = vst [vmem:[#allocation12_spill] sm:$0xff] %v8423_v32 }
 0x3d2   : > { %3269 = vmatmul.f32.gmra.mxu0 %v8065_v29 }
 0x3d4   : > { %v3090_v47 = vpop.f32.mrf.mxu3 }
 0x3d5   : > { %v8409_v34 = vadd.f32 %v3090_v47, %v2977_v56 }
 0x3d7   : > { %v8407_v42 = vpop.f32.mrf.mxu0 }
 0x3d8   : > { %3925 = vmatmul.f32.gmra.mxu1 %v8052_v33  ;;  %v9854_v33 = vld [vmem:[#allocation8_spill] sm:$0xff]  ;;  %v8436_v47 = vpop.f32.mrf.mxu1 }
 0x3d9   : > { %3140 = vmatmul.f32.gmra.mxu3 %v8141_v36  ;;  %9855 = vst [vmem:[#allocation13_spill] sm:$0xff] %v8436_v47 }
 0x3da   : > { %3272 = vmatmul.f32.gmra.mxu0 %v8096_v22  ;;  %v2983_v22 = vadd.f32 %v9854_v33, %v8084_v45  ;;  %v8447_v33 = vld [vmem:[#allocation3 + $0x14f] sm:$0xff] }
 0x3dc   : > { %v3093_v8 = vpop.f32.mrf.mxu3 }
 0x3dd   : > { %v8421_v37 = vadd.f32 %v3093_v8, %v2980_v49 }
 0x3df   : > { %v8419_v29 = vpop.f32.mrf.mxu0 }
 0x3e0   : > { %3928 = vmatmul.f32.gmra.mxu1 %v8072_v1  ;;  %v9856_v1 = vld [vmem:[#allocation10_spill] sm:$0xff] }
 0x3e1   : > { %3143 = vmatmul.f32.gmra.mxu3 %v8166_v27 }
 0x3e2   : > { %3275 = vmatmul.f32.gmra.mxu0 %v8134_v9  ;;  %v9857_v9 = vld [vmem:[#allocation11_spill] sm:$0xff] }
 0x3e3   : > { %v2986_v28 = vadd.f32 %v9857_v9, %v9856_v1 }
 0x3e4   : > { %v3096_v41 = vpop.f32.mrf.mxu3 }
 0x3e5   : > { %v8432_v21 = vadd.f32 %v3096_v41, %v2983_v22  ;;  %v3574_v22 = vld [vmem:[#allocation3 + $0x47] sm:$0xff]  ;;  %v2989_v41 = vadd.f32 %v8162_v11, %v8157_v54  ;;  %v3709_v11 = vld [vmem:[#allocation3 + $0x50] sm:$0xff] }
 0x3e7   : > { %v8430_v56 = vpop.f32.mrf.mxu0 }
 0x3e8   : > { %3931 = vmatmul.f32.gmra.mxu1 %v8098_v15  ;;  %v8451_v15 = vpop.f32.mrf.mxu1 }
 0x3e9   : > { %3146 = vmatmul.f32.gmra.mxu3 %v8200_v16  ;;  %9858 = vst [vmem:[#allocation15_spill] sm:$0xff] %v8451_v15 }
 0x3ea   : > { %3278 = vmatmul.f32.gmra.mxu0 %v8434_v46 }
 0x3ec   : > { %v3099_v49 = vpop.f32.mrf.mxu3 }
 0x3ed   : > { %v8445_v8 = vadd.f32 %v3099_v49, %v2986_v28  ;;  %v3708_v28 = vld [vmem:[#allocation3 + $0x48] sm:$0xff] }
 0x3ee   : > { %v3575_v49 = vld [vmem:[#allocation3 + $0x4f] sm:$0xff] }
 0x3ef   : > { %v8443_v45 = vpop.f32.mrf.mxu0 }
 0x3f0   : > { %3934 = vmatmul.f32.gmra.mxu1 %v8141_v36  ;;  %v2992_v36 = vadd.f32 %v8193_v13, %v8188_v39 }
 0x3f1   : > { %3627 = vmatmul.f32.vlgmr.msra.gmra.mxu3 %v3574_v22  ;;  %v8462_v22 = vpop.f32.mrf.mxu1 }
 0x3f2   : > { %3281 = vmatmul.f32.gmra.mxu0 %v8447_v33 }
 0x3f4   : > { %v3102_v47 = vpop.f32.mrf.mxu3 }
 0x3f5   : > { %v8457_v9 = vadd.f32 %v3102_v47, %v2989_v41  ;;  %v3576_v47 = vld [vmem:[#allocation3 + $0x67] sm:$0xff] }
 0x3f7   : > { %v8455_v1 = vpop.f32.mrf.mxu0 }
 0x3f8   : > { %3937 = vmatmul.f32.gmra.mxu1 %v8166_v27  ;;  %v2995_v27 = vadd.f32 %v8218_v48, %v8216_v53  ;;  %v3711_v48 = vld [vmem:[#allocation3 + $0x70] sm:$0xff] }
 0x3f9   : > { %3630 = vmatmul.f32.gmra.mxu3 %v3575_v49  ;;  %v8475_v13 = vpop.f32.mrf.mxu1  ;;  %v3710_v49 = vld [vmem:[#allocation3 + $0x68] sm:$0xff] }
 0x3fa   : > { %3761 = vmatmul.f32.vlgmr.msra.gmra.mxu0 %v3708_v28  ;;  %9859 = vst [vmem:[#allocation14_spill] sm:$0xff] %v8475_v13  ;;  %v3718_v13 = vld [vmem:[#allocation3 + $0xe8] sm:$0xff] }
 0x3fc   : > { %v3105_v15 = vpop.f32.mrf.mxu3 }
 0x3fd   : > { %v8466_v54 = vadd.f32 %v3105_v15, %v2992_v36  ;;  %v3577_v15 = vld [vmem:[#allocation3 + $0x6f] sm:$0xff] }
 0x3ff   : > { %v8464_v32 = vpop.f32.mrf.mxu0 }
 0x400   : > { %3940 = vmatmul.f32.gmra.mxu1 %v8200_v16  ;;  %v2998_v16 = vadd.f32 %v8234_v50, %v8232_v62  ;;  %v3712_v50 = vld [vmem:[#allocation3 + $0x88] sm:$0xff] }
 0x401   : > { %3633 = vmatmul.f32.gmra.mxu3 %v3576_v47  ;;  %v8484_v47 = vpop.f32.mrf.mxu1 }
 0x402   : > { %3764 = vmatmul.f32.gmra.mxu0 %v3709_v11  ;;  %9860 = vst [vmem:[#allocation16_spill] sm:$0xff] %v8484_v47 }
 0x404   : > { %v3108_v41 = vpop.f32.mrf.mxu3 }
 0x405   : > { %v8473_v39 = vadd.f32 %v3108_v41, %v2995_v27  ;;  %v3578_v27 = vld [vmem:[#allocation3 + $0x87] sm:$0xff] }
 0x407   : > { %v8471_v28 = vpop.f32.mrf.mxu0 }
 0x408   : > { %3943 = vmatmul.f32.gmra.mxu1 %v8225_v52  ;;  %v3001_v52 = vadd.f32 %v8247_v18, %v8245_v14  ;;  %v3713_v14 = vld [vmem:[#allocation3 + $0x90] sm:$0xff]  ;;  %v3580_v18 = vld [vmem:[#allocation3 + $0xa7] sm:$0xff] }
 0x409   : > { %3636 = vmatmul.f32.gmra.mxu3 %v3577_v15  ;;  %v3579_v15 = vld [vmem:[#allocation3 + $0x8f] sm:$0xff] }
 0x40a   : > { %3767 = vmatmul.f32.gmra.mxu0 %v3710_v49 }
 0x40c   : > { %v3111_v36 = vpop.f32.mrf.mxu3 }
 0x40d   : > { %v8482_v53 = vadd.f32 %v3111_v36, %v2998_v16  ;;  %v8493_v16 = vpop.f32.mrf.mxu1 }
 0x40e   : > { %9861 = vst [vmem:[#allocation17_spill] sm:$0xff] %v8493_v16 }
 0x40f   : > { %v8480_v11 = vpop.f32.mrf.mxu0 }
 0x410   : > { %3946 = vmatmul.f32.gmra.mxu1 %v8241_v25  ;;  %v3004_v25 = vadd.f32 %v8260_v55, %v8258_v63  ;;  %v3714_v63 = vld [vmem:[#allocation3 + $0xa8] sm:$0xff] }
 0x411   : > { %3639 = vmatmul.f32.gmra.mxu3 %v3578_v27  ;;  %v3581_v55 = vld [vmem:[#allocation3 + $0xaf] sm:$0xff] }
 0x412   : > { %3770 = vmatmul.f32.gmra.mxu0 %v3711_v48 }
 0x414   : > { %v3114_v41 = vpop.f32.mrf.mxu3 }
 0x415   : > { %v8491_v62 = vadd.f32 %v3114_v41, %v3001_v52  ;;  %v3007_v52 = vadd.f32 %v8273_v24, %v8271_v31  ;;  %v8503_v41 = vpop.f32.mrf.mxu1  ;;  %v3715_v24 = vld [vmem:[#allocation3 + $0xb0] sm:$0xff] }
 0x416   : > { %9862 = vst [vmem:[#allocation18_spill] sm:$0xff] %v8503_v41  ;;  %v3582_v41 = vld [vmem:[#allocation3 + $0xc7] sm:$0xff] }
 0x417   : > { %v8489_v49 = vpop.f32.mrf.mxu0 }
 0x419   : > { %3642 = vmatmul.f32.gmra.mxu3 %v3579_v15 }
 0x41a   : > { %3773 = vmatmul.f32.gmra.mxu0 %v3712_v50 }
 0x41c   : > { %v3117_v36 = vpop.f32.mrf.mxu3 }
 0x41d   : > { %v8499_v27 = vadd.f32 %v3117_v36, %v3004_v25  ;;  %v3010_v25 = vadd.f32 %v8286_v58, %v8284_v7  ;;  %v8515_v31 = vpop.f32.mrf.mxu1  ;;  %v3716_v58 = vld [vmem:[#allocation3 + $0xc8] sm:$0xff] }
 0x41e   : > { %9863 = vst [vmem:[#allocation20_spill] sm:$0xff] %v8515_v31 }
 0x41f   : > { %v8497_v48 = vpop.f32.mrf.mxu0 }
 0x421   : > { %3645 = vmatmul.f32.gmra.mxu3 %v3580_v18 }
 0x422   : > { %3776 = vmatmul.f32.gmra.mxu0 %v3713_v14 }
 0x424   : > { %v3120_v50 = vpop.f32.mrf.mxu3 }
 0x425   : > { %v8507_v16 = vadd.f32 %v3120_v50, %v3007_v52  ;;  %v8517_v52 = vpop.f32.mrf.mxu2  ;;  %v3013_v50 = vadd.f32 %v8298_v5, %v8296_v61  ;;  %v8525_v47 = vpop.f32.mrf.mxu1  ;;  %v3717_v5 = vld [vmem:[#allocation3 + $0xd0] sm:$0xff] }
 0x426   : > { %9864 = vst [vmem:[#allocation19_spill] sm:$0xff] %v8525_v47 }
 0x427   : > { %v8505_v15 = vpop.f32.mrf.mxu0 }
 0x429   : > { %3648 = vmatmul.f32.gmra.mxu3 %v3581_v55 }
 0x42a   : > { %3779 = vmatmul.f32.gmra.mxu0 %v3714_v63 }
 0x42c   : > { %v3123_v36 = vpop.f32.mrf.mxu3 }
 0x42d   : > { %v8513_v18 = vadd.f32 %v3123_v36, %v3010_v25  ;;  %v3583_v25 = vld [vmem:[#allocation3 + $0xcf] sm:$0xff]  ;;  %v3016_v36 = vadd.f32 %v8310_v23, %v8308_v40 }
 0x42f   : > { %v8511_v14 = vpop.f32.mrf.mxu0 }
 0x431   : > { %3651 = vmatmul.f32.gmra.mxu3 %v3582_v41  ;;  %v8529_v41 = vpop.f32.mrf.mxu2 }
 0x432   : > { %3782 = vmatmul.f32.gmra.mxu0 %v3715_v24 }
 0x434   : > { %v3126_v63 = vpop.f32.mrf.mxu3 }
 0x435   : > { %v8523_v7 = vadd.f32 %v3126_v63, %v3013_v50  ;;  %v3584_v50 = vld [vmem:[#allocation3 + $0xe7] sm:$0xff]  ;;  %v8535_v63 = vpop.f32.mrf.mxu1 }
 0x436   : > { %9865 = vst [vmem:[#allocation21_spill] sm:$0xff] %v8535_v63 }
 0x437   : > { %v8521_v55 = vpop.f32.mrf.mxu0 }
 0x439   : > { %3654 = vmatmul.f32.gmra.mxu3 %v3583_v25  ;;  %v8543_v23 = vpop.f32.mrf.mxu2 }
 0x43a   : > { %3785 = vmatmul.f32.gmra.mxu0 %v3716_v58  ;;  %v3019_v58 = vadd.f32 %v8325_v0, %v8323_v35  ;;  %v3719_v0 = vld [vmem:[#allocation3 + $0xf0] sm:$0xff] }
 0x43c   : > { %v3129_v24 = vpop.f32.mrf.mxu3 }
 0x43d   : > { %v8533_v61 = vadd.f32 %v3129_v24, %v3016_v36  ;;  %v3585_v36 = vld [vmem:[#allocation3 + $0xef] sm:$0xff]  ;;  %v3022_v24 = vadd.f32 %v8340_v30, %v8338_v57  ;;  %v5959_v30 = vld [vmem:[%s9763_s7 + $0xb8] sm:$0xff] }
 0x43e   : > { %4482 = vmatpush.msrb.mxu3 %v5959_v30 }
 0x43f   : > { %v8531_v31 = vpop.f32.mrf.mxu0 }
 0x441   : > { %3657 = vmatmul.f32.gmra.mxu3 %v3584_v50 }
 0x442   : > { %3788 = vmatmul.f32.gmra.mxu0 %v3717_v5  ;;  %v8547_v5 = vpop.f32.mrf.mxu1 }
 0x443   : > { %9867 = vst [vmem:[#allocation23_spill] sm:$0xff] %v8547_v5  ;;  %v3588_v5 = vld [vmem:[#allocation3 + $0x127] sm:$0xff] }
 0x444   : > { %v3132_v25 = vpop.f32.mrf.mxu3 }
 0x445   : > { %v8541_v40 = vadd.f32 %v3132_v25, %v3019_v58  ;;  %v3586_v58 = vld [vmem:[#allocation3 + $0x107] sm:$0xff] }
 0x447   : > { %v8539_v47 = vpop.f32.mrf.mxu0 }
 0x448   : > { %9866 = vst [vmem:[#allocation22_spill] sm:$0xff] %v8539_v47  ;;  %v8553_v47 = vpop.f32.mrf.mxu2 }
 0x449   : > { %3660 = vmatmul.f32.gmra.mxu3 %v3585_v36 }
 0x44a   : > { %3791 = vmatmul.f32.gmra.mxu0 %v3718_v13  ;;  %v3025_v13 = vadd.f32 %v8353_v38, %v8351_v12  ;;  %v5919_v12 = vld [vmem:[%s9763_s7 + $0x78] sm:$0xff]  ;;  %v3028_v38 = vadd.f32 %v8365_v43, %v8363_v59  ;;  %v5917_v59 = vld [vmem:[%s9763_s7 + $0x68] sm:$0xff]  ;;  %v3721_v43 = vld [vmem:[#allocation3 + $0x110] sm:$0xff] }
 0x44b   : > { %4231 = vmatpush.msrb.mxu2 %v5919_v12 }
 0x44c   : > { %v3135_v50 = vpop.f32.mrf.mxu3 }
 0x44d   : > { %v8551_v35 = vadd.f32 %v3135_v50, %v3022_v24  ;;  %v8564_v24 = vpop.f32.mrf.mxu1  ;;  %v3720_v50 = vld [vmem:[#allocation3 + $0x108] sm:$0xff] }
 0x44f   : > { %v8549_v63 = vpop.f32.mrf.mxu0 }
 0x451   : > { %3663 = vmatmul.f32.gmra.mxu3 %v3586_v58  ;;  %v8566_v58 = vpop.f32.mrf.mxu2 }
 0x452   : > { %3794 = vmatmul.f32.gmra.mxu0 %v3719_v0  ;;  %v3587_v0 = vld [vmem:[#allocation3 + $0x10f] sm:$0xff] }
 0x454   : > { %v3138_v25 = vpop.f32.mrf.mxu3 }
 0x455   : > { %v8559_v57 = vadd.f32 %v3138_v25, %v3025_v13  ;;  %v5918_v25 = vld [vmem:[%s9763_s7 + $0x70] sm:$0xff]  ;;  %v8586_v12 = vpop.f32.mrf.mxu1 }
 0x456   : > { %4232 = vmatpush.msrb.mxu2 %v5918_v25  ;;  %v3031_v25 = vadd.f32 %v8377_v17, %v8375_v3 }
 0x457   : > { %v8557_v36 = vpop.f32.mrf.mxu0 }
 0x458   : > { %4233 = vmatpush.msrb.mxu2 %v5917_v59  ;;  %v5958_v59 = vld [vmem:[%s9763_s7 + $0xb0] sm:$0xff] }
 0x459   : > { %3666 = vmatmul.f32.gmra.mxu3 %v3587_v0  ;;  %v5983_v0 = vld [vmem:[%s9763_s7 + $0xf8] sm:$0xff] }
 0x45a   : > { %3797 = vmatmul.f32.gmra.mxu0 %v3720_v50  ;;  %4483 = vmatpush.msrb.mxu3 %v5958_v59  ;;  %v5956_v59 = vld [vmem:[%s9763_s7 + $0xa0] sm:$0xff] }
 0x45b   : > { %4637 = vmatpush.msrb.mxu0 %v5983_v0  ;;  %v8606_v0 = vpop.f32.mrf.mxu2 }
 0x45c   : > { %v3141_v13 = vpop.f32.mrf.mxu3 }
 0x45d   : > { %v8578_v50 = vadd.f32 %v3141_v13, %v3028_v38  ;;  %v5916_v38 = vld [vmem:[%s9763_s7 + $0x60] sm:$0xff]  ;;  %v5915_v13 = vld [vmem:[%s9763_s7 + $0x58] sm:$0xff] }
 0x45e   : > { %4234 = vmatpush.msrb.mxu2 %v5916_v38  ;;  %v5913_v38 = vld [vmem:[%s9763_s7 + $0x48] sm:$0xff] }
 0x45f   : > { %v8576_v30 = vpop.f32.mrf.mxu0  ;;  %9869 = vst [vmem:[#allocation26_spill] sm:$0xff] %v8578_v50  ;;  %v3722_v50 = vld [vmem:[#allocation3 + $0x128] sm:$0xff] }
 0x460   : > { %9868 = vst [vmem:[#allocation24_spill] sm:$0xff] %v8576_v30  ;;  %v8588_v30 = vld [vmem:[#allocation2] sm:$0xff]  ;;  %4235 = vmatpush.msrb.mxu2 %v5915_v13  ;;  %v5957_v13 = vld [vmem:[%s9763_s7 + $0xa8] sm:$0xff] }
 0x461   : > { %4066 = vst.msk [vmem:[#allocation4 + $0x8] sm:$0xff] %vm4064_vm14, %v8588_v30  ;;  %3669 = vmatmul.f32.gmra.mxu3 %v3588_v5 }
 0x462   : > { %3800 = vmatmul.f32.gmra.mxu0 %v3721_v43  ;;  %4065 = vst.msk [vmem:[#allocation4] sm:$0xff] %vm4064_vm14, %v8588_v30  ;;  %v5914_v43 = vld [vmem:[%s9763_s7 + $0x50] sm:$0xff]  ;;  %4484 = vmatpush.msrb.mxu3 %v5957_v13  ;;  %v8653_v13 = vstv %s4020_s24  ;;  %s5618_s24 = sshll.u32 %s9971_s10, 5 }
 0x463   : > { %4067 = vst.msk [vmem:[#allocation4 + $0x10] sm:$0xff] %vm4064_vm14, %v8588_v30  ;;  %4236 = vmatpush.msrb.mxu2 %v5914_v43  ;;  %v8643_v43 = vpop.f32.mrf.mxu1  ;;  %s366_s30 = sadd.s32 %s5618_s24, %s9973_s23 }
 0x464   : > { %4070 = vst.msk [vmem:[#allocation4 + $0x20] sm:$0xff] %vm4064_vm14, %v8588_v30  ;;  %v3144_v5 = vpop.f32.mrf.mxu3  ;;  %4485 = vmatpush.msrb.mxu3 %v5956_v59  ;;  %v5982_v59 = vld [vmem:[%s9763_s7 + $0xf0] sm:$0xff]  ;;  %s5619_s17 = sshll.u32 %s366_s30, 3 }
 0x465   : > { %4071 = vst.msk [vmem:[#allocation4 + $0x28] sm:$0xff] %vm4064_vm14, %v8588_v30  ;;  %v8618_v17 = vadd.f32 %v3144_v5, %v3031_v25  ;;  %4237 = vmatpush.msrb.mxu2 %v5913_v38  ;;  %v3589_v25 = vld [vmem:[#allocation3 + $0x12f] sm:$0xff]  ;;  %v5912_v5 = vld [vmem:[%s9763_s7 + $0x40] sm:$0xff]  ;;  %v5955_v38 = vld [vmem:[%s9763_s7 + $0x98] sm:$0xff]  ;;  %4638 = vmatpush.msrb.mxu0 %v5982_v59  ;;  %s9624_s21 = scalar_lea.vmem %s9765_s9, %s5619_s17 }
 0x466   : > { %4072 = vst.msk [vmem:[#allocation4 + $0x30] sm:$0xff] %vm4064_vm14, %v8588_v30  ;;  %4486 = vmatpush.msrb.mxu3 %v5955_v38  ;;  %v9873_v38 = vld [vmem:[#allocation6_spill] sm:$0xff]  ;;  %v3723_v59 = vld [vmem:[#allocation3 + $0x130] sm:$0xff] }
 0x467   : > { %v8616_v3 = vpop.f32.mrf.mxu0  ;;  %9871 = vst [vmem:[#allocation27_spill] sm:$0xff] %v8618_v17  ;;  %4238 = vmatpush.msrb.mxu2 %v5912_v5  ;;  %v3285_v5 = vadd.f32 %v8407_v42, %v8409_v34  ;;  %v4022_v17 = vadd.s32 %v8653_v13, %v9873_v38  ;;  %v5980_v38 = vld [vmem:[%s9763_s7 + $0xe0] sm:$0xff] }
 0x468   : > { %9870 = vst [vmem:[#allocation25_spill] sm:$0xff] %v8616_v3 }
 0x469   : > { %4074 = vst.msk [vmem:[#allocation4 + $0x40] sm:$0xff] %vm4064_vm14, %v8588_v30  ;;  %3672 = vmatmul.f32.gmra.mxu3 %v3589_v25  ;;  %v3034_v25 = vadd.f32 %v8392_v2, %v8390_v26  ;;  %v5954_v26 = vld [vmem:[%s9763_s7 + $0x90] sm:$0xff]  ;;  %vm4024_vm15 = vcmp.ge.s32.totalorder %v4022_v17, 0  ;;  %vm4026_vm0 = vcmp.lt.s32.totalorder %v4022_v17, 16  ;;  %v6001_v17 = vld [vmem:[%s9763_s7 + $0x108] sm:$0xff] }
 0x46a   : > { %4075 = vst.msk [vmem:[#allocation4 + $0x48] sm:$0xff] %vm4064_vm14, %v8588_v30  ;;  %3803 = vmatmul.f32.gmra.mxu0 %v3722_v50  ;;  %v6007_v50 = vld [vmem:[%s9763_s7 + $0x138] sm:$0xff]  ;;  %v6006_v2 = vld [vmem:[%s9763_s7 + $0x130] sm:$0xff]  ;;  %4487 = vmatpush.msrb.mxu3 %v5954_v26  ;;  %v5952_v26 = vld [vmem:[%s9763_s7 + $0x80] sm:$0xff] }
 0x46b   : > { %4076 = vst.msk [vmem:[#allocation4 + $0x50] sm:$0xff] %vm4064_vm14, %v8588_v30  ;;  %4791 = vmatpush.msrb.mxu1 %v6007_v50  ;;  %v8678_v50 = vpop.f32.mrf.mxu2  ;;  %vm8738_vm1 = vmand %vm4024_vm15, %vm4026_vm0 }
 0x46c   : > { %4078 = vst.msk [vmem:[#allocation4 + $0x60] sm:$0xff] %vm4064_vm14, %v8588_v30  ;;  %v3147_v3 = vpop.f32.mrf.mxu3 }
 0x46d   : > { %4079 = vst.msk [vmem:[#allocation4 + $0x68] sm:$0xff] %vm4064_vm14, %v8588_v30  ;;  %v8674_v34 = vadd.f32 %v3147_v3, %v3034_v25  ;;  %4792 = vmatpush.msrb.mxu1 %v6006_v2  ;;  %v5981_v3 = vld [vmem:[%s9763_s7 + $0xe8] sm:$0xff]  ;;  %v3419_v2 = vadd.f32 %v8288_v4, %v3285_v5  ;;  %v6004_v4 = vld [vmem:[%s9763_s7 + $0x120] sm:$0xff]  ;;  %v4149_v5 = vld [vmem:[%s9763_s7 + $0x38] sm:$0xff] }
 0x46e   : > { %4080 = vst.msk [vmem:[#allocation4 + $0x70] sm:$0xff] %vm4064_vm14, %v8588_v30  ;;  %v6005_v25 = vld [vmem:[%s9763_s7 + $0x128] sm:$0xff]  ;;  %4639 = vmatpush.msrb.mxu0 %v5981_v3  ;;  %4344 = vmatpush.msra.mxu2 %v4149_v5  ;;  %v6003_v3 = vld [vmem:[%s9763_s7 + $0x118] sm:$0xff] }
 0x46f   : > { %4082 = vst.msk [vmem:[#allocation4 + $0x80] sm:$0xff] %vm4064_vm14, %v8588_v30  ;;  %v8672_v42 = vpop.f32.mrf.mxu0  ;;  %4793 = vmatpush.msrb.mxu1 %v6005_v25  ;;  %v3553_v25 = vadd.f32 %v8517_v52, %v3419_v2  ;;  %v5977_v5 = vld [vmem:[%s9763_s7 + $0xc8] sm:$0xff] }
 0x470   : > { %9872 = vst [vmem:[#allocation28_spill] sm:$0xff] %v8672_v42  ;;  %v5953_v42 = vld [vmem:[%s9763_s7 + $0x88] sm:$0xff]  ;;  %4640 = vmatpush.msrb.mxu0 %v5980_v38 }
 0x471   : > { %4083 = vst.msk [vmem:[#allocation4 + $0x88] sm:$0xff] %vm4064_vm14, %v8588_v30  ;;  %4488 = vmatpush.msrb.mxu3 %v5953_v42  ;;  %v3286_v42 = vadd.f32 %v8419_v29, %v8421_v37  ;;  %4794 = vmatpush.msrb.mxu1 %v6004_v4  ;;  %v8726_v29 = vpop.f32.mrf.mxu1 }
 0x472   : > { %4084 = vst.msk [vmem:[#allocation4 + $0x90] sm:$0xff] %vm4064_vm14, %v8588_v30  ;;  %3806 = vmatmul.f32.gmra.mxu0 %v3723_v59  ;;  %3675 = vmatmul.f32.gmra.mxu3 %v8434_v46  ;;  %v5979_v46 = vld [vmem:[%s9763_s7 + $0xd8] sm:$0xff]  ;;  %v5978_v59 = vld [vmem:[%s9763_s7 + $0xd0] sm:$0xff] }
 0x473   : > { %4086 = vst.msk [vmem:[#allocation4 + $0xa0] sm:$0xff] %vm4064_vm14, %v8588_v30  ;;  %4489 = vmatpush.msrb.mxu3 %v5952_v26  ;;  %4641 = vmatpush.msrb.mxu0 %v5979_v46  ;;  %v6002_v26 = vld [vmem:[%s9763_s7 + $0x110] sm:$0xff]  ;;  %v3420_v4 = vadd.f32 %v8303_v10, %v3286_v42  ;;  %v3724_v46 = vld [vmem:[#allocation3 + $0x148] sm:$0xff]  ;;  %v8760_v10 = vpop.f32.mrf.mxu2  ;;  %v8765_v42 = vsel %vm8738_vm1, 1.0, %v8588_v30 }
 0x474   : > { %4087 = vst.msk [vmem:[#allocation4 + $0xa8] sm:$0xff] %vm4064_vm14, %v8588_v30  ;;  %v3628_v37 = vpop.f32.mrf.mxu3  ;;  %4795 = vmatpush.msrb.mxu1 %v6003_v3  ;;  %v8756_v3 = vld [vmem:[%s9762_s6] ss:$0 sm:$0xff] }
 0x475   : > { %4088 = vst.msk [vmem:[#allocation4 + $0xb0] sm:$0xff] %vm4064_vm14, %v8588_v30  ;;  %v3688_v2 = vadd.f32 %v3628_v37, %v3553_v25  ;;  %4642 = vmatpush.msrb.mxu0 %v5978_v59  ;;  %v5976_v37 = vld [vmem:[%s9763_s7 + $0xc0] sm:$0xff] }
 0x476   : > { %4090 = vst.msk [vmem:[#allocation4 + $0xc0] sm:$0xff] %vm4064_vm14, %v8588_v30  ;;  %4796 = vmatpush.msrb.mxu1 %v6002_v26  ;;  %v6000_v59 = vld [vmem:[%s9763_s7 + $0x100] sm:$0xff] }
 0x477   : > { %4091 = vst.msk [vmem:[#allocation4 + $0xc8] sm:$0xff] %vm4064_vm14, %v8588_v30  ;;  %v3762_v52 = vpop.f32.mrf.mxu0  ;;  %4643 = vmatpush.msrb.mxu0 %v5977_v5  ;;  %v4034_v5 = vperm.slane %v8765_v42, 0 }
 0x478   : > { %4092 = vst.msk [vmem:[#allocation4 + $0xd0] sm:$0xff] %vm4064_vm14, %v8588_v30  ;;  %v3822_v25 = vadd.f32 %v3762_v52, %v3688_v2  ;;  %4797 = vmatpush.msrb.mxu1 %v6001_v17  ;;  %v3554_v52 = vadd.f32 %v8529_v41, %v3420_v4  ;;  %v3287_v2 = vadd.f32 %v8430_v56, %v8432_v21  ;;  %v3725_v17 = vld [vmem:[#allocation3 + $0x150] sm:$0xff] }
 0x479   : > { %4094 = vst.msk [vmem:[#allocation4 + $0xe0] sm:$0xff] %vm4064_vm14, %v8588_v30  ;;  %4644 = vmatpush.msrb.mxu0 %v5976_v37  ;;  %v8792_v56 = vpop.f32.mrf.mxu1  ;;  %v3592_v37 = vld [vmem:[#allocation3 + $0x167] sm:$0xff] }
 0x47a   : > { %4095 = vst.msk [vmem:[#allocation4 + $0xe8] sm:$0xff] %vm4064_vm14, %v8588_v30  ;;  %3809 = vmatmul.f32.gmra.mxu0 %v3724_v46  ;;  %v3956_v26 = vadd.f32 %v8564_v24, %v3822_v25  ;;  %3678 = vmatmul.f32.gmra.mxu3 %v8447_v33  ;;  %v3421_v25 = vadd.f32 %v8321_v19, %v3287_v2 }
 0x47b   : > { %4096 = vst.msk [vmem:[#allocation4 + $0xf0] sm:$0xff] %vm4064_vm14, %v8588_v30  ;;  %4798 = vmatpush.msrb.mxu1 %v6000_v59  ;;  %v3288_v19 = vadd.f32 %v8443_v45, %v8445_v8  ;;  %v3726_v8 = vld [vmem:[#allocation3 + $0x168] sm:$0xff] }
 0x47c   : > { %4098 = vst.msk [vmem:[#allocation4 + $0x100] sm:$0xff] %vm4064_vm14, %v8588_v30  ;;  %v3980_v38 = vadd.f32 %v8756_v3, %v3956_v26  ;;  %v3631_v33 = vpop.f32.mrf.mxu3  ;;  %v4148_v26 = vld [vmem:[%s9763_s7 + $0x30] sm:$0xff] }
 0x47d   : > { %4099 = vst.msk [vmem:[#allocation4 + $0x108] sm:$0xff] %vm4064_vm14, %v8588_v30  ;;  %v3689_v4 = vadd.f32 %v3631_v33, %v3554_v52  ;;  %v8806_v52 = vpop.f32.mrf.mxu2  ;;  %4345 = vmatpush.msra.mxu2 %v4148_v26 }
 0x47e   : > { %4100 = vst.msk [vmem:[#allocation4 + $0x110] sm:$0xff] %vm4064_vm14, %v8588_v30  ;;  %v4000_v24 = vmax.f32 %v3980_v38, 0.0  ;;  %v3555_v38 = vadd.f32 %v8543_v23, %v3421_v25  ;;  %v3422_v23 = vadd.f32 %v8336_v6, %v3288_v19  ;;  %v3289_v6 = vadd.f32 %v8455_v1, %v8457_v9 }
 0x47f   : > { %4102 = vst.msk [vmem:[#allocation4 + $0x120] sm:$0xff] %vm4064_vm14, %v8588_v30  ;;  %v3765_v41 = vpop.f32.mrf.mxu0 }
 0x480   : > { %4103 = vst.msk [vmem:[#allocation4 + $0x128] sm:$0xff] %vm4064_vm14, %v8588_v30  ;;  %v4044_v21 = vmul.f32 %v4034_v5, %v4000_v24  ;;  %v3823_v46 = vadd.f32 %v3765_v41, %v3689_v4 }
 0x481   : > { %4104 = vst.msk [vmem:[#allocation4 + $0x130] sm:$0xff] %vm4064_vm14, %v8588_v30 }
 0x482   : > { %4069 = vst.msk [vmem:[#allocation4 + $0x18] sm:$0x1] %vm4068_vm2, %v8588_v30  ;;  %3812 = vmatmul.f32.gmra.mxu0 %v3725_v17  ;;  %v3957_v59 = vadd.f32 %v8586_v12, %v3823_v46  ;;  %3681 = vmatmul.f32.gmra.mxu3 %v3592_v37  ;;  %v3593_v17 = vld [vmem:[#allocation3 + $0x16f] sm:$0xff]  ;;  %v4035_v37 = vperm.slane %v8765_v42, 1 }
 0x483   : > { %4073 = vst.msk [vmem:[#allocation4 + $0x38] sm:$0x1] %vm4068_vm2, %v8588_v30 }
 0x484   : > { %4077 = vst.msk [vmem:[#allocation4 + $0x58] sm:$0x1] %vm4068_vm2, %v8588_v30  ;;  %v3981_v2 = vadd.f32 %v8756_v3, %v3957_v59  ;;  %v3634_v12 = vpop.f32.mrf.mxu3  ;;  %v3556_v59 = vadd.f32 %v8553_v47, %v3422_v23  ;;  %v4147_v47 = vld [vmem:[%s9763_s7 + $0x28] sm:$0xff] }
 0x485   : > { %4106 = vst.msk [vmem:[#allocation4 + $0x8] sm:$0xff] %vm4064_vm14, %v4044_v21  ;;  %v3690_v41 = vadd.f32 %v3634_v12, %v3555_v38  ;;  %v8825_v21 = vpop.f32.mrf.mxu1  ;;  %v8837_v26 = vpop.f32.mrf.mxu2  ;;  %4346 = vmatpush.msra.mxu2 %v4147_v47 }
 0x486   : > { %4081 = vst.msk [vmem:[#allocation4 + $0x78] sm:$0x1] %vm4068_vm2, %v8588_v30  ;;  %v4001_v33 = vmax.f32 %v3981_v2, 0.0 }
 0x487   : > { %4085 = vst.msk [vmem:[#allocation4 + $0x98] sm:$0x1] %vm4068_vm2, %v8588_v30  ;;  %v3768_v24 = vpop.f32.mrf.mxu0 }
 0x488   : > { %4089 = vst.msk [vmem:[#allocation4 + $0xb8] sm:$0x1] %vm4068_vm2, %v8588_v30  ;;  %v4045_v45 = vmul.f32 %v4034_v5, %v4001_v33  ;;  %v3824_v4 = vadd.f32 %v3768_v24, %v3690_v41  ;;  %v3423_v24 = vadd.f32 %v8355_v60, %v3289_v6  ;;  %v3290_v60 = vadd.f32 %v8464_v32, %v8466_v54 }
 0x489   : > { %4093 = vst.msk [vmem:[#allocation4 + $0xd8] sm:$0x1] %vm4068_vm2, %v8588_v30 }
 0x48a   : > { %4097 = vst.msk [vmem:[#allocation4 + $0xf8] sm:$0x1] %vm4068_vm2, %v8588_v30  ;;  %3815 = vmatmul.f32.gmra.mxu0 %v3726_v8  ;;  %v3958_v25 = vadd.f32 %v8643_v43, %v3824_v4  ;;  %3684 = vmatmul.f32.gmra.mxu3 %v3593_v17  ;;  %v3727_v43 = vld [vmem:[#allocation3 + $0x170] sm:$0xff]  ;;  %v3557_v4 = vadd.f32 %v8566_v58, %v3423_v24  ;;  %v4036_v58 = vperm.slane %v8765_v42, 2 }
 0x48b   : > { %4101 = vst.msk [vmem:[#allocation4 + $0x118] sm:$0x1] %vm4068_vm2, %v8588_v30 }
 0x48c   : > { %v4150_v46 = vld [vmem:[#allocation4 + $0x8] sm:$0xff]  ;;  %4105 = vst.msk [vmem:[#allocation4 + $0x138] sm:$0x1] %vm4068_vm2, %v8588_v30  ;;  %v3982_v5 = vadd.f32 %v8756_v3, %v3958_v25  ;;  %v3637_v19 = vpop.f32.mrf.mxu3 }
 0x48d   : > { %4107 = vst.msk [vmem:[#allocation4 + $0x10] sm:$0xff] %vm4064_vm14, %v4045_v45  ;;  %5920 = vmatmul.msk.f32.vlgmr.msrb.gmra.mxu2 %vm4064_vm14, %v4150_v46  ;;  %v3691_v38 = vadd.f32 %v3637_v19, %v3556_v59  ;;  %v3914_v45 = vpop.f32.mrf.mxu1  ;;  %v8851_v25 = vpop.f32.mrf.mxu2  ;;  %v3424_v59 = vadd.f32 %v8370_v44, %v3290_v60  ;;  %v3291_v44 = vadd.f32 %v8471_v28, %v8473_v39 }
 0x48e   : > { %v4002_v30 = vmax.f32 %v3982_v5, 0.0 }
 0x48f   : > { %v3771_v2 = vpop.f32.mrf.mxu0 }
 0x490   : > { %v4046_v12 = vmul.f32 %v4035_v37, %v4002_v30  ;;  %v3825_v33 = vadd.f32 %v3771_v2, %v3691_v38 }
 0x492   : > { %3818 = vmatmul.f32.gmra.mxu0 %v3727_v43  ;;  %4108 = vst.msk [vmem:[#allocation4 + $0x28] sm:$0xff] %vm4064_vm14, %v4046_v12  ;;  %v3959_v9 = vadd.f32 %v8726_v29, %v3825_v33 }
 0x494   : > { %v4151_v41 = vld [vmem:[#allocation4 + $0x10] sm:$0xff]  ;;  %v3983_v8 = vadd.f32 %v8756_v3, %v3959_v9  ;;  %v3640_v23 = vpop.f32.mrf.mxu3 }
 0x495   : > { %v4401_v1 = vld [vmem:[#allocation4 + $0x9] sm:$0xff]  ;;  %5921 = vmatmul.msk.f32.gmra.mxu2 %vm4064_vm14, %v4151_v41  ;;  %v3692_v46 = vadd.f32 %v3640_v23, %v3557_v4  ;;  %v4402_v30 = vld [vmem:[#allocation4 + $0x11] sm:$0xff]  ;;  %v3917_v38 = vpop.f32.mrf.mxu1  ;;  %v8869_v9 = vpop.f32.mrf.mxu2 }
 0x496   : > { %5960 = vmatmul.msk.f32.vlgmr.msrb.gmra.mxu3 %vm4064_vm14, %v4401_v1  ;;  %v4003_v17 = vmax.f32 %v3983_v8, 0.0  ;;  %v3425_v1 = vadd.f32 %v8388_v51, %v3291_v44  ;;  %v3292_v51 = vadd.f32 %v8480_v11, %v8482_v53 }
 0x497   : > { %v3774_v29 = vpop.f32.mrf.mxu0 }
 0x498   : > { %v4047_v6 = vmul.f32 %v4035_v37, %v4003_v17  ;;  %v3826_v5 = vadd.f32 %v3774_v29, %v3692_v46  ;;  %v3558_v37 = vadd.f32 %v8606_v0, %v3424_v59  ;;  %v4146_v0 = vld [vmem:[%s9763_s7 + $0x20] sm:$0xff]  ;;  %v3426_v59 = vadd.f32 %v8405_v20, %v3292_v51 }
 0x499   : > { %v4152_v19 = vld [vmem:[#allocation4 + $0x28] sm:$0xff]  ;;  %4347 = vmatpush.msra.mxu2 %v4146_v0  ;;  %v3293_v20 = vadd.f32 %v8489_v49, %v8491_v62 }
 0x49a   : > { %v8854_v2 = vld [vmem:[#allocation4 + $0x27] sm:$0xff]  ;;  %4109 = vst.msk [vmem:[#allocation4 + $0x30] sm:$0xff] %vm4064_vm14, %v4047_v6  ;;  %v3960_v32 = vadd.f32 %v8792_v56, %v3826_v5  ;;  %6008 = vmatmul.msk.f32.vlgmr.msrb.gmra.mxu1 %vm4064_vm14, %v4152_v19  ;;  %v3560_v44 = vadd.f32 %v8760_v10, %v3426_v59  ;;  %v4145_v10 = vld [vmem:[%s9763_s7 + $0x18] sm:$0xff] }
 0x49b   : > { %5984 = vmatmul.msk.f32.vlgmr.msrb.gmra.mxu0 %vm4064_vm14, %v8854_v2  ;;  %4348 = vmatpush.msra.mxu2 %v4145_v10 }
 0x49c   : > { %v3984_v54 = vadd.f32 %v8756_v3, %v3960_v32  ;;  %v3643_v56 = vpop.f32.mrf.mxu3 }
 0x49d   : > { %5922 = vmatmul.msk.f32.gmra.mxu2 %vm4064_vm14, %v4152_v19  ;;  %v3693_v33 = vadd.f32 %v3643_v56, %v3558_v37  ;;  %v3920_v46 = vpop.f32.mrf.mxu1  ;;  %v8896_v53 = vpop.f32.mrf.mxu2 }
 0x49e   : > { %5961 = vmatmul.msk.f32.gmra.mxu3 %vm4064_vm14, %v4402_v30  ;;  %v4004_v12 = vmax.f32 %v3984_v54, 0.0 }
 0x49f   : > { %v3777_v43 = vpop.f32.mrf.mxu0 }
 0x4a0   : > { %v4048_v24 = vmul.f32 %v4036_v58, %v4004_v12  ;;  %v3827_v41 = vadd.f32 %v3777_v43, %v3693_v33  ;;  %v9876_v33 = vld [vmem:[#allocation12_spill] sm:$0xff] }
 0x4a1   : > { %v4153_v47 = vld [vmem:[#allocation4 + $0x30] sm:$0xff] }
 0x4a2   : > { %v4403_v60 = vld [vmem:[#allocation4 + $0x29] sm:$0xff]  ;;  %4110 = vst.msk [vmem:[#allocation4 + $0x48] sm:$0xff] %vm4064_vm14, %v4048_v24  ;;  %v3961_v39 = vadd.f32 %v8825_v21, %v3827_v41  ;;  %6009 = vmatmul.msk.f32.gmra.mxu1 %vm4064_vm14, %v4153_v47  ;;  %v3559_v21 = vadd.f32 %v8678_v50, %v3425_v1  ;;  %v4404_v30 = vld [vmem:[#allocation4 + $0x31] sm:$0xff]  ;;  %v3427_v24 = vadd.f32 %v9876_v33, %v3293_v20 }
 0x4a3   : > { %v8871_v28 = vld [vmem:[#allocation4 + $0x2f] sm:$0xff] }
 0x4a4   : > { %5985 = vmatmul.msk.f32.gmra.mxu0 %vm4064_vm14, %v8871_v28  ;;  %v3985_v8 = vadd.f32 %v8756_v3, %v3961_v39  ;;  %v3646_v4 = vpop.f32.mrf.mxu3  ;;  %v3561_v39 = vadd.f32 %v8806_v52, %v3427_v24 }
 0x4a5   : > { %5923 = vmatmul.msk.f32.gmra.mxu2 %vm4064_vm14, %v4153_v47  ;;  %v3694_v29 = vadd.f32 %v3646_v4, %v3559_v21  ;;  %v3923_v41 = vpop.f32.mrf.mxu1  ;;  %v8930_v0 = vpop.f32.mrf.mxu2 }
 0x4a6   : > { %5962 = vmatmul.msk.f32.gmra.mxu3 %vm4064_vm14, %v4403_v60  ;;  %v4005_v23 = vmax.f32 %v3985_v8, 0.0  ;;  %v3294_v60 = vadd.f32 %v8497_v48, %v8499_v27 }
 0x4a7   : > { %v3780_v17 = vpop.f32.mrf.mxu0 }
 0x4a8   : > { %v4049_v6 = vmul.f32 %v4036_v58, %v4005_v23  ;;  %v3828_v5 = vadd.f32 %v3780_v17, %v3694_v29  ;;  %v9877_v29 = vld [vmem:[#allocation13_spill] sm:$0xff] }
 0x4a9   : > { %v8888_v19 = vld [vmem:[#allocation4 + $0x48] sm:$0xff] }
 0x4aa   : > { %v8890_v32 = vld [vmem:[#allocation4 + $0x47] sm:$0xff]  ;;  %4111 = vst.msk [vmem:[#allocation4 + $0x50] sm:$0xff] %vm4064_vm14, %v4049_v6  ;;  %v3962_v11 = vadd.f32 %v3914_v45, %v3828_v5  ;;  %6010 = vmatmul.msk.f32.gmra.mxu1 %vm4064_vm14, %v8888_v19  ;;  %v4037_v45 = vperm.slane %v8765_v42, 3  ;;  %v3428_v6 = vadd.f32 %v9877_v29, %v3294_v60 }
 0x4ac   : > { %5986 = vmatmul.msk.f32.gmra.mxu0 %vm4064_vm14, %v8890_v32  ;;  %v3986_v50 = vadd.f32 %v8756_v3, %v3962_v11  ;;  %v3649_v54 = vpop.f32.mrf.mxu3  ;;  %v3562_v20 = vadd.f32 %v8837_v26, %v3428_v6  ;;  %v4144_v26 = vld [vmem:[%s9763_s7 + $0x10] sm:$0xff] }
 0x4ad   : > { %5924 = vmatmul.msk.f32.gmra.mxu2 %vm4064_vm14, %v8888_v19  ;;  %v3695_v56 = vadd.f32 %v3649_v54, %v3560_v44  ;;  %v3926_v52 = vpop.f32.mrf.mxu1 }
 0x4ae   : > { %5963 = vmatmul.msk.f32.gmra.mxu3 %vm4064_vm14, %v4404_v30  ;;  %v4006_v58 = vmax.f32 %v3986_v50, 0.0  ;;  %v3295_v30 = vadd.f32 %v8505_v15, %v8507_v16  ;;  %4349 = vmatpush.msra.mxu2 %v4144_v26 }
 0x4af   : > { %v3783_v37 = vpop.f32.mrf.mxu0 }
 0x4b0   : > { %v4050_v12 = vmul.f32 %v4037_v45, %v4006_v58  ;;  %v3829_v43 = vadd.f32 %v3783_v37, %v3695_v56  ;;  %v8953_v58 = vpop.f32.mrf.mxu2 }
 0x4b1   : > { %v8908_v1 = vld [vmem:[#allocation4 + $0x50] sm:$0xff] }
 0x4b2   : > { %v8910_v47 = vld [vmem:[#allocation4 + $0x49] sm:$0xff]  ;;  %4112 = vst.msk [vmem:[#allocation4 + $0x68] sm:$0xff] %vm4064_vm14, %v4050_v12  ;;  %v3963_v62 = vadd.f32 %v3917_v38, %v3829_v43  ;;  %6011 = vmatmul.msk.f32.gmra.mxu1 %vm4064_vm14, %v8908_v1  ;;  %v8935_v59 = vld [vmem:[#allocation4 + $0x51] sm:$0xff] }
 0x4b3   : > { %v8912_v49 = vld [vmem:[#allocation4 + $0x4f] sm:$0xff] }
 0x4b4   : > { %5987 = vmatmul.msk.f32.gmra.mxu0 %vm4064_vm14, %v8912_v49  ;;  %v3987_v38 = vadd.f32 %v8756_v3, %v3963_v62  ;;  %v3652_v51 = vpop.f32.mrf.mxu3  ;;  %v9878_v12 = vld [vmem:[#allocation15_spill] sm:$0xff]  ;;  %v3296_v62 = vadd.f32 %v8511_v14, %v8513_v18 }
 0x4b5   : > { %5925 = vmatmul.msk.f32.gmra.mxu2 %vm4064_vm14, %v8908_v1  ;;  %v3696_v4 = vadd.f32 %v3652_v51, %v3561_v39  ;;  %v3429_v43 = vadd.f32 %v9878_v12, %v3295_v30  ;;  %v3929_v60 = vpop.f32.mrf.mxu1 }
 0x4b6   : > { %5964 = vmatmul.msk.f32.gmra.mxu3 %vm4064_vm14, %v8910_v47  ;;  %v4007_v8 = vmax.f32 %v3987_v38, 0.0 }
 0x4b7   : > { %v3786_v21 = vpop.f32.mrf.mxu0  ;;  %v3563_v10 = vadd.f32 %v8851_v25, %v3429_v43 }
 0x4b8   : > { %v4051_v23 = vmul.f32 %v4037_v45, %v4007_v8  ;;  %v3830_v17 = vadd.f32 %v3786_v21, %v3696_v4 }
 0x4b9   : > { %v8933_v5 = vld [vmem:[#allocation4 + $0x68] sm:$0xff] }
 0x4ba   : > { %v8937_v48 = vld [vmem:[#allocation4 + $0x67] sm:$0xff]  ;;  %4113 = vst.msk [vmem:[#allocation4 + $0x70] sm:$0xff] %vm4064_vm14, %v4051_v23  ;;  %v3964_v27 = vadd.f32 %v3920_v46, %v3830_v17  ;;  %6012 = vmatmul.msk.f32.gmra.mxu1 %vm4064_vm14, %v8933_v5  ;;  %v4038_v46 = vperm.slane %v8765_v42, 4  ;;  %v3430_v23 = vadd.f32 %v8462_v22, %v3296_v62  ;;  %v8979_v17 = vpop.f32.mrf.mxu2  ;;  %v3297_v22 = vadd.f32 %v8521_v55, %v8523_v7 }
 0x4bc   : > { %5988 = vmatmul.msk.f32.gmra.mxu0 %vm4064_vm14, %v8937_v48  ;;  %v3988_v11 = vadd.f32 %v8756_v3, %v3964_v27  ;;  %v3655_v50 = vpop.f32.mrf.mxu3  ;;  %v4039_v27 = vperm.slane %v8765_v42, 5 }
 0x4bd   : > { %5926 = vmatmul.msk.f32.gmra.mxu2 %vm4064_vm14, %v8933_v5  ;;  %v3697_v54 = vadd.f32 %v3655_v50, %v3562_v20  ;;  %v3932_v50 = vpop.f32.mrf.mxu1 }
 0x4be   : > { %5965 = vmatmul.msk.f32.gmra.mxu3 %vm4064_vm14, %v8935_v59  ;;  %v4008_v45 = vmax.f32 %v3988_v11, 0.0 }
 0x4bf   : > { %v3789_v44 = vpop.f32.mrf.mxu0 }
 0x4c0   : > { %v4052_v37 = vmul.f32 %v4038_v46, %v4008_v45  ;;  %v3831_v56 = vadd.f32 %v3789_v44, %v3697_v54  ;;  %v9879_v54 = vld [vmem:[#allocation14_spill] sm:$0xff] }
 0x4c1   : > { %v8956_v33 = vld [vmem:[#allocation4 + $0x70] sm:$0xff] }
 0x4c2   : > { %v8958_v24 = vld [vmem:[#allocation4 + $0x69] sm:$0xff]  ;;  %4114 = vst.msk [vmem:[#allocation4 + $0x88] sm:$0xff] %vm4064_vm14, %v4052_v37  ;;  %v3965_v15 = vadd.f32 %v3923_v41, %v3831_v56  ;;  %6013 = vmatmul.msk.f32.gmra.mxu1 %vm4064_vm14, %v8956_v33  ;;  %v8983_v6 = vld [vmem:[#allocation4 + $0x71] sm:$0xff]  ;;  %v3431_v37 = vadd.f32 %v9879_v54, %v3297_v22  ;;  %v9016_v43 = vpop.f32.mrf.mxu2 }
 0x4c3   : > { %v8960_v16 = vld [vmem:[#allocation4 + $0x6f] sm:$0xff]  ;;  %v9882_v54 = vld [vmem:[#allocation17_spill] sm:$0xff] }
 0x4c4   : > { %5989 = vmatmul.msk.f32.gmra.mxu0 %vm4064_vm14, %v8960_v16  ;;  %v3989_v41 = vadd.f32 %v8756_v3, %v3965_v15  ;;  %v3658_v38 = vpop.f32.mrf.mxu3  ;;  %v3298_v15 = vadd.f32 %v8531_v31, %v8533_v61  ;;  %v3565_v62 = vadd.f32 %v8896_v53, %v3431_v37  ;;  %v9881_v61 = vld [vmem:[#allocation22_spill] sm:$0xff] }
 0x4c5   : > { %5927 = vmatmul.msk.f32.gmra.mxu2 %vm4064_vm14, %v8956_v33  ;;  %v3698_v8 = vadd.f32 %v3658_v38, %v3563_v10  ;;  %v3299_v53 = vadd.f32 %v9881_v61, %v8541_v40  ;;  %v9883_v61 = vld [vmem:[#allocation18_spill] sm:$0xff] }
 0x4c6   : > { %5966 = vmatmul.msk.f32.gmra.mxu3 %vm4064_vm14, %v8958_v24  ;;  %v4009_v39 = vmax.f32 %v3989_v41, 0.0 }
 0x4c7   : > { %v3792_v51 = vpop.f32.mrf.mxu0  ;;  %v3433_v37 = vadd.f32 %v9882_v54, %v3299_v53  ;;  %v4041_v54 = vperm.slane %v8765_v42, 7 }
 0x4c8   : > { %v4053_v21 = vmul.f32 %v4038_v46, %v4009_v39  ;;  %v3832_v4 = vadd.f32 %v3792_v51, %v3698_v8  ;;  %v9880_v8 = vld [vmem:[#allocation16_spill] sm:$0xff] }
 0x4c9   : > { %v8981_v29 = vld [vmem:[#allocation4 + $0x88] sm:$0xff] }
 0x4ca   : > { %v8985_v14 = vld [vmem:[#allocation4 + $0x87] sm:$0xff]  ;;  %4115 = vst.msk [vmem:[#allocation4 + $0x90] sm:$0xff] %vm4064_vm14, %v4053_v21  ;;  %v3966_v18 = vadd.f32 %v3926_v52, %v3832_v4  ;;  %6014 = vmatmul.msk.f32.gmra.mxu1 %vm4064_vm14, %v8981_v29  ;;  %v3564_v52 = vadd.f32 %v8869_v9, %v3430_v23  ;;  %v3432_v21 = vadd.f32 %v9880_v8, %v3298_v15  ;;  %v3935_v4 = vpop.f32.mrf.mxu1 }
 0x4cb   : > { %v4143_v9 = vld [vmem:[%s9763_s7 + $0x8] sm:$0xff] }
 0x4cc   : > { %5990 = vmatmul.msk.f32.gmra.mxu0 %vm4064_vm14, %v8985_v14  ;;  %v3990_v25 = vadd.f32 %v8756_v3, %v3966_v18  ;;  %v3661_v30 = vpop.f32.mrf.mxu3  ;;  %4350 = vmatpush.msra.mxu2 %v4143_v9 }
 0x4cd   : > { %5928 = vmatmul.msk.f32.gmra.mxu2 %vm4064_vm14, %v8981_v29  ;;  %v3699_v20 = vadd.f32 %v3661_v30, %v3564_v52  ;;  %v3566_v52 = vadd.f32 %v8930_v0, %v3432_v21  ;;  %v9047_v30 = vpop.f32.mrf.mxu2  ;;  %v4142_v0 = vld [vmem:[%s9763_s7] sm:$0xff] }
 0x4ce   : > { %5967 = vmatmul.msk.f32.gmra.mxu3 %vm4064_vm14, %v8983_v6  ;;  %v4010_v11 = vmax.f32 %v3990_v25, 0.0  ;;  %4351 = vmatpush.msra.mxu2 %v4142_v0 }
 0x4cf   : > { %v3795_v46 = vpop.f32.mrf.mxu0 }
 0x4d0   : > { %v4054_v45 = vmul.f32 %v4039_v27, %v4010_v11  ;;  %v3833_v44 = vadd.f32 %v3795_v46, %v3699_v20 }
 0x4d1   : > { %v9002_v56 = vld [vmem:[#allocation4 + $0x90] sm:$0xff] }
 0x4d2   : > { %v9004_v12 = vld [vmem:[#allocation4 + $0x89] sm:$0xff]  ;;  %4116 = vst.msk [vmem:[#allocation4 + $0xa8] sm:$0xff] %vm4064_vm14, %v4054_v45  ;;  %v3967_v7 = vadd.f32 %v3929_v60, %v3833_v44  ;;  %6015 = vmatmul.msk.f32.gmra.mxu1 %vm4064_vm14, %v9002_v56  ;;  %v9029_v18 = vld [vmem:[#allocation4 + $0x91] sm:$0xff] }
 0x4d3   : > { %v9006_v55 = vld [vmem:[#allocation4 + $0x8f] sm:$0xff] }
 0x4d4   : > { %5991 = vmatmul.msk.f32.gmra.mxu0 %vm4064_vm14, %v9006_v55  ;;  %v3991_v26 = vadd.f32 %v8756_v3, %v3967_v7  ;;  %v3664_v41 = vpop.f32.mrf.mxu3 }
 0x4d5   : > { %5929 = vmatmul.msk.f32.gmra.mxu2 %vm4064_vm14, %v9002_v56  ;;  %v3700_v38 = vadd.f32 %v3664_v41, %v3565_v62  ;;  %v6055_v62 = vld [vmem:[%s9763_s7 + $0x1b8] sm:$0xff]  ;;  %v3300_v41 = vadd.f32 %v8549_v63, %v8551_v35  ;;  %v6053_v63 = vld [vmem:[%s9763_s7 + $0x1a8] sm:$0xff] }
 0x4d6   : > { %5968 = vmatmul.msk.f32.gmra.mxu3 %vm4064_vm14, %v9004_v12  ;;  %v4011_v10 = vmax.f32 %v3991_v26, 0.0  ;;  %v3938_v26 = vpop.f32.mrf.mxu1 }
 0x4d7   : > { %v3798_v60 = vpop.f32.mrf.mxu0  ;;  %5100 = vmatpush.msra.mxu3 %v6055_v62  ;;  %v3434_v53 = vadd.f32 %v9883_v61, %v3300_v41  ;;  %v6078_v62 = vld [vmem:[%s9763_s7 + $0x1f0] sm:$0xff]  ;;  %v9884_v41 = vld [vmem:[#allocation7_spill] sm:$0xff] }
 0x4d8   : > { %v4055_v39 = vmul.f32 %v4039_v27, %v4011_v10  ;;  %v3834_v51 = vadd.f32 %v3798_v60, %v3700_v38  ;;  %v4040_v27 = vperm.slane %v8765_v42, 6  ;;  %v3567_v60 = vadd.f32 %v8953_v58, %v3433_v37 }
 0x4d9   : > { %v9027_v23 = vld [vmem:[#allocation4 + $0xa8] sm:$0xff]  ;;  %v3568_v37 = vadd.f32 %v8979_v17, %v3434_v53 }
 0x4da   : > { %v9031_v22 = vld [vmem:[#allocation4 + $0xa7] sm:$0xff]  ;;  %4117 = vst.msk [vmem:[#allocation4 + $0xb0] sm:$0xff] %vm4064_vm14, %v4055_v39  ;;  %v3968_v31 = vadd.f32 %v3932_v50, %v3834_v51  ;;  %6016 = vmatmul.msk.f32.gmra.mxu1 %vm4064_vm14, %v9027_v23  ;;  %v6054_v39 = vld [vmem:[%s9763_s7 + $0x1b0] sm:$0xff] }
 0x4db   : > { %5101 = vmatpush.msra.mxu3 %v6054_v39 }
 0x4dc   : > { %5992 = vmatmul.msk.f32.gmra.mxu0 %vm4064_vm14, %v9031_v22  ;;  %v3992_v25 = vadd.f32 %v8756_v3, %v3968_v31  ;;  %v3667_v11 = vpop.f32.mrf.mxu3 }
 0x4dd   : > { %5930 = vmatmul.msk.f32.gmra.mxu2 %vm4064_vm14, %v9027_v23  ;;  %v3701_v50 = vadd.f32 %v3667_v11, %v3566_v52  ;;  %5102 = vmatpush.msra.mxu3 %v6053_v63  ;;  %v6052_v11 = vld [vmem:[%s9763_s7 + $0x1a0] sm:$0xff]  ;;  %v6049_v63 = vld [vmem:[%s9763_s7 + $0x188] sm:$0xff] }
 0x4de   : > { %5969 = vmatmul.msk.f32.gmra.mxu3 %vm4064_vm14, %v9029_v18  ;;  %v4012_v46 = vmax.f32 %v3992_v25, 0.0 }
 0x4df   : > { %v3801_v20 = vpop.f32.mrf.mxu0  ;;  %5103 = vmatpush.msra.mxu3 %v6052_v11  ;;  %v6031_v11 = vld [vmem:[%s9763_s7 + $0x178] sm:$0xff] }
 0x4e0   : > { %v4056_v45 = vmul.f32 %v4040_v27, %v4012_v46  ;;  %v3835_v44 = vadd.f32 %v3801_v20, %v3701_v50  ;;  %v6079_v20 = vld [vmem:[%s9763_s7 + $0x1f8] sm:$0xff]  ;;  %4945 = vmatpush.msrb.mxu2 %v6031_v11 }
 0x4e1   : > { %v9050_v7 = vld [vmem:[#allocation4 + $0xb0] sm:$0xff]  ;;  %v6103_v50 = vld [vmem:[%s9763_s7 + $0x238] sm:$0xff]  ;;  %5254 = vmatpush.msra.mxu0 %v6079_v20  ;;  %v6100_v20 = vld [vmem:[%s9763_s7 + $0x220] sm:$0xff] }
 0x4e2   : > { %v9052_v9 = vld [vmem:[#allocation4 + $0xa9] sm:$0xff]  ;;  %4118 = vst.msk [vmem:[#allocation4 + $0xc8] sm:$0xff] %vm4064_vm14, %v4056_v45  ;;  %v3969_v15 = vadd.f32 %v3935_v4, %v3835_v44  ;;  %6017 = vmatmul.msk.f32.gmra.mxu1 %vm4064_vm14, %v9050_v7  ;;  %v9078_v4 = vpop.f32.mrf.mxu2  ;;  %v9083_v58 = vld [vmem:[#allocation4 + $0xb1] sm:$0xff]  ;;  %v3301_v45 = vadd.f32 %v8557_v36, %v8559_v57 }
 0x4e3   : > { %v9054_v40 = vld [vmem:[#allocation4 + $0xaf] sm:$0xff]  ;;  %5408 = vmatpush.msra.mxu1 %v6103_v50  ;;  %5255 = vmatpush.msra.mxu0 %v6078_v62  ;;  %v9886_v50 = vld [vmem:[#allocation26_spill] sm:$0xff] }
 0x4e4   : > { %5993 = vmatmul.msk.f32.gmra.mxu0 %vm4064_vm14, %v9054_v40  ;;  %v3993_v10 = vadd.f32 %v8756_v3, %v3969_v15  ;;  %v3670_v38 = vpop.f32.mrf.mxu3  ;;  %v3941_v15 = vpop.f32.mrf.mxu1  ;;  %v6102_v36 = vld [vmem:[%s9763_s7 + $0x230] sm:$0xff] }
 0x4e5   : > { %5931 = vmatmul.msk.f32.gmra.mxu2 %vm4064_vm14, %v9050_v7  ;;  %v3702_v21 = vadd.f32 %v3670_v38, %v3567_v60  ;;  %5409 = vmatpush.msra.mxu1 %v6102_v36  ;;  %v6077_v60 = vld [vmem:[%s9763_s7 + $0x1e8] sm:$0xff] }
 0x4e6   : > { %5970 = vmatmul.msk.f32.gmra.mxu3 %vm4064_vm14, %v9052_v9  ;;  %v4013_v51 = vmax.f32 %v3993_v10, 0.0  ;;  %v4023_v10 = vadd.s32 %v8653_v13, %v9884_v41  ;;  %v6101_v38 = vld [vmem:[%s9763_s7 + $0x228] sm:$0xff]  ;;  %5256 = vmatpush.msra.mxu0 %v6077_v60 }
 0x4e7   : > { %v3804_v8 = vpop.f32.mrf.mxu0  ;;  %5410 = vmatpush.msra.mxu1 %v6101_v38 }
 0x4e8   : > { %v4057_v35 = vmul.f32 %v4040_v27, %v4013_v51  ;;  %v3836_v31 = vadd.f32 %v3804_v8, %v3702_v21  ;;  %v6051_v27 = vld [vmem:[%s9763_s7 + $0x198] sm:$0xff]  ;;  %v9885_v8 = vld [vmem:[#allocation20_spill] sm:$0xff]  ;;  %vm4025_vm3 = vcmp.ge.s32.totalorder %v4023_v10, 0  ;;  %vm4027_vm4 = vcmp.lt.s32.totalorder %v4023_v10, 16  ;;  %v6073_v10 = vld [vmem:[%s9763_s7 + $0x1c8] sm:$0xff] }
 0x4e9   : > { %v9086_v25 = vld [vmem:[#allocation4 + $0xc8] sm:$0xff]  ;;  %5104 = vmatpush.msra.mxu3 %v6051_v27  ;;  %v3435_v21 = vadd.f32 %v9885_v8, %v3301_v45  ;;  %v6076_v27 = vld [vmem:[%s9763_s7 + $0x1e0] sm:$0xff]  ;;  %v9887_v45 = vld [vmem:[#allocation24_spill] sm:$0xff]  ;;  %5411 = vmatpush.msra.mxu1 %v6100_v20 }
 0x4ea   : > { %v9088_v52 = vld [vmem:[#allocation4 + $0xc7] sm:$0xff]  ;;  %4119 = vst.msk [vmem:[#allocation4 + $0xd0] sm:$0xff] %vm4064_vm14, %v4057_v35  ;;  %v3970_v46 = vadd.f32 %v3938_v26, %v3836_v31  ;;  %6018 = vmatmul.msk.f32.gmra.mxu1 %vm4064_vm14, %v9086_v25  ;;  %v6050_v26 = vld [vmem:[%s9763_s7 + $0x190] sm:$0xff]  ;;  %v9137_v13 = vpop.f32.mrf.mxu2  ;;  %5257 = vmatpush.msra.mxu0 %v6076_v27  ;;  %vm4029_vm5 = vmand %vm4025_vm3, %vm4027_vm4 }
 0x4eb   : > { %5105 = vmatpush.msra.mxu3 %v6050_v26  ;;  %v6099_v26 = vld [vmem:[%s9763_s7 + $0x218] sm:$0xff]  ;;  %v6030_v27 = vld [vmem:[%s9763_s7 + $0x170] sm:$0xff] }
 0x4ec   : > { %5994 = vmatmul.msk.f32.gmra.mxu0 %vm4064_vm14, %v9088_v52  ;;  %v3994_v44 = vadd.f32 %v8756_v3, %v3970_v46  ;;  %v3673_v0 = vpop.f32.mrf.mxu3  ;;  %v6048_v46 = vld [vmem:[%s9763_s7 + $0x180] sm:$0xff]  ;;  %v3944_v41 = vpop.f32.mrf.mxu1  ;;  %5412 = vmatpush.msra.mxu1 %v6099_v26 }
 0x4ed   : > { %5932 = vmatmul.msk.f32.gmra.mxu2 %vm4064_vm14, %v9086_v25  ;;  %v3703_v17 = vadd.f32 %v3673_v0, %v3568_v37  ;;  %5106 = vmatpush.msra.mxu3 %v6049_v63  ;;  %v6075_v0 = vld [vmem:[%s9763_s7 + $0x1d8] sm:$0xff] }
 0x4ee   : > { %5971 = vmatmul.msk.f32.gmra.mxu3 %vm4064_vm14, %v9083_v58  ;;  %v4014_v57 = vmax.f32 %v3994_v44, 0.0  ;;  %v3302_v44 = vadd.f32 %v9887_v45, %v9886_v50  ;;  %5258 = vmatpush.msra.mxu0 %v6075_v0  ;;  %v6072_v50 = vld [vmem:[%s9763_s7 + $0x1c0] sm:$0xff] }
 0x4ef   : > { %v3807_v42 = vpop.f32.mrf.mxu0  ;;  %5107 = vmatpush.msra.mxu3 %v6048_v46  ;;  %v6096_v45 = vld [vmem:[%s9763_s7 + $0x200] sm:$0xff]  ;;  %4946 = vmatpush.msrb.mxu2 %v6030_v27 }
 0x4f0   : > { %v4058_v39 = vmul.f32 %v4041_v54, %v4014_v57  ;;  %v3837_v51 = vadd.f32 %v3807_v42, %v3703_v17  ;;  %v6098_v17 = vld [vmem:[%s9763_s7 + $0x210] sm:$0xff] }
 0x4f1   : > { %v9139_v35 = vld [vmem:[#allocation4 + $0xd0] sm:$0xff]  ;;  %5413 = vmatpush.msra.mxu1 %v6098_v17 }
 0x4f2   : > { %v9141_v31 = vld [vmem:[#allocation4 + $0xc9] sm:$0xff]  ;;  %4120 = vst.msk [vmem:[#allocation4 + $0xe8] sm:$0xff] %vm4064_vm14, %v4058_v39  ;;  %v3971_v53 = vadd.f32 %v3941_v15, %v3837_v51  ;;  %6019 = vmatmul.msk.f32.gmra.mxu1 %vm4064_vm14, %v9139_v35  ;;  %v3569_v15 = vadd.f32 %v9016_v43, %v3435_v21  ;;  %v9184_v39 = vld [vmem:[#allocation4 + $0xd1] sm:$0xff]  ;;  %v6189_v21 = vld [vmem:[#allocation2] sm:$0xff]  ;;  %v3950_v20 = vpop.f32.mrf.mxu2 }
 0x4f3   : > { %v9143_v61 = vld [vmem:[#allocation4 + $0xcf] sm:$0xff]  ;;  %v9190_v63 = vsel %vm4029_vm5, 1.0, %v6189_v21 }
 0x4f4   : > { %5995 = vmatmul.msk.f32.gmra.mxu0 %vm4064_vm14, %v9143_v61  ;;  %v3995_v37 = vadd.f32 %v8756_v3, %v3971_v53  ;;  %v6074_v43 = vld [vmem:[%s9763_s7 + $0x1d0] sm:$0xff]  ;;  %v9888_v51 = vld [vmem:[#allocation19_spill] sm:$0xff]  ;;  %v4042_v26 = vperm.slane %v9190_v63, 0 }
 0x4f5   : > { %5933 = vmatmul.msk.f32.gmra.mxu2 %vm4064_vm14, %v9139_v35  ;;  %v3676_v62 = vpop.f32.mrf.mxu3  ;;  %v3436_v8 = vadd.f32 %v9888_v51, %v3302_v44  ;;  %5259 = vmatpush.msra.mxu0 %v6074_v43  ;;  %v9889_v44 = vld [vmem:[#allocation27_spill] sm:$0xff]  ;;  %v3947_v51 = vpop.f32.mrf.mxu1 }
 0x4f6   : > { %5972 = vmatmul.msk.f32.gmra.mxu3 %vm4064_vm14, %v9141_v31  ;;  %v4015_v36 = vmax.f32 %v3995_v37, 0.0  ;;  %v3704_v42 = vadd.f32 %v3676_v62, %v3569_v15  ;;  %v9890_v37 = vld [vmem:[#allocation25_spill] sm:$0xff] }
 0x4f7   : > { %v3810_v57 = vpop.f32.mrf.mxu0  ;;  %v3303_v15 = vadd.f32 %v9890_v37, %v9889_v44  ;;  %v3570_v62 = vadd.f32 %v9047_v30, %v3436_v8  ;;  %5260 = vmatpush.msra.mxu0 %v6073_v10  ;;  %v9892_v8 = vld [vmem:[#allocation28_spill] sm:$0xff] }
 0x4f8   : > { %v4059_v60 = vmul.f32 %v4041_v54, %v4015_v36  ;;  %v3838_v38 = vadd.f32 %v3810_v57, %v3704_v42  ;;  %v6097_v54 = vld [vmem:[%s9763_s7 + $0x208] sm:$0xff]  ;;  %v3304_v10 = vadd.f32 %v9892_v8, %v8674_v34 }
 0x4f9   : > { %v9192_v53 = vld [vmem:[#allocation4 + $0xe8] sm:$0xff]  ;;  %5414 = vmatpush.msra.mxu1 %v6097_v54  ;;  %5261 = vmatpush.msra.mxu0 %v6072_v50 }
 0x4fa   : > { %v9194_v11 = vld [vmem:[#allocation4 + $0xe7] sm:$0xff]  ;;  %4121 = vst.msk [vmem:[#allocation4 + $0xf0] sm:$0xff] %vm4064_vm14, %v4059_v60  ;;  %v3972_v46 = vadd.f32 %v3944_v41, %v3838_v38  ;;  %6020 = vmatmul.msk.f32.gmra.mxu1 %vm4064_vm14, %v9192_v53  ;;  %v9891_v60 = vld [vmem:[#allocation21_spill] sm:$0xff]  ;;  %v3953_v50 = vpop.f32.mrf.mxu2 }
 0x4fb   : > { %5415 = vmatpush.msra.mxu1 %v6096_v45  ;;  %v3437_v38 = vadd.f32 %v9891_v60, %v3303_v15 }
 0x4fc   : > { %5996 = vmatmul.msk.f32.gmra.mxu0 %vm4064_vm14, %v9194_v11  ;;  %v3996_v0 = vadd.f32 %v8756_v3, %v3972_v46 }
 0x4fd   : > { %5934 = vmatmul.msk.f32.gmra.mxu2 %vm4064_vm14, %v9192_v53  ;;  %v3679_v36 = vpop.f32.mrf.mxu3  ;;  %v3571_v27 = vadd.f32 %v9078_v4, %v3437_v38  ;;  %v6029_v4 = vld [vmem:[%s9763_s7 + $0x168] sm:$0xff]  ;;  %v4043_v38 = vperm.slane %v9190_v63, 1 }
 0x4fe   : > { %5973 = vmatmul.msk.f32.gmra.mxu3 %vm4064_vm14, %v9184_v39  ;;  %v4016_v57 = vmax.f32 %v3996_v0, 0.0  ;;  %v3705_v43 = vadd.f32 %v3679_v36, %v3570_v62  ;;  %4947 = vmatpush.msrb.mxu2 %v6029_v4 }
 0x4ff   : > { %v3813_v42 = vpop.f32.mrf.mxu0 }
 0x500   : > { %v4060_v17 = vmul.f32 %v4042_v26, %v4016_v57  ;;  %v3839_v41 = vadd.f32 %v3813_v42, %v3705_v43  ;;  %v4126_v57 = vld [vmem:[#allocation4 + $0x7] sm:$0xff] }
 0x501   : > { %v9223_v21 = vld [vmem:[#allocation4 + $0xf0] sm:$0xff]  ;;  %v9893_v42 = vld [vmem:[#allocation23_spill] sm:$0xff] }
 0x502   : > { %v9225_v46 = vld [vmem:[#allocation4 + $0xe9] sm:$0xff]  ;;  %4122 = vst.msk [vmem:[#allocation4 + $0x108] sm:$0xff] %vm4064_vm14, %v4060_v17  ;;  %v3973_v30 = vadd.f32 %v3947_v51, %v3839_v41  ;;  %6021 = vmatmul.msk.f32.gmra.mxu1 %vm4064_vm14, %v9223_v21  ;;  %v3438_v43 = vadd.f32 %v9893_v42, %v3304_v10  ;;  %v9243_v17 = vld [vmem:[#allocation4 + $0xf1] sm:$0xff] }
 0x503   : > { %v9227_v44 = vld [vmem:[#allocation4 + $0xef] sm:$0xff] }
 0x504   : > { %5997 = vmatmul.msk.f32.gmra.mxu0 %vm4064_vm14, %v9227_v44  ;;  %v3997_v54 = vadd.f32 %v8756_v3, %v3973_v30 }
 0x505   : > { %5935 = vmatmul.msk.f32.gmra.mxu2 %vm4064_vm14, %v9223_v21  ;;  %v3682_v45 = vpop.f32.mrf.mxu3 }
 0x506   : > { %5974 = vmatmul.msk.f32.gmra.mxu3 %vm4064_vm14, %v9225_v46  ;;  %v4017_v37 = vmax.f32 %v3997_v54, 0.0  ;;  %v3706_v0 = vadd.f32 %v3682_v45, %v3571_v27 }
 0x507   : > { %v3816_v15 = vpop.f32.mrf.mxu0 }
 0x508   : > { %v4061_v62 = vmul.f32 %v4042_v26, %v4017_v37  ;;  %v3840_v36 = vadd.f32 %v3816_v15, %v3706_v0  ;;  %v4127_v37 = vld [vmem:[#allocation4 + $0xf] sm:$0xff] }
 0x509   : > { %v9245_v41 = vld [vmem:[#allocation4 + $0x107] sm:$0xff] }
 0x50a   : > { %v9247_v60 = vld [vmem:[#allocation4 + $0x108] sm:$0xff]  ;;  %4123 = vst.msk [vmem:[#allocation4 + $0x110] sm:$0xff] %vm4064_vm14, %v4061_v62  ;;  %v3974_v34 = vadd.f32 %v3950_v20, %v3840_v36  ;;  %v3572_v20 = vadd.f32 %v9137_v13, %v3438_v43 }
 0x50b   : > { %6022 = vmatmul.msk.f32.gmra.mxu1 %vm4064_vm14, %v9247_v60 }
 0x50c   : > { %5998 = vmatmul.msk.f32.gmra.mxu0 %vm4064_vm14, %v9245_v41  ;;  %v3998_v26 = vadd.f32 %v8756_v3, %v3974_v34 }
 0x50d   : > { %5936 = vmatmul.msk.f32.vlgmr.msra.gmra.mxu2 %vm4064_vm14, %v4126_v57  ;;  %v3685_v51 = vpop.f32.mrf.mxu3 }
 0x50e   : > { %5975 = vmatmul.msk.f32.gmra.mxu3 %vm4064_vm14, %v9243_v17  ;;  %v4018_v8 = vmax.f32 %v3998_v26, 0.0  ;;  %v3707_v54 = vadd.f32 %v3685_v51, %v3572_v20 }
 0x50f   : > { %v3819_v10 = vpop.f32.mrf.mxu0 }
 0x510   : > { %v9263_v30 = vpop.f32.mrf.mxu2  ;;  %v4062_v27 = vmul.f32 %v4043_v38, %v4018_v8  ;;  %v3841_v45 = vadd.f32 %v3819_v10, %v3707_v54 }
 0x511   : > { %v9265_v15 = vld [vmem:[#allocation4 + $0x10f] sm:$0xff] }
 0x512   : > { %v9267_v0 = vld [vmem:[#allocation4 + $0x110] sm:$0xff]  ;;  %4124 = vst.msk [vmem:[#allocation4 + $0x128] sm:$0xff] %vm4064_vm14, %v4062_v27  ;;  %v3975_v62 = vadd.f32 %v3953_v50, %v3841_v45  ;;  %v6028_v50 = vld [vmem:[%s9763_s7 + $0x160] sm:$0xff] }
 0x513   : > { %6023 = vmatmul.msk.f32.gmra.mxu1 %vm4064_vm14, %v9267_v0  ;;  %4948 = vmatpush.msrb.mxu2 %v6028_v50  ;;  %v9469_v54 = vld [vmem:[#allocation4 + $0x111] sm:$0xff] }
 0x514   : > { %5999 = vmatmul.msk.f32.gmra.mxu0 %vm4064_vm14, %v9265_v15  ;;  %v3999_v13 = vadd.f32 %v8756_v3, %v3975_v62 }
 0x515   : > { %5937 = vmatmul.msk.f32.gmra.mxu2 %vm4064_vm14, %v4127_v37  ;;  %v4864_v37 = vld [vmem:[#allocation4 + $0x29] sm:$0xff] }
 0x516   : > { %6056 = vmatmul.msk.f32.vlgmr.msra.gmra.mxu3 %vm4064_vm14, %v8890_v32  ;;  %v4019_v36 = vmax.f32 %v3999_v13, 0.0 }
 0x518   : > { %v9278_v63 = vpop.f32.mrf.mxu2  ;;  %v4063_v57 = vmul.f32 %v4043_v38, %v4019_v36  ;;  %v4865_v36 = vld [vmem:[#allocation4 + $0x31] sm:$0xff] }
 0x51a   : > { %4125 = vst.msk [vmem:[#allocation4 + $0x130] sm:$0xff] %vm4064_vm14, %v4063_v57 }
 0x51b   : > { %6104 = vmatmul.msk.f32.vlgmr.msra.gmra.mxu1 %vm4064_vm14, %v8910_v47 }
 0x51c   : > { %6080 = vmatmul.msk.f32.vlgmr.msra.gmra.mxu0 %vm4064_vm14, %v8888_v19 }
 0x51d   : > { %5938 = vmatmul.msk.f32.gmra.mxu2 %vm4064_vm14, %v8854_v2 }
 0x51e   : > { %6057 = vmatmul.msk.f32.gmra.mxu3 %vm4064_vm14, %v8912_v49 }
 0x520   : > { %v9292_v3 = vpop.f32.mrf.mxu2 }
 0x521   : > { %v5341_v13 = vld [vmem:[#allocation4 + $0x129] sm:$0xff]  ;;  %v5342_v50 = vld [vmem:[#allocation4 + $0x131] sm:$0xff] }
 0x522   : > { %v5188_v57 = vld [vmem:[#allocation4 + $0x130] sm:$0xff] }
 0x523   : > { %6105 = vmatmul.msk.f32.gmra.mxu1 %vm4064_vm14, %v8935_v59 }
 0x524   : > { %6081 = vmatmul.msk.f32.gmra.mxu0 %vm4064_vm14, %v8908_v1  ;;  %v6026_v1 = vld [vmem:[%s9763_s7 + $0x150] sm:$0xff] }
 0x525   : > { %5939 = vmatmul.msk.f32.gmra.mxu2 %vm4064_vm14, %v8871_v28  ;;  %v6027_v28 = vld [vmem:[%s9763_s7 + $0x158] sm:$0xff] }
 0x526   : > { %6058 = vmatmul.msk.f32.gmra.mxu3 %vm4064_vm14, %v8937_v48  ;;  %4949 = vmatpush.msrb.mxu2 %v6027_v28 }
 0x528   : > { %v9302_v2 = vpop.f32.mrf.mxu2  ;;  %4950 = vmatpush.msrb.mxu2 %v6026_v1 }
 0x52b   : > { %6106 = vmatmul.msk.f32.gmra.mxu1 %vm4064_vm14, %v8958_v24 }
 0x52c   : > { %6082 = vmatmul.msk.f32.gmra.mxu0 %vm4064_vm14, %v8933_v5 }
 0x52d   : > { %5940 = vmatmul.msk.f32.gmra.mxu2 %vm4064_vm14, %v8890_v32 }
 0x52e   : > { %6059 = vmatmul.msk.f32.gmra.mxu3 %vm4064_vm14, %v8960_v16 }
 0x530   : > { %v9315_v19 = vpop.f32.mrf.mxu2 }
 0x533   : > { %6107 = vmatmul.msk.f32.gmra.mxu1 %vm4064_vm14, %v8983_v6 }
 0x534   : > { %6083 = vmatmul.msk.f32.gmra.mxu0 %vm4064_vm14, %v8956_v33  ;;  %v9363_v33 = vpop.f32.mrf.mxu0 }
 0x535   : > { %5941 = vmatmul.msk.f32.gmra.mxu2 %vm4064_vm14, %v8912_v49  ;;  %v9348_v49 = vpop.f32.mrf.mxu3 }
 0x536   : > { %6060 = vmatmul.msk.f32.gmra.mxu3 %vm4064_vm14, %v8985_v14 }
 0x538   : > { %v9325_v32 = vpop.f32.mrf.mxu2 }
 0x53b   : > { %6108 = vmatmul.msk.f32.gmra.mxu1 %vm4064_vm14, %v9004_v12 }
 0x53c   : > { %6084 = vmatmul.msk.f32.gmra.mxu0 %vm4064_vm14, %v8981_v29 }
 0x53d   : > { %5942 = vmatmul.msk.f32.gmra.mxu2 %vm4064_vm14, %v8937_v48  ;;  %v6025_v48 = vld [vmem:[%s9763_s7 + $0x148] sm:$0xff] }
 0x53e   : > { %6061 = vmatmul.msk.f32.gmra.mxu3 %vm4064_vm14, %v9006_v55  ;;  %4951 = vmatpush.msrb.mxu2 %v6025_v48 }
 0x540   : > { %v9338_v47 = vpop.f32.mrf.mxu2 }
 0x543   : > { %6109 = vmatmul.msk.f32.gmra.mxu1 %vm4064_vm14, %v9029_v18 }
 0x544   : > { %6085 = vmatmul.msk.f32.gmra.mxu0 %vm4064_vm14, %v9002_v56 }
 0x545   : > { %5943 = vmatmul.msk.f32.gmra.mxu2 %vm4064_vm14, %v8960_v16  ;;  %v9365_v16 = vpop.f32.mrf.mxu1 }
 0x546   : > { %6062 = vmatmul.msk.f32.gmra.mxu3 %vm4064_vm14, %v9031_v22 }
 0x548   : > { %v9350_v5 = vpop.f32.mrf.mxu2 }
 0x54b   : > { %6110 = vmatmul.msk.f32.gmra.mxu1 %vm4064_vm14, %v9052_v9 }
 0x54c   : > { %6086 = vmatmul.msk.f32.gmra.mxu0 %vm4064_vm14, %v9027_v23  ;;  %v9381_v23 = vpop.f32.mrf.mxu0 }
 0x54d   : > { %5944 = vmatmul.msk.f32.gmra.mxu2 %vm4064_vm14, %v8985_v14  ;;  %v9369_v14 = vpop.f32.mrf.mxu3  ;;  %v9383_v42 = vpop.f32.mrf.mxu1 }
 0x54e   : > { %6063 = vmatmul.msk.f32.gmra.mxu3 %vm4064_vm14, %v9054_v40 }
 0x550   : > { %v9367_v29 = vpop.f32.mrf.mxu2 }
 0x553   : > { %6111 = vmatmul.msk.f32.gmra.mxu1 %vm4064_vm14, %v9083_v58 }
 0x554   : > { %6087 = vmatmul.msk.f32.gmra.mxu0 %vm4064_vm14, %v9050_v7  ;;  %v9400_v34 = vpop.f32.mrf.mxu0 }
 0x555   : > { %5945 = vmatmul.msk.f32.gmra.mxu2 %vm4064_vm14, %v9006_v55  ;;  %v9385_v43 = vpop.f32.mrf.mxu3  ;;  %v6024_v55 = vld [vmem:[%s9763_s7 + $0x140] sm:$0xff]  ;;  %v9402_v4 = vpop.f32.mrf.mxu1 }
 0x556   : > { %6064 = vmatmul.msk.f32.gmra.mxu3 %vm4064_vm14, %v9088_v52  ;;  %4952 = vmatpush.msrb.mxu2 %v6024_v55  ;;  %v4866_v55 = vld [vmem:[#allocation4 + $0x49] sm:$0xff] }
 0x558   : > { %v9379_v56 = vpop.f32.mrf.mxu2 }
 0x55b   : > { %6112 = vmatmul.msk.f32.gmra.mxu1 %vm4064_vm14, %v9141_v31 }
 0x55c   : > { %6088 = vmatmul.msk.f32.gmra.mxu0 %vm4064_vm14, %v9086_v25  ;;  %v9416_v26 = vpop.f32.mrf.mxu0 }
 0x55d   : > { %5946 = vmatmul.msk.f32.gmra.mxu2 %vm4064_vm14, %v9031_v22  ;;  %v9404_v22 = vpop.f32.mrf.mxu3 }
 0x55e   : > { %6065 = vmatmul.msk.f32.gmra.mxu3 %vm4064_vm14, %v9143_v61 }
 0x560   : > { %v9398_v7 = vpop.f32.mrf.mxu2 }
 0x561   : > { %9894 = vst [vmem:[#allocation29_spill] sm:$0xff] %v9398_v7 }
 0x563   : > { %6113 = vmatmul.msk.f32.gmra.mxu1 %vm4064_vm14, %v9184_v39 }
 0x564   : > { %6089 = vmatmul.msk.f32.gmra.mxu0 %vm4064_vm14, %v9139_v35 }
 0x565   : > { %5947 = vmatmul.msk.f32.gmra.mxu2 %vm4064_vm14, %v9054_v40  ;;  %v9422_v40 = vpop.f32.mrf.mxu1  ;;  %v9428_v35 = vpop.f32.mrf.mxu3 }
 0x566   : > { %6066 = vmatmul.msk.f32.gmra.mxu3 %vm4064_vm14, %v9194_v11 }
 0x568   : > { %v9414_v25 = vpop.f32.mrf.mxu2 }
 0x569   : > { %9895 = vst [vmem:[#allocation30_spill] sm:$0xff] %v9414_v25 }
 0x56b   : > { %6114 = vmatmul.msk.f32.gmra.mxu1 %vm4064_vm14, %v9225_v46 }
 0x56c   : > { %6090 = vmatmul.msk.f32.gmra.mxu0 %vm4064_vm14, %v9192_v53 }
 0x56d   : > { %5948 = vmatmul.msk.f32.gmra.mxu2 %vm4064_vm14, %v9088_v52  ;;  %v9440_v52 = vpop.f32.mrf.mxu0  ;;  %v9442_v53 = vpop.f32.mrf.mxu1 }
 0x56e   : > { %6067 = vmatmul.msk.f32.gmra.mxu3 %vm4064_vm14, %v9227_v44  ;;  %v9446_v51 = vpop.f32.mrf.mxu3 }
 0x570   : > { %v9430_v38 = vpop.f32.mrf.mxu2 }
 0x571   : > { %9896 = vst [vmem:[#allocation32_spill] sm:$0xff] %v9430_v38 }
 0x573   : > { %6115 = vmatmul.msk.f32.gmra.mxu1 %vm4064_vm14, %v9243_v17 }
 0x574   : > { %6091 = vmatmul.msk.f32.gmra.mxu0 %vm4064_vm14, %v9223_v21 }
 0x575   : > { %5949 = vmatmul.msk.f32.gmra.mxu2 %vm4064_vm14, %v9143_v61  ;;  %v9452_v61 = vld [vmem:[#allocation4 + $0x109] sm:$0xff]  ;;  %v9462_v8 = vpop.f32.mrf.mxu1 }
 0x576   : > { %6068 = vmatmul.msk.f32.gmra.mxu3 %vm4064_vm14, %v9245_v41  ;;  %v9460_v41 = vpop.f32.mrf.mxu0  ;;  %v9464_v10 = vpop.f32.mrf.mxu3 }
 0x578   : > { %v9444_v20 = vpop.f32.mrf.mxu2 }
 0x579   : > { %9897 = vst [vmem:[#allocation31_spill] sm:$0xff] %v9444_v20 }
 0x57b   : > { %6116 = vmatmul.msk.f32.gmra.mxu1 %vm4064_vm14, %v9452_v61 }
 0x57c   : > { %6092 = vmatmul.msk.f32.gmra.mxu0 %vm4064_vm14, %v9247_v60 }
 0x57d   : > { %5950 = vmatmul.msk.f32.gmra.mxu2 %vm4064_vm14, %v9194_v11  ;;  %v5033_v11 = vld [vmem:[#allocation4 + $0x127] sm:$0xff]  ;;  %v9479_v45 = vpop.f32.mrf.mxu1 }
 0x57e   : > { %6069 = vmatmul.msk.f32.gmra.mxu3 %vm4064_vm14, %v9265_v15  ;;  %v9477_v27 = vpop.f32.mrf.mxu0  ;;  %v5034_v15 = vld [vmem:[#allocation4 + $0x12f] sm:$0xff]  ;;  %v9481_v62 = vpop.f32.mrf.mxu3 }
 0x580   : > { %v9458_v21 = vpop.f32.mrf.mxu2 }
 0x581   : > { %9898 = vst [vmem:[#allocation33_spill] sm:$0xff] %v9458_v21 }
 0x583   : > { %6117 = vmatmul.msk.f32.gmra.mxu1 %vm4064_vm14, %v9469_v54 }
 0x584   : > { %6093 = vmatmul.msk.f32.gmra.mxu0 %vm4064_vm14, %v9267_v0 }
 0x585   : > { %5951 = vmatmul.msk.f32.gmra.mxu2 %vm4064_vm14, %v9227_v44  ;;  %v5187_v44 = vld [vmem:[#allocation4 + $0x128] sm:$0xff]  ;;  %v9492_v1 = vpop.f32.mrf.mxu1 }
 0x586   : > { %6070 = vmatmul.msk.f32.gmra.mxu3 %vm4064_vm14, %v5033_v11  ;;  %v9490_v28 = vpop.f32.mrf.mxu0 }
 0x588   : > { %v9475_v60 = vpop.f32.mrf.mxu2 }
 0x589   : > { %9899 = vst [vmem:[#allocation9_spill] sm:$0xff] %v9475_v60 }
 0x58b   : > { %6118 = vmatmul.msk.f32.gmra.mxu1 %vm4064_vm14, %v5341_v13 }
 0x58c   : > { %6094 = vmatmul.msk.f32.gmra.mxu0 %vm4064_vm14, %v5187_v44 }
 0x58d   : > { %6032 = vmatmul.msk.f32.vlgmr.msrb.gmra.mxu2 %vm4064_vm14, %v4864_v37  ;;  %v9501_v37 = vpop.f32.mrf.mxu3  ;;  %v9507_v44 = vpop.f32.mrf.mxu1 }
 0x58e   : > { %6071 = vmatmul.msk.f32.gmra.mxu3 %vm4064_vm14, %v5034_v15  ;;  %v9505_v15 = vpop.f32.mrf.mxu0  ;;  %9900 = vst [vmem:[#allocation8_spill] sm:$0xff] %v9507_v44 }
 0x590   : > { %v9487_v0 = vpop.f32.mrf.mxu2 }
 0x593   : > { %6119 = vmatmul.msk.f32.gmra.mxu1 %vm4064_vm14, %v5342_v50 }
 0x594   : > { %6095 = vmatmul.msk.f32.gmra.mxu0 %vm4064_vm14, %v5188_v57 }
 0x595   : > { %6033 = vmatmul.msk.f32.gmra.mxu2 %vm4064_vm14, %v4865_v36  ;;  %v9513_v36 = vpop.f32.mrf.mxu3 }
 0x596   : > { %v9515_v57 = vpop.f32.mrf.mxu0 }
 0x597   : > { %9901 = vst [vmem:[#allocation10_spill] sm:$0xff] %v9515_v57 }
 0x598   : > { %v9496_v48 = vpop.f32.mrf.mxu2 }
 0x59d   : > { %6034 = vmatmul.msk.f32.gmra.mxu2 %vm4064_vm14, %v4866_v55  ;;  %v9519_v55 = vpop.f32.mrf.mxu1 }
 0x59e   : > { %9902 = vst [vmem:[#allocation11_spill] sm:$0xff] %v9519_v55  ;;  %v9527_v21 = vpop.f32.mrf.mxu0 }
 0x59f   : > { %9904 = vst [vmem:[#allocation12_spill] sm:$0xff] %v9527_v21 }
 0x5a0   : > { %v9499_v11 = vpop.f32.mrf.mxu2 }
 0x5a5   : > { %6035 = vmatmul.msk.f32.gmra.mxu2 %vm4064_vm14, %v8935_v59  ;;  %v9523_v59 = vpop.f32.mrf.mxu3  ;;  %v9529_v20 = vpop.f32.mrf.mxu1 }
 0x5a6   : > { %9903 = vst [vmem:[#allocation6_spill] sm:$0xff] %v9523_v59  ;;  %v9537_v25 = vpop.f32.mrf.mxu0 }
 0x5a7   : > { %9905 = vst [vmem:[#allocation13_spill] sm:$0xff] %v9529_v20 }
 0x5a8   : > { %v9509_v13 = vpop.f32.mrf.mxu2  ;;  %9907 = vst [vmem:[#allocation14_spill] sm:$0xff] %v9537_v25 }
 0x5ad   : > { %6036 = vmatmul.msk.f32.gmra.mxu2 %vm4064_vm14, %v8958_v24  ;;  %v9535_v38 = vpop.f32.mrf.mxu3 }
 0x5ae   : > { %9906 = vst [vmem:[#allocation15_spill] sm:$0xff] %v9535_v38  ;;  %v9549_v20 = vpop.f32.mrf.mxu0 }
 0x5af   : > { %9910 = vst [vmem:[#allocation17_spill] sm:$0xff] %v9549_v20 }
 0x5b0   : > { %v9517_v50 = vpop.f32.mrf.mxu2 }
 0x5b5   : > { %6037 = vmatmul.msk.f32.gmra.mxu2 %vm4064_vm14, %v8983_v6  ;;  %v9541_v6 = vpop.f32.mrf.mxu1  ;;  %v9545_v59 = vpop.f32.mrf.mxu3 }
 0x5b6   : > { %9908 = vst [vmem:[#allocation16_spill] sm:$0xff] %v9541_v6 }
 0x5b7   : > { %9909 = vst [vmem:[#allocation22_spill] sm:$0xff] %v9545_v59 }
 0x5b8   : > { %v9525_v60 = vpop.f32.mrf.mxu2 }
 0x5bd   : > { %6038 = vmatmul.msk.f32.gmra.mxu2 %vm4064_vm14, %v9004_v12  ;;  %v9551_v12 = vpop.f32.mrf.mxu1  ;;  %v9557_v25 = vpop.f32.mrf.mxu3 }
 0x5be   : > { %9911 = vst [vmem:[#allocation18_spill] sm:$0xff] %v9551_v12 }
 0x5bf   : > { %9912 = vst [vmem:[#allocation7_spill] sm:$0xff] %v9557_v25 }
 0x5c0   : > { %v9533_v24 = vpop.f32.mrf.mxu2 }
 0x5c5   : > { %6039 = vmatmul.msk.f32.gmra.mxu2 %vm4064_vm14, %v9029_v18  ;;  %v9559_v18 = vpop.f32.mrf.mxu0  ;;  %v9563_v38 = vpop.f32.mrf.mxu1 }
 0x5c6   : > { %9913 = vst [vmem:[#allocation20_spill] sm:$0xff] %v9559_v18 }
 0x5c7   : > { %9914 = vst [vmem:[#allocation26_spill] sm:$0xff] %v9563_v38 }
 0x5c8   : > { %v9543_v55 = vpop.f32.mrf.mxu2 }
 0x5cd   : > { %6040 = vmatmul.msk.f32.gmra.mxu2 %vm4064_vm14, %v9052_v9  ;;  %v9567_v9 = vpop.f32.mrf.mxu3  ;;  %v9571_v12 = vpop.f32.mrf.mxu0 }
 0x5ce   : > { %9915 = vst [vmem:[#allocation24_spill] sm:$0xff] %v9567_v9  ;;  %v9573_v59 = vpop.f32.mrf.mxu1 }
 0x5cf   : > { %9917 = vst [vmem:[#allocation27_spill] sm:$0xff] %v9571_v12 }
 0x5d0   : > { %v9553_v21 = vpop.f32.mrf.mxu2  ;;  %9918 = vst [vmem:[#allocation25_spill] sm:$0xff] %v9573_v59 }
 0x5d5   : > { %6041 = vmatmul.msk.f32.gmra.mxu2 %vm4064_vm14, %v9083_v58  ;;  %v9579_v18 = vpop.f32.mrf.mxu3  ;;  %v9581_v25 = vpop.f32.mrf.mxu0 }
 0x5d6   : > { %9920 = vst [vmem:[#allocation28_spill] sm:$0xff] %v9579_v18 }
 0x5d7   : > { %9921 = vst [vmem:[#allocation23_spill] sm:$0xff] %v9581_v25 }
 0x5d8   : > { %v9561_v6 = vpop.f32.mrf.mxu2 }
 0x5dd   : > { %6042 = vmatmul.msk.f32.gmra.mxu2 %vm4064_vm14, %v9141_v31  ;;  %v9585_v31 = vpop.f32.mrf.mxu1  ;;  %v5109_v12 = vpop.f32.mrf.mxu3 }
 0x5de   : > { %9922 = vst [vmem:[#allocation34_spill] sm:$0xff] %v9585_v31  ;;  %v5263_v59 = vpop.f32.mrf.mxu0  ;;  %v4354_v31 = vadd.f32 %v9487_v0, %v9263_v30 }
 0x5e0   : > { %v9569_v20 = vpop.f32.mrf.mxu2 }
 0x5e1   : > { %9916 = vst [vmem:[#allocation19_spill] sm:$0xff] %v9569_v20 }
 0x5e5   : > { %6043 = vmatmul.msk.f32.gmra.mxu2 %vm4064_vm14, %v9184_v39  ;;  %v5417_v39 = vpop.f32.mrf.mxu1  ;;  %v5112_v25 = vpop.f32.mrf.mxu3 }
 0x5e6   : > { %v5266_v18 = vpop.f32.mrf.mxu0 }
 0x5e8   : > { %v9577_v58 = vpop.f32.mrf.mxu2 }
 0x5e9   : > { %9919 = vst [vmem:[#allocation21_spill] sm:$0xff] %v9577_v58 }
 0x5ed   : > { %6044 = vmatmul.msk.f32.gmra.mxu2 %vm4064_vm14, %v9225_v46  ;;  %v5420_v58 = vpop.f32.mrf.mxu1 }
 0x5ee   : > { %v5269_v57 = vpop.f32.mrf.mxu0 }
 0x5f0   : > { %v9587_v38 = vpop.f32.mrf.mxu2 }
 0x5f1   : > { %9923 = vst [vmem:[#allocation35_spill] sm:$0xff] %v9587_v38  ;;  %v5115_v38 = vpop.f32.mrf.mxu3 }
 0x5f5   : > { %6045 = vmatmul.msk.f32.gmra.mxu2 %vm4064_vm14, %v9243_v17  ;;  %v4539_v17 = vadd.f32 %v9348_v49, %v4354_v31  ;;  %v5423_v20 = vpop.f32.mrf.mxu1 }
 0x5f8   : > { %v9591_v9 = vpop.f32.mrf.mxu2 }
 0x5f9   : > { %9924 = vst [vmem:[#allocation36_spill] sm:$0xff] %v9591_v9  ;;  %v5118_v31 = vpop.f32.mrf.mxu3 }
 0x5fd   : > { %6046 = vmatmul.msk.f32.gmra.mxu2 %vm4064_vm14, %v9452_v61  ;;  %v4357_v61 = vadd.f32 %v9496_v48, %v9278_v63  ;;  %v5272_v63 = vpop.f32.mrf.mxu0  ;;  %v5426_v48 = vpop.f32.mrf.mxu1 }
 0x5ff   : > { %v4540_v30 = vadd.f32 %v9369_v14, %v4357_v61  ;;  %v9617_v14 = vld [vmem:[%s9764_s8] ss:$0 sm:$0xff] }
 0x600   : > { %v9595_v46 = vpop.f32.mrf.mxu2 }
 0x601   : > { %9925 = vst [vmem:[#allocation37_spill] sm:$0xff] %v9595_v46  ;;  %v4694_v46 = vadd.f32 %v9363_v33, %v4539_v17  ;;  %v4695_v44 = vadd.f32 %v9381_v23, %v4540_v30 }
 0x603   : > { %v4849_v17 = vadd.f32 %v9383_v42, %v4695_v44  ;;  %v5121_v44 = vpop.f32.mrf.mxu3 }
 0x605   : > { %6047 = vmatmul.msk.f32.gmra.mxu2 %vm4064_vm14, %v9469_v54  ;;  %v4848_v54 = vadd.f32 %v9365_v16, %v4694_v46  ;;  %v5429_v30 = vpop.f32.mrf.mxu1 }
 0x608   : > { %v9603_v9 = vpop.f32.mrf.mxu2 }
 0x609   : > { %9926 = vst [vmem:[#allocation38_spill] sm:$0xff] %v9603_v9  ;;  %v4360_v9 = vadd.f32 %v9499_v11, %v9292_v3  ;;  %v4363_v11 = vadd.f32 %v9509_v13, %v9302_v2  ;;  %v4366_v2 = vadd.f32 %v9517_v50, %v9315_v19  ;;  %v4369_v19 = vadd.f32 %v9525_v60, %v9325_v32 }
 0x60a   : > { %v4372_v32 = vadd.f32 %v9533_v24, %v9338_v47  ;;  %v4375_v47 = vadd.f32 %v9543_v55, %v9350_v5  ;;  %v4378_v5 = vadd.f32 %v9553_v21, %v9367_v29  ;;  %v4381_v29 = vadd.f32 %v9561_v6, %v9379_v56  ;;  %v9928_v56 = vld [vmem:[#allocation29_spill] sm:$0xff]  ;;  %v9929_v6 = vld [vmem:[#allocation19_spill] sm:$0xff] }
 0x60b   : > { %v4541_v16 = vadd.f32 %v9385_v43, %v4360_v9  ;;  %v4542_v9 = vadd.f32 %v9404_v22, %v4363_v11  ;;  %v4543_v22 = vadd.f32 %v9428_v35, %v4366_v2  ;;  %v4544_v35 = vadd.f32 %v9446_v51, %v4369_v19 }
 0x60d   : > { %v4696_v42 = vadd.f32 %v9400_v34, %v4541_v16 }
 0x60f   : > { %v4850_v61 = vadd.f32 %v9402_v4, %v4696_v42 }
 0x610   : > { %v4954_v0 = vpop.f32.mrf.mxu2 }
 0x611   : > { %v5002_v49 = vadd.f32 %v4954_v0, %v4848_v54 }
 0x613   : > { %v5157_v7 = vadd.f32 %v5109_v12, %v5002_v49  ;;  %v5275_v12 = vpop.f32.mrf.mxu0 }
 0x615   : > { %v5311_v33 = vadd.f32 %v5263_v59, %v5157_v7 }
 0x617   : > { %v5465_v46 = vadd.f32 %v5417_v39, %v5311_v33 }
 0x618   : > { %v4957_v3 = vpop.f32.mrf.mxu2 }
 0x619   : > { %v5485_v23 = vadd.f32 %v9617_v14, %v5465_v46  ;;  %v5003_v7 = vadd.f32 %v4957_v3, %v4849_v17  ;;  %v5432_v3 = vpop.f32.mrf.mxu1 }
 0x61b   : > { %5502 = vst.msk [vmem:[%s9624_s21] sm:$0xff] %vm5501_vm6, %v5485_v23  ;;  %v5158_v43 = vadd.f32 %v5112_v25, %v5003_v7  ;;  %v4697_v25 = vadd.f32 %v9416_v26, %v4542_v9  ;;  %v5278_v33 = vpop.f32.mrf.mxu0 }
 0x61d   : > { %v5312_v59 = vadd.f32 %v5266_v18, %v5158_v43  ;;  %v5124_v18 = vpop.f32.mrf.mxu3  ;;  %v4851_v4 = vadd.f32 %v9422_v40, %v4697_v25 }
 0x61f   : > { %v5466_v39 = vadd.f32 %v5420_v58, %v5312_v59 }
 0x620   : > { %v4960_v54 = vpop.f32.mrf.mxu2 }
 0x621   : > { %v5486_v0 = vadd.f32 %v9617_v14, %v5466_v39  ;;  %v5004_v49 = vadd.f32 %v4960_v54, %v4850_v61  ;;  %v4546_v61 = vadd.f32 %v9481_v62, %v4375_v47  ;;  %v4547_v62 = vadd.f32 %v9501_v37, %v4378_v5 }
 0x622   : > { %v4548_v37 = vadd.f32 %v9513_v36, %v4381_v29  ;;  %v9931_v36 = vld [vmem:[#allocation6_spill] sm:$0xff] }
 0x623   : > { %5503 = vst.msk [vmem:[%s9624_s21 + $0x8] sm:$0xff] %vm5501_vm6, %v5486_v0  ;;  %v5159_v34 = vadd.f32 %v5115_v38, %v5004_v49  ;;  %v4698_v38 = vadd.f32 %v9440_v52, %v4543_v22  ;;  %v5281_v43 = vpop.f32.mrf.mxu0  ;;  %v4699_v52 = vadd.f32 %v9460_v41, %v4544_v35  ;;  %v4384_v35 = vadd.f32 %v9929_v6, %v9928_v56  ;;  %v9947_v56 = vld [vmem:[#allocation18_spill] sm:$0xff] }
 0x625   : > { %v5313_v13 = vadd.f32 %v5269_v57, %v5159_v34  ;;  %v4852_v40 = vadd.f32 %v9442_v53, %v4698_v38  ;;  %v5127_v50 = vpop.f32.mrf.mxu3 }
 0x627   : > { %v5467_v58 = vadd.f32 %v5423_v20, %v5313_v13 }
 0x628   : > { %v4963_v16 = vpop.f32.mrf.mxu2 }
 0x629   : > { %v5487_v46 = vadd.f32 %v9617_v14, %v5467_v58  ;;  %v5005_v17 = vadd.f32 %v4963_v16, %v4851_v4 }
 0x62b   : > { %5504 = vst.msk [vmem:[%s9624_s21 + $0x10] sm:$0xff] %vm5501_vm6, %v5487_v46  ;;  %v5160_v26 = vadd.f32 %v5118_v31, %v5005_v17  ;;  %v5435_v31 = vpop.f32.mrf.mxu1 }
 0x62d   : > { %v5314_v57 = vadd.f32 %v5272_v63, %v5160_v26  ;;  %v4545_v63 = vadd.f32 %v9464_v10, %v4372_v32  ;;  %v5130_v39 = vpop.f32.mrf.mxu3 }
 0x62f   : > { %v5468_v20 = vadd.f32 %v5426_v48, %v5314_v57  ;;  %v4853_v48 = vadd.f32 %v9462_v8, %v4699_v52  ;;  %v4700_v41 = vadd.f32 %v9477_v27, %v4545_v63  ;;  %v4701_v27 = vadd.f32 %v9490_v28, %v4546_v61  ;;  %v9933_v63 = vld [vmem:[#allocation30_spill] sm:$0xff] }
 0x630   : > { %v4966_v23 = vpop.f32.mrf.mxu2  ;;  %v4702_v28 = vadd.f32 %v9505_v15, %v4547_v62 }
 0x631   : > { %v5488_v7 = vadd.f32 %v9617_v14, %v5468_v20  ;;  %v5006_v11 = vadd.f32 %v4966_v23, %v4852_v40  ;;  %v9930_v20 = vld [vmem:[#allocation10_spill] sm:$0xff]  ;;  %v4549_v23 = vadd.f32 %v9931_v36, %v4384_v35  ;;  %v9949_v36 = vld [vmem:[#allocation37_spill] sm:$0xff] }
 0x632   : > { %v4703_v40 = vadd.f32 %v9930_v20, %v4548_v37 }
 0x633   : > { %5505 = vst.msk [vmem:[%s9624_s21 + $0x18] sm:$0xff] %vm5501_vm6, %v5488_v7  ;;  %v5161_v60 = vadd.f32 %v5121_v44, %v5006_v11  ;;  %v5284_v44 = vpop.f32.mrf.mxu0  ;;  %v5438_v10 = vpop.f32.mrf.mxu1  ;;  %v9932_v11 = vld [vmem:[#allocation11_spill] sm:$0xff] }
 0x635   : > { %v5315_v51 = vadd.f32 %v5275_v12, %v5161_v60  ;;  %v5133_v2 = vpop.f32.mrf.mxu3 }
 0x637   : > { %v5469_v53 = vadd.f32 %v5429_v30, %v5315_v51  ;;  %v4854_v30 = vadd.f32 %v9479_v45, %v4700_v41  ;;  %v4855_v45 = vadd.f32 %v9492_v1, %v4701_v27  ;;  %v9927_v1 = vld [vmem:[#allocation8_spill] sm:$0xff]  ;;  %v9940_v27 = vld [vmem:[#allocation14_spill] sm:$0xff] }
 0x638   : > { %v4969_v42 = vpop.f32.mrf.mxu2  ;;  %v4856_v17 = vadd.f32 %v9927_v1, %v4702_v28  ;;  %v9943_v28 = vld [vmem:[#allocation31_spill] sm:$0xff] }
 0x639   : > { %v5489_v59 = vadd.f32 %v9617_v14, %v5469_v53  ;;  %v5007_v9 = vadd.f32 %v4969_v42, %v4853_v48  ;;  %v9934_v53 = vld [vmem:[#allocation21_spill] sm:$0xff] }
 0x63a   : > { %v4387_v48 = vadd.f32 %v9934_v53, %v9933_v63  ;;  %v9952_v63 = vld [vmem:[#allocation26_spill] sm:$0xff] }
 0x63b   : > { %5506 = vst.msk [vmem:[%s9624_s21 + $0x20] sm:$0xff] %vm5501_vm6, %v5489_v59  ;;  %v5162_v24 = vadd.f32 %v5124_v18, %v5007_v9  ;;  %v5287_v25 = vpop.f32.mrf.mxu0  ;;  %v5441_v18 = vpop.f32.mrf.mxu1  ;;  %v9935_v59 = vld [vmem:[#allocation12_spill] sm:$0xff] }
 0x63c   : > { %v4704_v9 = vadd.f32 %v9935_v59, %v4549_v23 }
 0x63d   : > { %v5316_v12 = vadd.f32 %v5278_v33, %v5162_v24  ;;  %v5136_v16 = vpop.f32.mrf.mxu3  ;;  %v9936_v24 = vld [vmem:[#allocation15_spill] sm:$0xff] }
 0x63e   : > { %v4550_v41 = vadd.f32 %v9936_v24, %v4387_v48  ;;  %v9954_v24 = vld [vmem:[#allocation38_spill] sm:$0xff] }
 0x63f   : > { %v5470_v8 = vadd.f32 %v5432_v3, %v5316_v12  ;;  %v9937_v12 = vld [vmem:[#allocation13_spill] sm:$0xff] }
 0x640   : > { %v4972_v54 = vpop.f32.mrf.mxu2 }
 0x641   : > { %v5490_v0 = vadd.f32 %v9617_v14, %v5470_v8  ;;  %v5008_v49 = vadd.f32 %v4972_v54, %v4854_v30 }
 0x643   : > { %5507 = vst.msk [vmem:[%s9624_s21 + $0x28] sm:$0xff] %vm5501_vm6, %v5490_v0  ;;  %v5163_v55 = vadd.f32 %v5127_v50, %v5008_v49  ;;  %v5290_v3 = vpop.f32.mrf.mxu0  ;;  %v5444_v57 = vpop.f32.mrf.mxu1  ;;  %v9938_v0 = vld [vmem:[#allocation32_spill] sm:$0xff]  ;;  %v9939_v49 = vld [vmem:[#allocation35_spill] sm:$0xff] }
 0x644   : > { %v4390_v5 = vadd.f32 %v9939_v49, %v9938_v0  ;;  %v9957_v0 = vld [vmem:[#allocation25_spill] sm:$0xff] }
 0x645   : > { %v5317_v34 = vadd.f32 %v5281_v43, %v5163_v55  ;;  %v4857_v43 = vadd.f32 %v9932_v11, %v4703_v40  ;;  %v5139_v32 = vpop.f32.mrf.mxu3  ;;  %v9950_v11 = vld [vmem:[#allocation20_spill] sm:$0xff] }
 0x647   : > { %v5471_v13 = vadd.f32 %v5435_v31, %v5317_v34 }
 0x648   : > { %v4975_v22 = vpop.f32.mrf.mxu2 }
 0x649   : > { %v5491_v58 = vadd.f32 %v9617_v14, %v5471_v13  ;;  %v5009_v4 = vadd.f32 %v4975_v22, %v4855_v45  ;;  %v9941_v13 = vld [vmem:[#allocation22_spill] sm:$0xff]  ;;  %v9942_v22 = vld [vmem:[#allocation16_spill] sm:$0xff] }
 0x64a   : > { %v4551_v45 = vadd.f32 %v9941_v13, %v4390_v5 }
 0x64b   : > { %5508 = vst.msk [vmem:[%s9624_s21 + $0x30] sm:$0xff] %vm5501_vm6, %v5491_v58  ;;  %v5164_v21 = vadd.f32 %v5130_v39, %v5009_v4  ;;  %v5293_v51 = vpop.f32.mrf.mxu0  ;;  %v5447_v39 = vpop.f32.mrf.mxu1 }
 0x64d   : > { %v5318_v33 = vadd.f32 %v5284_v44, %v5164_v21  ;;  %v5142_v54 = vpop.f32.mrf.mxu3 }
 0x64f   : > { %v5472_v46 = vadd.f32 %v5438_v10, %v5318_v33  ;;  %v4858_v10 = vadd.f32 %v9937_v12, %v4704_v9  ;;  %v9944_v33 = vld [vmem:[#allocation36_spill] sm:$0xff]  ;;  %v9955_v12 = vld [vmem:[#allocation27_spill] sm:$0xff] }
 0x650   : > { %v4978_v19 = vpop.f32.mrf.mxu2 }
 0x651   : > { %v5492_v26 = vadd.f32 %v9617_v14, %v5472_v46  ;;  %v5010_v38 = vadd.f32 %v4978_v19, %v4856_v17  ;;  %v9945_v46 = vld [vmem:[#allocation17_spill] sm:$0xff] }
 0x652   : > { %v4706_v1 = vadd.f32 %v9945_v46, %v4551_v45 }
 0x653   : > { %5509 = vst.msk [vmem:[%s9624_s21 + $0x38] sm:$0xff] %vm5501_vm6, %v5492_v26  ;;  %v5165_v15 = vadd.f32 %v5133_v2, %v5010_v38  ;;  %v4705_v2 = vadd.f32 %v9940_v27, %v4550_v41  ;;  %v5296_v34 = vpop.f32.mrf.mxu0  ;;  %v5450_v62 = vpop.f32.mrf.mxu1  ;;  %v9946_v26 = vld [vmem:[#allocation7_spill] sm:$0xff] }
 0x654   : > { %v4860_v6 = vadd.f32 %v9947_v56, %v4706_v1 }
 0x655   : > { %v5319_v50 = vadd.f32 %v5287_v25, %v5165_v15  ;;  %v4859_v58 = vadd.f32 %v9942_v22, %v4705_v2  ;;  %v5145_v17 = vpop.f32.mrf.mxu3 }
 0x657   : > { %v5473_v7 = vadd.f32 %v5441_v18, %v5319_v50  ;;  %v9948_v50 = vld [vmem:[#allocation33_spill] sm:$0xff] }
 0x658   : > { %v4981_v60 = vpop.f32.mrf.mxu2  ;;  %v4396_v23 = vadd.f32 %v9949_v36, %v9948_v50 }
 0x659   : > { %v5493_v52 = vadd.f32 %v9617_v14, %v5473_v7  ;;  %v5011_v31 = vadd.f32 %v4981_v60, %v4857_v43 }
 0x65b   : > { %5510 = vst.msk [vmem:[%s9624_s21 + $0x40] sm:$0xff] %vm5501_vm6, %v5493_v52  ;;  %v5166_v42 = vadd.f32 %v5136_v16, %v5011_v31  ;;  %v4393_v16 = vadd.f32 %v9944_v33, %v9943_v28  ;;  %v5299_v19 = vpop.f32.mrf.mxu0  ;;  %v5453_v35 = vpop.f32.mrf.mxu1  ;;  %v9951_v52 = vld [vmem:[#allocation24_spill] sm:$0xff] }
 0x65c   : > { %v4553_v31 = vadd.f32 %v9951_v52, %v4396_v23 }
 0x65d   : > { %v5320_v47 = vadd.f32 %v5290_v3, %v5166_v42  ;;  %v4552_v38 = vadd.f32 %v9946_v26, %v4393_v16  ;;  %v5148_v60 = vpop.f32.mrf.mxu3 }
 0x65f   : > { %v5474_v44 = vadd.f32 %v5444_v57, %v5320_v47  ;;  %v4707_v43 = vadd.f32 %v9950_v11, %v4552_v38  ;;  %v9953_v47 = vld [vmem:[#allocation9_spill] sm:$0xff] }
 0x660   : > { %v4984_v61 = vpop.f32.mrf.mxu2  ;;  %v4399_v41 = vadd.f32 %v9954_v24, %v9953_v47 }
 0x661   : > { %v5494_v8 = vadd.f32 %v9617_v14, %v5474_v44  ;;  %v5012_v30 = vadd.f32 %v4984_v61, %v4858_v10  ;;  %v4861_v53 = vadd.f32 %v9952_v63, %v4707_v43  ;;  %v4708_v10 = vadd.f32 %v9955_v12, %v4553_v31 }
 0x663   : > { %5511 = vst.msk [vmem:[%s9624_s21 + $0x48] sm:$0xff] %vm5501_vm6, %v5494_v8  ;;  %v5167_v55 = vadd.f32 %v5139_v32, %v5012_v30  ;;  %v5302_v48 = vpop.f32.mrf.mxu0  ;;  %v9956_v8 = vld [vmem:[#allocation28_spill] sm:$0xff]  ;;  %v4862_v49 = vadd.f32 %v9957_v0, %v4708_v10 }
 0x664   : > { %v4554_v30 = vadd.f32 %v9956_v8, %v4399_v41 }
 0x665   : > { %v5321_v25 = vadd.f32 %v5293_v51, %v5167_v55  ;;  %v5151_v5 = vpop.f32.mrf.mxu3 }
 0x667   : > { %v5475_v18 = vadd.f32 %v5447_v39, %v5321_v25  ;;  %v5456_v39 = vpop.f32.mrf.mxu1 }
 0x668   : > { %v4987_v4 = vpop.f32.mrf.mxu2 }
 0x669   : > { %v5495_v29 = vadd.f32 %v9617_v14, %v5475_v18  ;;  %v5013_v21 = vadd.f32 %v4987_v4, %v4859_v58  ;;  %v9959_v58 = vld [vmem:[#allocation34_spill] sm:$0xff] }
 0x66b   : > { %5512 = vst.msk [vmem:[%s9624_s21 + $0x50] sm:$0xff] %vm5501_vm6, %v5495_v29  ;;  %v5168_v37 = vadd.f32 %v5142_v54, %v5013_v21 }
 0x66d   : > { %v5322_v3 = vadd.f32 %v5296_v34, %v5168_v37  ;;  %v5305_v34 = vpop.f32.mrf.mxu0  ;;  %v5154_v33 = vpop.f32.mrf.mxu3 }
 0x66f   : > { %v5476_v57 = vadd.f32 %v5450_v62, %v5322_v3  ;;  %v9958_v62 = vld [vmem:[#allocation23_spill] sm:$0xff]  ;;  %v5459_v45 = vpop.f32.mrf.mxu1 }
 0x670   : > { %v4990_v15 = vpop.f32.mrf.mxu2  ;;  %v4709_v13 = vadd.f32 %v9958_v62, %v4554_v30 }
 0x671   : > { %v5496_v20 = vadd.f32 %v9617_v14, %v5476_v57  ;;  %v5014_v40 = vadd.f32 %v4990_v15, %v4860_v6 }
 0x672   : > { %v4863_v4 = vadd.f32 %v9959_v58, %v4709_v13 }
 0x673   : > { %5513 = vst.msk [vmem:[%s9624_s21 + $0x58] sm:$0xff] %vm5501_vm6, %v5496_v20  ;;  %v5169_v7 = vadd.f32 %v5145_v17, %v5014_v40 }
 0x675   : > { %v5323_v32 = vadd.f32 %v5299_v19, %v5169_v7  ;;  %v5308_v37 = vpop.f32.mrf.mxu0 }
 0x677   : > { %v5477_v51 = vadd.f32 %v5453_v35, %v5323_v32  ;;  %v5462_v1 = vpop.f32.mrf.mxu1 }
 0x678   : > { %v4993_v42 = vpop.f32.mrf.mxu2 }
 0x679   : > { %v5497_v59 = vadd.f32 %v9617_v14, %v5477_v51  ;;  %v5015_v9 = vadd.f32 %v4993_v42, %v4861_v53 }
 0x67b   : > { %5514 = vst.msk [vmem:[%s9624_s21 + $0x60] sm:$0xff] %vm5501_vm6, %v5497_v59  ;;  %v5170_v44 = vadd.f32 %v5148_v60, %v5015_v9 }
 0x67d   : > { %v5324_v61 = vadd.f32 %v5302_v48, %v5170_v44 }
 0x67f   : > { %v5478_v54 = vadd.f32 %v5456_v39, %v5324_v61 }
 0x680   : > { %v4996_v55 = vpop.f32.mrf.mxu2 }
 0x681   : > { %v5498_v27 = vadd.f32 %v9617_v14, %v5478_v54  ;;  %v5016_v2 = vadd.f32 %v4996_v55, %v4862_v49 }
 0x683   : > { %5515 = vst.msk [vmem:[%s9624_s21 + $0x68] sm:$0xff] %vm5501_vm6, %v5498_v27  ;;  %v5171_v25 = vadd.f32 %v5151_v5, %v5016_v2 }
 0x685   : > { %v5325_v18 = vadd.f32 %v5305_v34, %v5171_v25 }
 0x687   : > { %v5479_v22 = vadd.f32 %v5459_v45, %v5325_v18 }
 0x688   : > { %v4999_v29 = vpop.f32.mrf.mxu2 }
 0x689   : > { %v5499_v21 = vadd.f32 %v9617_v14, %v5479_v22  ;;  %v5017_v28 = vadd.f32 %v4999_v29, %v4863_v4 }
 0x68b   : > { %5516 = vst.msk [vmem:[%s9624_s21 + $0x70] sm:$0xff] %vm5501_vm6, %v5499_v21  ;;  %v5172_v16 = vadd.f32 %v5154_v33, %v5017_v28 }
 0x68d   : > { %v5326_v46 = vadd.f32 %v5308_v37, %v5172_v16 }
 0x68f   : > { %v5480_v17 = vadd.f32 %v5462_v1, %v5326_v46 }
 0x691   : > { %v5500_v3 = vadd.f32 %v9617_v14, %v5480_v17 }
 0x693   : > { %5517 = vst.msk [vmem:[%s9624_s21 + $0x78] sm:$0xff] %vm5501_vm6, %v5500_v3 }
 0x694 PF: > { %s19_s13 = sadd.s32 1, %s6228_s13   ;;  %s9960_s30 = smov %s6220_s11 }
 0x695   : > { %p16_p8 = scmp.ge.s32.totalorder %s19_s13, 6   ;;  %s9961_s10 = smov %s6224_s12 }
 0x696   : > { %s9962_s11 = smov %s9965_s14  ;;  %s9963_s12 = smov %s9969_s15 }
 0x697   :  { %18 = sbr.rel (!%p16_p8) target bundleno = 3 (0x3), region = 116 }

</bundles_post_ra>
